<compile_context>
chip_gen: v6e
topology: v6e:2x2x1
jax: 0.10.0
libtpu: 0.0.40
codegen_flags: <defaults>
</compile_context>

<pallas_src>
import functools

import jax
import jax.numpy as jnp
from jax.experimental import pallas as pl
from jax.experimental.pallas import tpu as pltpu

INPUT_DIM = 784
HIDDEN_DIM = 400
HIDDEN_PAD = 512            # 400 -> 512: lane-dense hidden activations
LATENT_DIM = 20
LATENT_PAD = 128            # latent lanes padded to a full 128-lane vreg width
ML_WIDTH = 2 * LATENT_PAD   # fused [mu | logvar] output width (256)


def _round_up(n, m):
    return ((n + m - 1) // m) * m


# ----------------------------------------------------------------------------
# Parameters
# ----------------------------------------------------------------------------
def init_params(key):
    """Logical (PyTorch-shaped) params; weights stored as (in, out)."""
    ks = jax.random.split(key, 10)

    def linear(kw, kb, fan_in, fan_out):
        bound = 1.0 / jnp.sqrt(jnp.float32(fan_in))
        w = jax.random.uniform(kw, (fan_in, fan_out), jnp.float32, -bound, bound)
        b = jax.random.uniform(kb, (1, fan_out), jnp.float32, -bound, bound)
        return w, b

    w1, b1 = linear(ks[0], ks[1], INPUT_DIM, HIDDEN_DIM)      # encoder.fc1
    wmu, bmu = linear(ks[2], ks[3], HIDDEN_DIM, LATENT_DIM)   # encoder.fc_mu
    wlv, blv = linear(ks[4], ks[5], HIDDEN_DIM, LATENT_DIM)   # encoder.fc_logvar
    wd1, bd1 = linear(ks[6], ks[7], LATENT_DIM, HIDDEN_DIM)   # decoder.fc1
    wd2, bd2 = linear(ks[8], ks[9], HIDDEN_DIM, INPUT_DIM)    # decoder.fc2
    return (w1, b1, wmu, bmu, wlv, blv, wd1, bd1, wd2, bd2)


def pack_params(params):
    """Pad / fuse / cast logical params into the kernel layout.

    Invariant: every padded weight/bias entry is exactly zero, so the extra
    lanes contribute nothing to any contraction.
    """
    w1, b1, wmu, bmu, wlv, blv, wd1, bd1, wd2, bd2 = params
    f32, bf16 = jnp.float32, jnp.bfloat16

    # Encoder fc1 with hidden dim padded 400 -> 512 (zero cols).
    w1p = jnp.zeros((INPUT_DIM, HIDDEN_PAD), f32).at[:, :HIDDEN_DIM].set(w1)
    b1p = jnp.zeros((1, HIDDEN_PAD), f32).at[:, :HIDDEN_DIM].set(b1)

    # Fused encoder head: cols [0,128) -> mu (valid 0:20),
    #                     cols [128,256) -> logvar (valid 128:148).
    # Rows 400:512 are zero (they only ever see h == 0 anyway).
    wml = jnp.zeros((HIDDEN_PAD, ML_WIDTH), f32)
    wml = wml.at[:HIDDEN_DIM, :LATENT_DIM].set(wmu)
    wml = wml.at[:HIDDEN_DIM, LATENT_PAD:LATENT_PAD + LATENT_DIM].set(wlv)
    bml = jnp.zeros((1, ML_WIDTH), f32)
    bml = bml.at[:, :LATENT_DIM].set(bmu)
    bml = bml.at[:, LATENT_PAD:LATENT_PAD + LATENT_DIM].set(blv)

    # Decoder fc1: contraction padded 20 -> 128 (zero rows), hidden padded
    # 400 -> 512 (zero cols).
    wd1p = jnp.zeros((LATENT_PAD, HIDDEN_PAD), f32)
    wd1p = wd1p.at[:LATENT_DIM, :HIDDEN_DIM].set(wd1)
    bd1p = jnp.zeros((1, HIDDEN_PAD), f32).at[:, :HIDDEN_DIM].set(bd1)

    # Decoder fc2: contraction padded 400 -> 512 (zero rows).
    wd2p = jnp.zeros((HIDDEN_PAD, INPUT_DIM), f32).at[:HIDDEN_DIM, :].set(wd2)

    return (w1p.astype(bf16), b1p, wml.astype(bf16), bml,
            wd1p.astype(bf16), bd1p, wd2p.astype(bf16), bd2)


# ----------------------------------------------------------------------------
# Kernel
# ----------------------------------------------------------------------------
def vae_kernel(x_ref, eps_ref, w1_ref, b1_ref, wml_ref, bml_ref,
               wd1_ref, bd1_ref, wd2_ref, bd2_ref, xrec_ref, ml_ref):
    bf16, f32 = jnp.bfloat16, jnp.float32

    # ---- Encoder fc1 + relu (bf16 in, f32 accumulate) ----
    x = x_ref[...]                                                  # (TB, 784) bf16
    h = jnp.dot(x, w1_ref[...], preferred_element_type=f32) + b1_ref[...]
    h = jnp.maximum(h, 0.0).astype(bf16)                            # (TB, 512)

    # ---- Fused mu/logvar matmul (single MXU push, N=256) ----
    ml = jnp.dot(h, wml_ref[...], preferred_element_type=f32) + bml_ref[...]
    ml_ref[...] = ml.astype(bf16)                                   # lane-dense (TB, 256)

    mu_pad = ml[:, :LATENT_PAD]        # cols 20:128 are exactly 0
    logvar_pad = ml[:, LATENT_PAD:]    # cols 20:128 are exactly 0

    # ---- Reparameterize on lane-dense 128-wide tiles (full f32 internally) ----
    # eps cols 20:128 are 0, so z cols 20:128 == 0 + 0*exp(0) == 0.
    std = jnp.exp(0.5 * logvar_pad)
    z = (mu_pad + eps_ref[...].astype(f32) * std).astype(bf16)      # (TB, 128)

    # ---- Decoder (K padded 20 -> 128; padded wd1 rows are zero) ----
    hd = jnp.dot(z, wd1_ref[...], preferred_element_type=f32) + bd1_ref[...]
    hd = jnp.maximum(hd, 0.0).astype(bf16)                          # (TB, 512)
    logits = jnp.dot(hd, wd2_ref[...], preferred_element_type=f32) + bd2_ref[...]
    xrec_ref[...] = jax.nn.sigmoid(logits).astype(bf16)             # (TB, 784)


# ----------------------------------------------------------------------------
# Wrapper
# ----------------------------------------------------------------------------
@functools.partial(jax.jit, static_argnames=("tile_b",))
def vae_forward(x_nchw, eps, packed_params, *, tile_b=256):
    """Mirrors VAE.forward: returns (x_recon, mu, logvar) (bf16 outputs)."""
    # x.view(-1, 784); cast once (fused with the reshape/pad) to bf16 streaming.
    x = x_nchw.reshape(-1, INPUT_DIM).astype(jnp.bfloat16)
    B = x.shape[0]

    # Keep >= 2 grid steps whenever B allows (v7x: feed both TensorCores),
    # while never exceeding tile_b; always a multiple of 8.
    half = _round_up(max(-(-B // 2), 1), 8)
    tb = max(8, min(tile_b, half))
    Bp = _round_up(B, tb)
    if Bp != B:
        x = jnp.pad(x, ((0, Bp - B), (0, 0)))

    # Lane-pad eps to 128 (padded entries exactly zero), bf16 streaming.
    eps_pad = jnp.zeros((Bp, LATENT_PAD), jnp.bfloat16)
    eps_pad = eps_pad.at[:B, :LATENT_DIM].set(eps.astype(jnp.bfloat16))

    tiled = lambda i: (i, 0)
    const = lambda i: (0, 0)

    in_specs = [
        pl.BlockSpec((tb, INPUT_DIM), tiled),            # x    (bf16)
        pl.BlockSpec((tb, LATENT_PAD), tiled),           # eps  (bf16)
        pl.BlockSpec((INPUT_DIM, HIDDEN_PAD), const),    # w1   (bf16)
        pl.BlockSpec((1, HIDDEN_PAD), const),            # b1   (f32)
        pl.BlockSpec((HIDDEN_PAD, ML_WIDTH), const),     # wml  (bf16, fused)
        pl.BlockSpec((1, ML_WIDTH), const),              # bml  (f32)
        pl.BlockSpec((LATENT_PAD, HIDDEN_PAD), const),   # wd1  (bf16, K-padded)
        pl.BlockSpec((1, HIDDEN_PAD), const),            # bd1  (f32)
        pl.BlockSpec((HIDDEN_PAD, INPUT_DIM), const),    # wd2  (bf16)
        pl.BlockSpec((1, INPUT_DIM), const),             # bd2  (f32)
    ]
    out_specs = (
        pl.BlockSpec((tb, INPUT_DIM), tiled),            # x_recon        (bf16)
        pl.BlockSpec((tb, ML_WIDTH), tiled),             # [mu | logvar]  (bf16)
    )
    out_shape = (
        jax.ShapeDtypeStruct((Bp, INPUT_DIM), jnp.bfloat16),
        jax.ShapeDtypeStruct((Bp, ML_WIDTH), jnp.bfloat16),
    )

    weight_bytes = sum(int(p.size) * p.dtype.itemsize for p in packed_params)
    flops = 2 * Bp * (INPUT_DIM * HIDDEN_PAD + HIDDEN_PAD * ML_WIDTH
                      + LATENT_PAD * HIDDEN_PAD + HIDDEN_PAD * INPUT_DIM)
    cost = pl.CostEstimate(
        flops=flops,
        transcendentals=Bp * (LATENT_PAD + INPUT_DIM),
        bytes_accessed=(Bp * INPUT_DIM * 2            # x in (bf16)
                        + Bp * LATENT_PAD * 2         # eps in (bf16)
                        + weight_bytes                # resident params
                        + Bp * INPUT_DIM * 2          # x_recon out (bf16)
                        + Bp * ML_WIDTH * 2),         # mu/logvar slab out (bf16)
    )

    xrec_p, ml_p = pl.pallas_call(
        vae_kernel,
        grid=(Bp // tb,),
        in_specs=in_specs,
        out_specs=out_specs,
        out_shape=out_shape,
        compiler_params=pltpu.CompilerParams(
            # Batch tiles are independent -> shard across TCs where available.
            dimension_semantics=(pltpu.PARALLEL,),
            # ~8 MB footprint at TB=256 with bf16 I/O; 32 MiB is safe on
            # v5e/v6e (128 MiB physical) and v7x (64 MiB physical).
            vmem_limit_bytes=32 * 1024 * 1024,
        ),
        cost_estimate=cost,
    )(x, eps_pad, *packed_params)

    x_recon = xrec_p[:B]
    mu = ml_p[:B, :LATENT_DIM]
    logvar = ml_p[:B, LATENT_PAD:LATENT_PAD + LATENT_DIM]
    return x_recon, mu, logvar


# ----------------------------------------------------------------------------
# Pure-JAX reference (same bf16-input / f32-accumulate math) for validation
# ----------------------------------------------------------------------------
def vae_reference(x_nchw, eps, params):
    w1, b1, wmu, bmu, wlv, blv, wd1, bd1, wd2, bd2 = params
    bf16, f32 = jnp.bfloat16, jnp.float32
    x = x_nchw.reshape(-1, INPUT_DIM).astype(bf16).astype(f32)
    eps_b = eps.astype(bf16).astype(f32)

    def mm(a, w):
        return jnp.dot(a.astype(bf16), w.astype(bf16), preferred_element_type=f32)

    h = jnp.maximum(mm(x, w1) + b1, 0.0)
    mu = mm(h, wmu) + bmu
    logvar = mm(h, wlv) + blv
    z = mu + eps_b * jnp.exp(0.5 * logvar)
    hd = jnp.maximum(mm(z, wd1) + bd1, 0.0)
    x_recon = jax.nn.sigmoid(mm(hd, wd2) + bd2)
    return x_recon, mu, logvar


if __name__ == "__main__":
    key = jax.random.PRNGKey(0)
    k_params, k_x, k_eps = jax.random.split(key, 3)

    params = init_params(k_params)
    packed = pack_params(params)

    # Deterministic MNIST-like NCHW batch; B=64 gives two grid steps (tb=32).
    B = 64
    x = jax.random.uniform(k_x, (B, 1, 28, 28), jnp.float32)
    # eps = torch.randn_like(std): generated outside the kernel for determinism.
    eps = jax.random.normal(k_eps, (B, LATENT_DIM), jnp.float32)

    x_recon, mu, logvar = jax.block_until_ready(vae_forward(x, eps, packed))

    assert x_recon.shape == (B, INPUT_DIM)
    assert mu.shape == (B, LATENT_DIM)
    assert logvar.shape == (B, LATENT_DIM)
    assert bool(jnp.all(jnp.isfinite(x_recon.astype(jnp.float32))))
    xr32 = x_recon.astype(jnp.float32)
    assert bool(jnp.all((xr32 >= 0.0) & (xr32 <= 1.0)))

    # Numerical check against a plain-JAX reference using the same precision
    # (outputs are bf16, so tolerances account for output rounding).
    xr_ref, mu_ref, lv_ref = vae_reference(x, eps, params)
    assert bool(jnp.allclose(xr32, xr_ref, atol=3e-2, rtol=3e-2))
    assert bool(jnp.allclose(mu.astype(jnp.float32), mu_ref, atol=3e-2, rtol=3e-2))
    assert bool(jnp.allclose(logvar.astype(jnp.float32), lv_ref, atol=3e-2, rtol=3e-2))

    print("KERNEL_OK")
</pallas_src>

<mosaic_0001>
module attributes {stable_mosaic.version = 11 : i64} {
  func.func @vae_kernel(%arg0: i32, %arg1: memref<32x784xbf16, #tpu.memory_space<vmem>>, %arg2: memref<32x128xbf16, #tpu.memory_space<vmem>>, %arg3: memref<784x512xbf16, #tpu.memory_space<vmem>>, %arg4: memref<1x512xf32, #tpu.memory_space<vmem>>, %arg5: memref<512x256xbf16, #tpu.memory_space<vmem>>, %arg6: memref<1x256xf32, #tpu.memory_space<vmem>>, %arg7: memref<128x512xbf16, #tpu.memory_space<vmem>>, %arg8: memref<1x512xf32, #tpu.memory_space<vmem>>, %arg9: memref<512x784xbf16, #tpu.memory_space<vmem>>, %arg10: memref<1x784xf32, #tpu.memory_space<vmem>>, %arg11: memref<32x784xbf16, #tpu.memory_space<vmem>>, %arg12: memref<32x256xbf16, #tpu.memory_space<vmem>>) attributes {dimension_semantics = [#tpu.dimension_semantics<parallel>], iteration_bounds = array<i64: 2>, scalar_prefetch = 0 : i64, scratch_operands = 0 : i64, tpu.core_type = #tpu.core_type<tc>, window_params = [{transform_indices = @transform_0, window_bounds = array<i64: 32, 784>}, {transform_indices = @transform_1, window_bounds = array<i64: 32, 128>}, {pipeline_mode = #tpu.pipeline_mode<synchronous>, transform_indices = @transform_2, window_bounds = array<i64: 784, 512>}, {pipeline_mode = #tpu.pipeline_mode<synchronous>, transform_indices = @transform_3, window_bounds = array<i64: 1, 512>}, {pipeline_mode = #tpu.pipeline_mode<synchronous>, transform_indices = @transform_4, window_bounds = array<i64: 512, 256>}, {pipeline_mode = #tpu.pipeline_mode<synchronous>, transform_indices = @transform_5, window_bounds = array<i64: 1, 256>}, {pipeline_mode = #tpu.pipeline_mode<synchronous>, transform_indices = @transform_6, window_bounds = array<i64: 128, 512>}, {pipeline_mode = #tpu.pipeline_mode<synchronous>, transform_indices = @transform_7, window_bounds = array<i64: 1, 512>}, {pipeline_mode = #tpu.pipeline_mode<synchronous>, transform_indices = @transform_8, window_bounds = array<i64: 512, 784>}, {pipeline_mode = #tpu.pipeline_mode<synchronous>, transform_indices = @transform_9, window_bounds = array<i64: 1, 784>}, {transform_indices = @transform_10, window_bounds = array<i64: 32, 784>}, {transform_indices = @transform_11, window_bounds = array<i64: 32, 256>}]} {
    %c0 = arith.constant 0 : index
    %c0_0 = arith.constant 0 : index
    %0 = vector.load %arg1[%c0, %c0_0] : memref<32x784xbf16, #tpu.memory_space<vmem>>, vector<32x784xbf16>
    %c0_1 = arith.constant 0 : index
    %c0_2 = arith.constant 0 : index
    %1 = vector.load %arg3[%c0_1, %c0_2] : memref<784x512xbf16, #tpu.memory_space<vmem>>, vector<784x512xbf16>
    %cst = arith.constant dense<0.000000e+00> : vector<32x512xf32>
    %2 = tpu.matmul %0, %1, %cst {dimension_numbers = #tpu.dot_dimension_numbers<[1], [0], [0], [1], [0, 0, 1, 1], [], []>} : vector<32x784xbf16>, vector<784x512xbf16>, vector<32x512xf32> -> vector<32x512xf32>
    %c0_3 = arith.constant 0 : index
    %c0_4 = arith.constant 0 : index
    %3 = vector.load %arg4[%c0_3, %c0_4] : memref<1x512xf32, #tpu.memory_space<vmem>>, vector<1x512xf32>
    %4 = vector.broadcast %3 : vector<1x512xf32> to vector<32x512xf32>
    %5 = arith.addf %2, %4 : vector<32x512xf32>
    %cst_5 = arith.constant 0.000000e+00 : f32
    %6 = vector.broadcast %cst_5 : f32 to vector<32x512xf32>
    %7 = arith.maximumf %5, %6 : vector<32x512xf32>
    %8 = arith.truncf %7 : vector<32x512xf32> to vector<32x512xbf16>
    %c0_6 = arith.constant 0 : index
    %c0_7 = arith.constant 0 : index
    %9 = vector.load %arg5[%c0_6, %c0_7] : memref<512x256xbf16, #tpu.memory_space<vmem>>, vector<512x256xbf16>
    %cst_8 = arith.constant dense<0.000000e+00> : vector<32x256xf32>
    %10 = tpu.matmul %8, %9, %cst_8 {dimension_numbers = #tpu.dot_dimension_numbers<[1], [0], [0], [1], [0, 0, 1, 1], [], []>} : vector<32x512xbf16>, vector<512x256xbf16>, vector<32x256xf32> -> vector<32x256xf32>
    %c0_9 = arith.constant 0 : index
    %c0_10 = arith.constant 0 : index
    %11 = vector.load %arg6[%c0_9, %c0_10] : memref<1x256xf32, #tpu.memory_space<vmem>>, vector<1x256xf32>
    %12 = vector.broadcast %11 : vector<1x256xf32> to vector<32x256xf32>
    %13 = arith.addf %10, %12 : vector<32x256xf32>
    %14 = arith.truncf %13 : vector<32x256xf32> to vector<32x256xbf16>
    %c0_11 = arith.constant 0 : index
    %c0_12 = arith.constant 0 : index
    %15 = vector.load %arg12[%c0_11, %c0_12] : memref<32x256xbf16, #tpu.memory_space<vmem>>, vector<32x256xbf16>
    tpu.vector_store %arg12[%c0_11, %c0_12], %14 {strides = array<i32>} : memref<32x256xbf16, #tpu.memory_space<vmem>>, vector<32x256xbf16>,
    %16 = vector.extract_strided_slice %13 {offsets = [0, 0], sizes = [32, 128], strides = [1, 1]} : vector<32x256xf32> to vector<32x128xf32>
    %17 = vector.extract_strided_slice %13 {offsets = [0, 128], sizes = [32, 128], strides = [1, 1]} : vector<32x256xf32> to vector<32x128xf32>
    %cst_13 = arith.constant 5.000000e-01 : f32
    %18 = vector.broadcast %cst_13 : f32 to vector<32x128xf32>
    %19 = arith.mulf %18, %17 : vector<32x128xf32>
    %20 = math.exp %19 : vector<32x128xf32>
    %c0_14 = arith.constant 0 : index
    %c0_15 = arith.constant 0 : index
    %21 = vector.load %arg2[%c0_14, %c0_15] : memref<32x128xbf16, #tpu.memory_space<vmem>>, vector<32x128xbf16>
    %22 = arith.extf %21 : vector<32x128xbf16> to vector<32x128xf32>
    %23 = arith.mulf %22, %20 : vector<32x128xf32>
    %24 = arith.addf %16, %23 : vector<32x128xf32>
    %25 = arith.truncf %24 : vector<32x128xf32> to vector<32x128xbf16>
    %c0_16 = arith.constant 0 : index
    %c0_17 = arith.constant 0 : index
    %26 = vector.load %arg7[%c0_16, %c0_17] : memref<128x512xbf16, #tpu.memory_space<vmem>>, vector<128x512xbf16>
    %cst_18 = arith.constant dense<0.000000e+00> : vector<32x512xf32>
    %27 = tpu.matmul %25, %26, %cst_18 {dimension_numbers = #tpu.dot_dimension_numbers<[1], [0], [0], [1], [0, 0, 1, 1], [], []>} : vector<32x128xbf16>, vector<128x512xbf16>, vector<32x512xf32> -> vector<32x512xf32>
    %c0_19 = arith.constant 0 : index
    %c0_20 = arith.constant 0 : index
    %28 = vector.load %arg8[%c0_19, %c0_20] : memref<1x512xf32, #tpu.memory_space<vmem>>, vector<1x512xf32>
    %29 = vector.broadcast %28 : vector<1x512xf32> to vector<32x512xf32>
    %30 = arith.addf %27, %29 : vector<32x512xf32>
    %cst_21 = arith.constant 0.000000e+00 : f32
    %31 = vector.broadcast %cst_21 : f32 to vector<32x512xf32>
    %32 = arith.maximumf %30, %31 : vector<32x512xf32>
    %33 = arith.truncf %32 : vector<32x512xf32> to vector<32x512xbf16>
    %c0_22 = arith.constant 0 : index
    %c0_23 = arith.constant 0 : index
    %34 = vector.load %arg9[%c0_22, %c0_23] : memref<512x784xbf16, #tpu.memory_space<vmem>>, vector<512x784xbf16>
    %cst_24 = arith.constant dense<0.000000e+00> : vector<32x784xf32>
    %35 = tpu.matmul %33, %34, %cst_24 {dimension_numbers = #tpu.dot_dimension_numbers<[1], [0], [0], [1], [0, 0, 1, 1], [], []>} : vector<32x512xbf16>, vector<512x784xbf16>, vector<32x784xf32> -> vector<32x784xf32>
    %c0_25 = arith.constant 0 : index
    %c0_26 = arith.constant 0 : index
    %36 = vector.load %arg10[%c0_25, %c0_26] : memref<1x784xf32, #tpu.memory_space<vmem>>, vector<1x784xf32>
    %37 = vector.broadcast %36 : vector<1x784xf32> to vector<32x784xf32>
    %38 = arith.addf %35, %37 : vector<32x784xf32>
    %39 = arith.negf %38 : vector<32x784xf32>
    %40 = math.exp %39 : vector<32x784xf32>
    %cst_27 = arith.constant 1.000000e+00 : f32
    %41 = vector.broadcast %cst_27 : f32 to vector<32x784xf32>
    %42 = arith.addf %41, %40 : vector<32x784xf32>
    %43 = arith.divf %41, %42 : vector<32x784xf32>
    %44 = arith.truncf %43 : vector<32x784xf32> to vector<32x784xbf16>
    %c0_28 = arith.constant 0 : index
    %c0_29 = arith.constant 0 : index
    %45 = vector.load %arg11[%c0_28, %c0_29] : memref<32x784xbf16, #tpu.memory_space<vmem>>, vector<32x784xbf16>
    tpu.vector_store %arg11[%c0_28, %c0_29], %44 {strides = array<i32>} : memref<32x784xbf16, #tpu.memory_space<vmem>>, vector<32x784xbf16>,
    return
  }
  func.func @transform_0(%arg0: i32) -> (i32, i32) {
    %c0_i32 = arith.constant 0 : i32
    %c0_i32_0 = arith.constant 0 : i32
    return %arg0, %c0_i32 : i32, i32
  }
  func.func @transform_1(%arg0: i32) -> (i32, i32) {
    %c0_i32 = arith.constant 0 : i32
    %c0_i32_0 = arith.constant 0 : i32
    return %arg0, %c0_i32 : i32, i32
  }
  func.func @transform_2(%arg0: i32) -> (i32, i32) {
    %c0_i32 = arith.constant 0 : i32
    %c0_i32_0 = arith.constant 0 : i32
    %c0_i32_1 = arith.constant 0 : i32
    return %c0_i32, %c0_i32_0 : i32, i32
  }
  func.func @transform_3(%arg0: i32) -> (i32, i32) {
    %c0_i32 = arith.constant 0 : i32
    %c0_i32_0 = arith.constant 0 : i32
    %c0_i32_1 = arith.constant 0 : i32
    return %c0_i32, %c0_i32_0 : i32, i32
  }
  func.func @transform_4(%arg0: i32) -> (i32, i32) {
    %c0_i32 = arith.constant 0 : i32
    %c0_i32_0 = arith.constant 0 : i32
    %c0_i32_1 = arith.constant 0 : i32
    return %c0_i32, %c0_i32_0 : i32, i32
  }
  func.func @transform_5(%arg0: i32) -> (i32, i32) {
    %c0_i32 = arith.constant 0 : i32
    %c0_i32_0 = arith.constant 0 : i32
    %c0_i32_1 = arith.constant 0 : i32
    return %c0_i32, %c0_i32_0 : i32, i32
  }
  func.func @transform_6(%arg0: i32) -> (i32, i32) {
    %c0_i32 = arith.constant 0 : i32
    %c0_i32_0 = arith.constant 0 : i32
    %c0_i32_1 = arith.constant 0 : i32
    return %c0_i32, %c0_i32_0 : i32, i32
  }
  func.func @transform_7(%arg0: i32) -> (i32, i32) {
    %c0_i32 = arith.constant 0 : i32
    %c0_i32_0 = arith.constant 0 : i32
    %c0_i32_1 = arith.constant 0 : i32
    return %c0_i32, %c0_i32_0 : i32, i32
  }
  func.func @transform_8(%arg0: i32) -> (i32, i32) {
    %c0_i32 = arith.constant 0 : i32
    %c0_i32_0 = arith.constant 0 : i32
    %c0_i32_1 = arith.constant 0 : i32
    return %c0_i32, %c0_i32_0 : i32, i32
  }
  func.func @transform_9(%arg0: i32) -> (i32, i32) {
    %c0_i32 = arith.constant 0 : i32
    %c0_i32_0 = arith.constant 0 : i32
    %c0_i32_1 = arith.constant 0 : i32
    return %c0_i32, %c0_i32_0 : i32, i32
  }
  func.func @transform_10(%arg0: i32) -> (i32, i32) {
    %c0_i32 = arith.constant 0 : i32
    %c0_i32_0 = arith.constant 0 : i32
    return %arg0, %c0_i32 : i32, i32
  }
  func.func @transform_11(%arg0: i32) -> (i32, i32) {
    %c0_i32 = arith.constant 0 : i32
    %c0_i32_0 = arith.constant 0 : i32
    return %arg0, %c0_i32 : i32, i32
  }
}

</mosaic_0001>

<bundles_post_ra>
// kernel: vae_forward.1
= control target key start
LH: loop header
LB: loop body
LE: loop exit
PB: predicated region body
PF: predicated region fallthrough
CT: control target
= control target key end

     0   :  { %17 = vsyncpa [#allocation3], 0  ;;  %s8954_s0 = inlined_call_operand.vmem [shape: bf16[64,784], index: 0, kind: input, shape index: {}]   ;;  %s8955_s1 = inlined_call_operand.vmem [shape: bf16[64,128], index: 1, kind: input, shape index: {}]   ;;  %s8956_s2 = inlined_call_operand.vmem [shape: bf16[784,512], index: 2, kind: input, shape index: {}]   ;;  %s8957_s3 = inlined_call_operand.vmem [shape: f32[1,512], index: 3, kind: input, shape index: {}]   ;;  %s8958_s4 = inlined_call_operand.vmem [shape: bf16[512,256], index: 4, kind: input, shape index: {}]   ;;  %s8959_s5 = inlined_call_operand.vmem [shape: f32[1,256], index: 5, kind: input, shape index: {}]   ;;  %s8960_s6 = inlined_call_operand.vmem [shape: bf16[128,512], index: 6, kind: input, shape index: {}]   ;;  %s8961_s7 = inlined_call_operand.vmem [shape: f32[1,512], index: 7, kind: input, shape index: {}]   ;;  %s8962_s8 = inlined_call_operand.vmem [shape: bf16[512,784], index: 8, kind: input, shape index: {}]   ;;  %s8963_s9 = inlined_call_operand.vmem [shape: f32[1,784], index: 9, kind: input, shape index: {}]   ;;  %s8964_s10 = inlined_call_operand.hbm [shape: bf16[64,784], index: 10, kind: output, shape index: {0}]   ;;  %s8965_s11 = inlined_call_operand.vmem [shape: bf16[64,256], index: 11, kind: output, shape index: {1}]  }
   0x1   :  { %19 = vsyncpa [#allocation3 + $0x1], 0  ;;  %s7090_s17 = smov 0   ;;  %s7092_s18 = smov 0  }
   0x2   :  { %s7094_s19 = smov 0   ;;  %s7096_s20 = smov 0  }
   0x3 LB: > { %8969 = sst [smem:[#allocation5_spill]] %s7020_s19  ;;  %s7111_s21 = sadd.s32 4294967295, %s7024_s20   ;;  %s7024_s20 = sphi %s7096_s20, %s8974_s20   ;;  %s7020_s19 = sphi %s7094_s19, %s8979_s19   ;;  %s7016_s18 = sphi %s7092_s18, %s8978_s18   ;;  %s7012_s17 = sphi %s7090_s17, %s8977_s17  }
   0x4   : > { %s5332_s22 = sadd.s32 4294967294, %s7024_s20   ;;  %s7115_s23 = sadd.s32 1, %s7024_s20  }
   0x5   : > { %8970 = sst [smem:[#allocation6_spill]] %s7115_s23  ;;  %s252_s24 = sadd.s32 1, %s7020_s19 }
   0x6   : > { %s249_s25 = ssub.s32 %s7024_s20, %s7115_s23  ;;  %p262_p0 = scmp.ne.s32.totalorder %s7020_s19, %s7016_s18 }
   0x7   : > { %p250_p1 = scmp.eq.s32.totalorder %s249_s25, 0  ;;  %p263_p2 = scmp.eq.s32.totalorder %s7111_s21, 1 }
   0x8   : > { %p268_p3 = scmp.ne.s32.totalorder %s7016_s18, %s7012_s17  ;;  %p269_p4 = scmp.eq.s32.totalorder %s5332_s22, 1 }
   0x9   : > { %s7126_s26 = scalar_select %p250_p1, %s7020_s19, %s252_s24  }
   0xa   : > { %p7128_p5 = por %p263_p2, %p262_p0  ;;  %p7132_p6 = por %p269_p4, %p268_p3 }
   0xb   : > { %8971 = sst [smem:[#allocation7_spill]] %s7126_s26  ;;  %p5335_p7 = scmp.ge.s32.totalorder %s7024_s20, 1 }
   0xc   : > { %p356_p8 = scmp.lt.s32.totalorder %s7024_s20, 3 }
   0xe   : > { %p357_p9 = pnand %p5335_p7, %p356_p8 }
   0xf   : > { %s5336_s29 = sshll.u32 (!%p357_p9), %s7111_s21, 2  ;;  %s397_s22 = sand.u32 (!%p357_p9), 1, %s7016_s18  }
  0x10   : > { %360 = sbr.rel (%p357_p9) target bundleno = 1293 (0x50d), region = 60  ;;  %p409_p10 = scmp.lt.s32.totalorder (!%p357_p9), %s5336_s29, 7 }
  0x11   : > { %s8914_s12 = scalar_lea.sflag (!%p357_p9), [#allocation3], %s397_s22  ;;  %s7027_s14 = smov (!%p357_p9), [#allocation2]  }
  0x12   : > { %s6968_s15 = sshll.u32 (!%p357_p9), %s7027_s14, 4  ;;  %s6969_s15 = int_to_ptr.vmem [resolvable:$false] %s6968_s15 }
  0x13   : > { %s6970_s19 = scalar_lea.vmem (!%p357_p9), %s6969_s15, 3584 }
  0x15   : > { %v6061_v0 = vld [vmem:[%s8956_s2 + $0xe4] ss:$16 sps:$4 sm:$0xff]   ;;  %v6065_v2 = vld [vmem:[%s8956_s2 + $0xe0] ss:$16 sps:$4 sm:$0xff]   ;;  %s8981_s29 = smov (!%p409_p10, %s5336_s29), 7  ;;  %vm1714_vm0 = vcmask 130048  }
  0x16   : > { %v6063_v1 = vld [vmem:[%s8956_s2 + $0x2e4] ss:$16 sps:$4 sm:$0xff]   ;;  %1721 = vmatprep.subr.bf16.mxu0 %v6061_v0  ;;  %v6066_v3 = vld [vmem:[%s8956_s2 + $0x2e0] ss:$16 sps:$4 sm:$0xff]   ;;  %s6017_s13 = smul.u32 28, %s8981_s29  ;;  %s5930_s16 = sshll.u32 %s8981_s29, 3 }
  0x17   : > { %1774 = vmatprep.subr.bf16.mxu1 %v6063_v1  ;;  %v6067_v4 = vld [vmem:[%s8956_s2 + $0xc4] ss:$16 sps:$4 sm:$0xff]   ;;  %1722 = vmatpush1.bf16.msra.mxu0 %v6065_v2  ;;  %v6071_v6 = vld [vmem:[%s8956_s2 + $0xc0] ss:$16 sps:$4 sm:$0xff]   ;;  %s8130_s24 = scalar_lea.vmem %s8965_s11, %s5930_s16  ;;  %s5339_s26 = sshll.u32 %s8981_s29, 2  ;;  %vm5193_vm1 = vcmask 125952  }
  0x18   : > { %1775 = vmatpush1.bf16.msra.mxu1 %v6066_v3  ;;  %v6069_v5 = vld [vmem:[%s8956_s2 + $0x2c4] ss:$16 sps:$4 sm:$0xff]   ;;  %1723 = vmatprep.subr.bf16.mxu0 %v6067_v4  ;;  %v6072_v7 = vld [vmem:[%s8956_s2 + $0x2c0] ss:$16 sps:$4 sm:$0xff]   ;;  %s7280_s23 = scalar_lea.vmem %s8954_s0, %s6017_s13  ;;  %s419_s30 = scalar_lea.vmem %s8955_s1, %s5339_s26 }
  0x19   : > { %1776 = vmatprep.subr.bf16.mxu1 %v6069_v5  ;;  %v6073_v8 = vld [vmem:[%s8956_s2 + $0xa4] ss:$16 sps:$4 sm:$0xff]   ;;  %v6077_v10 = vld [vmem:[%s8956_s2 + $0xa0] ss:$16 sps:$4 sm:$0xff]   ;;  %v7301_v51 = vld [vmem:[%s7280_s23 + $0xc] ss:$28 sps:$4 sm:$0xff]  }
  0x1a   : > { %v6075_v9 = vld [vmem:[%s8956_s2 + $0x2a4] ss:$16 sps:$4 sm:$0xff]   ;;  %v6078_v11 = vld [vmem:[%s8956_s2 + $0x2a0] ss:$16 sps:$4 sm:$0xff]   ;;  %1806 = vmatprep.mubr.bf16.mxu1 %v7301_v51  ;;  %s6018_s26 = smul.u32 1792, %s7111_s21 }
  0x1b   : > { %1724 = vmatpush1.bf16.msra.mxu0 %v6071_v6  ;;  %v6079_v12 = vld [vmem:[%s8956_s2 + $0x84] ss:$16 sps:$4 sm:$0xff]   ;;  %v6083_v14 = vld [vmem:[%s8956_s2 + $0x80] ss:$16 sps:$4 sm:$0xff]  }
  0x1c   : > { %1777 = vmatpush1.bf16.msra.mxu1 %v6072_v7  ;;  %1725 = vmatprep.subr.bf16.mxu0 %v6073_v8  ;;  %v6081_v13 = vld [vmem:[%s8956_s2 + $0x284] ss:$16 sps:$4 sm:$0xff]   ;;  %v6084_v15 = vld [vmem:[%s8956_s2 + $0x280] ss:$16 sps:$4 sm:$0xff]   ;;  %s8907_s29 = scalar_lea.hbm %s8964_s10, %s6018_s26 }
  0x1d   : > { %1778 = vmatprep.subr.bf16.mxu1 %v6075_v9  ;;  %v6085_v16 = vld [vmem:[%s8956_s2 + $0x64] ss:$16 sps:$4 sm:$0xff]   ;;  %v6089_v18 = vld [vmem:[%s8956_s2 + $0x60] ss:$16 sps:$4 sm:$0xff]   ;;  %v7367_v9 = vld [vmem:[%s7280_s23 + $0x3c] ss:$28 sps:$4 sm:$0xff]  }
  0x1e   : > { %v6087_v17 = vld [vmem:[%s8956_s2 + $0x264] ss:$16 sps:$4 sm:$0xff]   ;;  %v6090_v19 = vld [vmem:[%s8956_s2 + $0x260] ss:$16 sps:$4 sm:$0xff]  }
  0x1f   : > { %1726 = vmatpush1.bf16.msra.mxu0 %v6077_v10  ;;  %v6091_v20 = vld [vmem:[%s8956_s2 + $0x44] ss:$16 sps:$4 sm:$0xff]   ;;  %v6095_v22 = vld [vmem:[%s8956_s2 + $0x40] ss:$16 sps:$4 sm:$0xff]  }
  0x20   : > { %1779 = vmatpush1.bf16.msra.mxu1 %v6078_v11  ;;  %1727 = vmatprep.subr.bf16.mxu0 %v6079_v12  ;;  %v6093_v21 = vld [vmem:[%s8956_s2 + $0x244] ss:$16 sps:$4 sm:$0xff]   ;;  %v6096_v23 = vld [vmem:[%s8956_s2 + $0x240] ss:$16 sps:$4 sm:$0xff]   ;;  %v6186_v11 = vld [vmem:[%s8956_s2 + $0xec] ss:$16 sps:$4 sm:$0xff]  }
  0x21   : > { %1780 = vmatprep.subr.bf16.mxu1 %v6081_v13  ;;  %v6097_v24 = vld [vmem:[%s8956_s2 + $0x24] ss:$16 sps:$4 sm:$0xff]   ;;  %v6101_v26 = vld [vmem:[%s8956_s2 + $0x20] ss:$16 sps:$4 sm:$0xff]  }
  0x22   : > { %v6099_v25 = vld [vmem:[%s8956_s2 + $0x224] ss:$16 sps:$4 sm:$0xff]   ;;  %v6102_v27 = vld [vmem:[%s8956_s2 + $0x220] ss:$16 sps:$4 sm:$0xff]  }
  0x23   : > { %1728 = vmatpush1.bf16.msra.mxu0 %v6083_v14  ;;  %v6103_v28 = vld [vmem:[%s8956_s2 + $0x4] ss:$16 sps:$4 sm:$0xff]   ;;  %v6107_v30 = vld [vmem:[%s8956_s2] ss:$16 sps:$4 sm:$0xff]  }
  0x24   : > { %1781 = vmatpush1.bf16.msra.mxu1 %v6084_v15  ;;  %1729 = vmatprep.subr.bf16.mxu0 %v6085_v16  ;;  %v6105_v29 = vld [vmem:[%s8956_s2 + $0x204] ss:$16 sps:$4 sm:$0xff]   ;;  %v6108_v31 = vld [vmem:[%s8956_s2 + $0x200] ss:$16 sps:$4 sm:$0xff]  }
  0x25   : > { %1782 = vmatprep.subr.bf16.mxu1 %v6087_v17  ;;  %v6109_v32 = vld [vmem:[%s8956_s2 + $0x1e4] ss:$16 sps:$4 sm:$0xff]   ;;  %v6113_v34 = vld [vmem:[%s8956_s2 + $0x1e0] ss:$16 sps:$4 sm:$0xff]  }
  0x26   : > { %v6111_v33 = vld [vmem:[%s8956_s2 + $0x3e4] ss:$16 sps:$4 sm:$0xff]   ;;  %v6114_v35 = vld [vmem:[%s8956_s2 + $0x3e0] ss:$16 sps:$4 sm:$0xff]  }
  0x27   : > { %1730 = vmatpush1.bf16.msra.mxu0 %v6089_v18  ;;  %v6115_v36 = vld [vmem:[%s8956_s2 + $0x1c4] ss:$16 sps:$4 sm:$0xff]   ;;  %v6119_v38 = vld [vmem:[%s8956_s2 + $0x1c0] ss:$16 sps:$4 sm:$0xff]  }
  0x28   : > { %1783 = vmatpush1.bf16.msra.mxu1 %v6090_v19  ;;  %1731 = vmatprep.subr.bf16.mxu0 %v6091_v20  ;;  %v6117_v37 = vld [vmem:[%s8956_s2 + $0x3c4] ss:$16 sps:$4 sm:$0xff]   ;;  %v6120_v39 = vld [vmem:[%s8956_s2 + $0x3c0] ss:$16 sps:$4 sm:$0xff]   ;;  %v7026_v19 = vmov 0  }
  0x29   : > { %1784 = vmatprep.subr.bf16.mxu1 %v6093_v21  ;;  %v6121_v40 = vld [vmem:[%s8956_s2 + $0x1a4] ss:$16 sps:$4 sm:$0xff]   ;;  %v6125_v42 = vld [vmem:[%s8956_s2 + $0x1a0] ss:$16 sps:$4 sm:$0xff]   ;;  %v6184_v21 = vld [vmem:[%s8956_s2 + $0xe8] ss:$16 sps:$4 sm:$0xff]  }
  0x2a   : > { %v6123_v41 = vld [vmem:[%s8956_s2 + $0x3a4] ss:$16 sps:$4 sm:$0xff]   ;;  %v6126_v43 = vld [vmem:[%s8956_s2 + $0x3a0] ss:$16 sps:$4 sm:$0xff]  }
  0x2b   : > { %1732 = vmatpush1.bf16.msra.mxu0 %v6095_v22  ;;  %v6127_v44 = vld [vmem:[%s8956_s2 + $0x184] ss:$16 sps:$4 sm:$0xff]   ;;  %v6131_v46 = vld [vmem:[%s8956_s2 + $0x180] ss:$16 sps:$4 sm:$0xff]  }
  0x2c   : > { %1785 = vmatpush1.bf16.msra.mxu1 %v6096_v23  ;;  %1733 = vmatprep.subr.bf16.mxu0 %v6097_v24  ;;  %v6129_v45 = vld [vmem:[%s8956_s2 + $0x384] ss:$16 sps:$4 sm:$0xff]   ;;  %v6132_v47 = vld [vmem:[%s8956_s2 + $0x380] ss:$16 sps:$4 sm:$0xff]   ;;  %v6193_v24 = vld [vmem:[%s8956_s2 + $0xcc] ss:$16 sps:$4 sm:$0xff]  }
  0x2d   : > { %1786 = vmatprep.subr.bf16.mxu1 %v6099_v25  ;;  %v6133_v48 = vld [vmem:[%s8956_s2 + $0x164] ss:$16 sps:$4 sm:$0xff]   ;;  %v6137_v52 = vld [vmem:[%s8956_s2 + $0x160] ss:$16 sps:$4 sm:$0xff]  }
  0x2e   : > { %v7295_v49 = vld [vmem:[%s7280_s23 + $0x4] ss:$28 sps:$4 sm:$0xff]   ;;  %v7382_v14 = vld [vmem:[%s7280_s23 + $0x38] ss:$28 sps:$4 sm:$0xff]  }
  0x2f   : > { %1734 = vmatpush1.bf16.msra.mxu0 %v6101_v26  ;;  %v6135_v50 = vld [vmem:[%s8956_s2 + $0x364] ss:$16 sps:$4 sm:$0xff]   ;;  %1753 = vmatprep.mubr.bf16.mxu0 %v7295_v49  ;;  %v6138_v53 = vld [vmem:[%s8956_s2 + $0x360] ss:$16 sps:$4 sm:$0xff]   ;;  %v6191_v26 = vld [vmem:[%s8956_s2 + $0xc8] ss:$16 sps:$4 sm:$0xff]  }
  0x30   : > { %1787 = vmatpush1.bf16.msra.mxu1 %v6102_v27  ;;  %1735 = vmatprep.subr.bf16.mxu0 %v6103_v28  ;;  %v6139_v54 = vld [vmem:[%s8956_s2 + $0x144] ss:$16 sps:$4 sm:$0xff]   ;;  %v6143_v56 = vld [vmem:[%s8956_s2 + $0x140] ss:$16 sps:$4 sm:$0xff]   ;;  %v6199_v28 = vld [vmem:[%s8956_s2 + $0xac] ss:$16 sps:$4 sm:$0xff]  }
  0x31   : > { %1788 = vmatprep.subr.bf16.mxu1 %v6105_v29  ;;  %v6141_v55 = vld [vmem:[%s8956_s2 + $0x344] ss:$16 sps:$4 sm:$0xff]   ;;  %v6144_v57 = vld [vmem:[%s8956_s2 + $0x340] ss:$16 sps:$4 sm:$0xff]  }
  0x32   : > { %v6145_v58 = vld [vmem:[%s8956_s2 + $0x124] ss:$16 sps:$4 sm:$0xff]   ;;  %v6149_v60 = vld [vmem:[%s8956_s2 + $0x120] ss:$16 sps:$4 sm:$0xff]  }
  0x33   : > { %1736 = vmatpush1.bf16.msra.mxu0 %v6107_v30  ;;  %v6147_v59 = vld [vmem:[%s8956_s2 + $0x324] ss:$16 sps:$4 sm:$0xff]   ;;  %v6150_v61 = vld [vmem:[%s8956_s2 + $0x320] ss:$16 sps:$4 sm:$0xff]   ;;  %v6197_v30 = vld [vmem:[%s8956_s2 + $0xa8] ss:$16 sps:$4 sm:$0xff]  }
  0x34   : > { %1789 = vmatpush1.bf16.msra.mxu1 %v6108_v31  ;;  %1737 = vmatprep.subr.bf16.mxu0 %v6109_v32  ;;  %v6151_v62 = vld [vmem:[%s8956_s2 + $0x104] ss:$16 sps:$4 sm:$0xff]   ;;  %v6155_v0 = vld [vmem:[%s8956_s2 + $0x100] ss:$16 sps:$4 sm:$0xff]   ;;  %v6205_v32 = vld [vmem:[%s8956_s2 + $0x8c] ss:$16 sps:$4 sm:$0xff]  }
  0x35   : > { %1790 = vmatprep.subr.bf16.mxu1 %v6111_v33  ;;  %v6153_v63 = vld [vmem:[%s8956_s2 + $0x304] ss:$16 sps:$4 sm:$0xff]   ;;  %v6156_v1 = vld [vmem:[%s8956_s2 + $0x300] ss:$16 sps:$4 sm:$0xff]  }
  0x36   : > { %v6165_v2 = vld [vmem:[%s8956_s2 + $0x4e4] ss:$16 sps:$4 sm:$0xff]   ;;  %v7351_v3 = vld [vmem:[%s7280_s23] ss:$28 sps:$4 sm:$0xff]  }
  0x37   : > { %1738 = vmatpush2.bf16.msra.mxu0 %v6113_v34  ;;  %v6168_v4 = vld [vmem:[%s8956_s2 + $0x604] ss:$16 sps:$4 sm:$0xff]   ;;  %v6163_v6 = vld [vmem:[%s8956_s2 + $0x4e0] ss:$16 sps:$4 sm:$0xff]  }
  0x38   : > { %1791 = vmatpush2.bf16.msra.mxu1 %v6114_v35  ;;  %1739 = vmatprep.subr.bf16.mxu0 %v6115_v36  ;;  %v6160_v5 = vld [vmem:[%s7280_s23 + $0x8] ss:$28 sps:$4 sm:$0xff]   ;;  %v6166_v7 = vld [vmem:[%s8956_s2 + $0x600] ss:$16 sps:$4 sm:$0xff]   ;;  %v6190_v22 = vld [vmem:[%s7280_s23 + $0x18] ss:$28 sps:$4 sm:$0xff]  }
  0x39   : > { %1792 = vmatprep.subr.bf16.mxu1 %v6117_v37  ;;  %v6171_v8 = vld [vmem:[%s8956_s2 + $0x4c4] ss:$16 sps:$4 sm:$0xff]   ;;  %v6169_v12 = vld [vmem:[%s8956_s2 + $0x4c0] ss:$16 sps:$4 sm:$0xff]   ;;  %v6203_v35 = vld [vmem:[%s8956_s2 + $0x88] ss:$16 sps:$4 sm:$0xff]  }
  0x3a   : > { %v6174_v10 = vld [vmem:[%s7280_s23 + $0x44] ss:$28 sps:$4 sm:$0xff]   ;;  %v7436_v33 = vld [vmem:[%s7280_s23 + $0x14] ss:$28 sps:$4 sm:$0xff]  }
  0x3b   : > { %1740 = vmatpush2.bf16.msra.mxu0 %v6119_v38  ;;  %v6180_v13 = vld [vmem:[%s8956_s2 + $0x4a4] ss:$16 sps:$4 sm:$0xff]   ;;  %v6177_v15 = vld [vmem:[%s7280_s23 + $0x40] ss:$28 sps:$4 sm:$0xff]   ;;  %v6266_v37 = vld [vmem:[%s7280_s23 + $0x50] ss:$28 sps:$4 sm:$0xff]  }
  0x3c   : > { %1793 = vmatpush2.bf16.msra.mxu1 %v6120_v39  ;;  %1741 = vmatprep.subr.bf16.mxu0 %v6121_v40  ;;  %v6178_v16 = vld [vmem:[%s8956_s2 + $0x4a0] ss:$16 sps:$4 sm:$0xff]   ;;  %v6183_v17 = vld [vmem:[%s8956_s2 + $0x484] ss:$16 sps:$4 sm:$0xff]   ;;  %v6211_v38 = vld [vmem:[%s8956_s2 + $0x6c] ss:$16 sps:$4 sm:$0xff]  }
  0x3d   : > { %1794 = vmatprep.subr.bf16.mxu1 %v6123_v41  ;;  %v6181_v18 = vld [vmem:[%s8956_s2 + $0x480] ss:$16 sps:$4 sm:$0xff]   ;;  %v6189_v20 = vld [vmem:[%s8956_s2 + $0x464] ss:$16 sps:$4 sm:$0xff]   ;;  %v6209_v40 = vld [vmem:[%s8956_s2 + $0x68] ss:$16 sps:$4 sm:$0xff]  }
  0x3e   : > { %v6187_v23 = vld [vmem:[%s8956_s2 + $0x460] ss:$16 sps:$4 sm:$0xff]   ;;  %v6196_v25 = vld [vmem:[%s8956_s2 + $0x444] ss:$16 sps:$4 sm:$0xff]  }
  0x3f   : > { %1742 = vmatpush2.bf16.msra.mxu0 %v6125_v42  ;;  %v6194_v27 = vld [vmem:[%s8956_s2 + $0x440] ss:$16 sps:$4 sm:$0xff]   ;;  %v6202_v29 = vld [vmem:[%s8956_s2 + $0x424] ss:$16 sps:$4 sm:$0xff]   ;;  %v6217_v42 = vld [vmem:[%s8956_s2 + $0x4c] ss:$16 sps:$4 sm:$0xff]  }
  0x40   : > { %1795 = vmatpush2.bf16.msra.mxu1 %v6126_v43  ;;  %1743 = vmatprep.subr.bf16.mxu0 %v6127_v44  ;;  %v6200_v31 = vld [vmem:[%s8956_s2 + $0x420] ss:$16 sps:$4 sm:$0xff]   ;;  %v6208_v34 = vld [vmem:[%s8956_s2 + $0x404] ss:$16 sps:$4 sm:$0xff]   ;;  %v6215_v44 = vld [vmem:[%s8956_s2 + $0x48] ss:$16 sps:$4 sm:$0xff]  }
  0x41   : > { %1796 = vmatprep.subr.bf16.mxu1 %v6129_v45  ;;  %v6206_v36 = vld [vmem:[%s8956_s2 + $0x400] ss:$16 sps:$4 sm:$0xff]   ;;  %v6214_v39 = vld [vmem:[%s8956_s2 + $0x5e4] ss:$16 sps:$4 sm:$0xff]  }
  0x42   : > { %v6212_v41 = vld [vmem:[%s8956_s2 + $0x5e0] ss:$16 sps:$4 sm:$0xff]   ;;  %v6220_v43 = vld [vmem:[%s8956_s2 + $0x5c4] ss:$16 sps:$4 sm:$0xff]  }
  0x43   : > { %1744 = vmatpush2.bf16.msra.mxu0 %v6131_v46  ;;  %v6218_v45 = vld [vmem:[%s8956_s2 + $0x5c0] ss:$16 sps:$4 sm:$0xff]   ;;  %v6223_v46 = vld [vmem:[%s8956_s2 + $0x2c] ss:$16 sps:$4 sm:$0xff]  }
  0x44   : > { %1797 = vmatpush2.bf16.msra.mxu1 %v6132_v47  ;;  %1745 = vmatprep.subr.bf16.mxu0 %v6133_v48  ;;  %v6226_v47 = vld [vmem:[%s8956_s2 + $0x5a4] ss:$16 sps:$4 sm:$0xff]   ;;  %v6221_v48 = vld [vmem:[%s8956_s2 + $0x28] ss:$16 sps:$4 sm:$0xff]  }
  0x45   : > { %1798 = vmatprep.subr.bf16.mxu1 %v6135_v50  ;;  %v6229_v50 = vld [vmem:[%s8956_s2 + $0xc] ss:$16 sps:$4 sm:$0xff]  }
  0x47   : > { %1746 = vmatpush2.bf16.msra.mxu0 %v6137_v52  ;;  %v6232_v52 = vld [vmem:[%s8956_s2 + $0x584] ss:$16 sps:$4 sm:$0xff]  }
  0x48   : > { %1799 = vmatpush2.bf16.msra.mxu1 %v6138_v53  ;;  %1747 = vmatprep.subr.bf16.mxu0 %v6139_v54  ;;  %v6227_v53 = vld [vmem:[%s8956_s2 + $0x8] ss:$16 sps:$4 sm:$0xff]   ;;  %v6230_v54 = vld [vmem:[%s8956_s2 + $0x580] ss:$16 sps:$4 sm:$0xff]  }
  0x49   : > { %1800 = vmatprep.subr.bf16.mxu1 %v6141_v55  ;;  %v6235_v55 = vld [vmem:[%s8956_s2 + $0x1ec] ss:$16 sps:$4 sm:$0xff]  }
  0x4b   : > { %1748 = vmatpush2.bf16.msra.mxu0 %v6143_v56  ;;  %v6238_v56 = vld [vmem:[%s8956_s2 + $0x564] ss:$16 sps:$4 sm:$0xff]  }
  0x4c   : > { %1801 = vmatpush2.bf16.msra.mxu1 %v6144_v57  ;;  %1749 = vmatprep.subr.bf16.mxu0 %v6145_v58  ;;  %v6233_v57 = vld [vmem:[%s8956_s2 + $0x1e8] ss:$16 sps:$4 sm:$0xff]   ;;  %v6236_v58 = vld [vmem:[%s8956_s2 + $0x560] ss:$16 sps:$4 sm:$0xff]  }
  0x4d   : > { %1802 = vmatprep.subr.bf16.mxu1 %v6147_v59  ;;  %v6241_v59 = vld [vmem:[%s8956_s2 + $0x1cc] ss:$16 sps:$4 sm:$0xff]  }
  0x4f   : > { %1750 = vmatpush2.bf16.msra.mxu0 %v6149_v60  ;;  %v6244_v60 = vld [vmem:[%s8956_s2 + $0x544] ss:$16 sps:$4 sm:$0xff]  }
  0x50   : > { %1803 = vmatpush2.bf16.msra.mxu1 %v6150_v61  ;;  %1751 = vmatprep.subr.bf16.mxu0 %v6151_v62  ;;  %v6239_v61 = vld [vmem:[%s8956_s2 + $0x1c8] ss:$16 sps:$4 sm:$0xff]   ;;  %v6242_v62 = vld [vmem:[%s8956_s2 + $0x540] ss:$16 sps:$4 sm:$0xff]  }
  0x51   : > { %1804 = vmatprep.subr.bf16.mxu1 %v6153_v63  ;;  %v6247_v63 = vld [vmem:[%s8956_s2 + $0x1ac] ss:$16 sps:$4 sm:$0xff]  }
  0x53   : > { %1752 = vmatpush2.bf16.msra.mxu0 %v6155_v0  ;;  %v6250_v0 = vld [vmem:[%s8956_s2 + $0x524] ss:$16 sps:$4 sm:$0xff]  }
  0x54   : > { %1805 = vmatpush2.bf16.msra.mxu1 %v6156_v1  ;;  %1827 = vmatprep.subr.bf16.mxu0 %v6165_v2  ;;  %v6245_v1 = vld [vmem:[%s8956_s2 + $0x1a8] ss:$16 sps:$4 sm:$0xff]   ;;  %v6248_v2 = vld [vmem:[%s8956_s2 + $0x520] ss:$16 sps:$4 sm:$0xff]  }
  0x55   : > { %1894 = vmatprep.subr.bf16.mxu1 %v6168_v4  ;;  %v6253_v4 = vld [vmem:[%s8956_s2 + $0x18c] ss:$16 sps:$4 sm:$0xff]  }
  0x56   : > { %1754 = vmatmul.mubr.bf16.vlgmr.msra.gmra.mxu0 %v7351_v3 }
  0x57   : > { %1807 = vmatmul.mubr.bf16.vlgmr.msra.gmra.mxu1 %v6160_v5  ;;  %1828 = vmatpush1.bf16.msra.mxu0 %v6163_v6  ;;  %v6256_v5 = vld [vmem:[%s8956_s2 + $0x504] ss:$16 sps:$4 sm:$0xff]   ;;  %v6251_v6 = vld [vmem:[%s8956_s2 + $0x188] ss:$16 sps:$4 sm:$0xff]  }
  0x58   : > { %1895 = vmatpush1.bf16.msra.mxu1 %v6166_v7  ;;  %1829 = vmatprep.subr.bf16.mxu0 %v6171_v8  ;;  %v6254_v7 = vld [vmem:[%s8956_s2 + $0x500] ss:$16 sps:$4 sm:$0xff]   ;;  %v6262_v8 = vld [vmem:[%s8956_s2 + $0x16c] ss:$16 sps:$4 sm:$0xff]  }
  0x59   : > { %1763 = vmatprep.mubr.bf16.mxu0 %v7367_v9  ;;  %1816 = vmatprep.mubr.bf16.mxu1 %v6174_v10  ;;  %v6265_v10 = vld [vmem:[%s8956_s2 + $0x2ec] ss:$16 sps:$4 sm:$0xff]  }
  0x5a   : > { %1933 = vmatprep.subr.bf16.mxu1 %v6186_v11  ;;  %v7554_v11 = vld [vmem:[%s7280_s23 + $0x10] ss:$28 sps:$4 sm:$0xff]  }
  0x5b   : > { %1830 = vmatpush1.bf16.msra.mxu0 %v6169_v12  ;;  %v6260_v12 = vld [vmem:[%s8956_s2 + $0x168] ss:$16 sps:$4 sm:$0xff]  }
  0x5c   : > { %1831 = vmatprep.subr.bf16.mxu0 %v6180_v13  ;;  %v6263_v13 = vld [vmem:[%s8956_s2 + $0x2e8] ss:$16 sps:$4 sm:$0xff]  }
  0x5e   : > { %1764 = vmatmul.mubr.bf16.gmra.mxu0 %v7382_v14 }
  0x5f   : > { %1817 = vmatmul.mubr.bf16.gmra.mxu1 %v6177_v15  ;;  %1832 = vmatpush1.bf16.msra.mxu0 %v6178_v16  ;;  %v6269_v15 = vld [vmem:[%s8956_s2 + $0x14c] ss:$16 sps:$4 sm:$0xff]  }
  0x60   : > { %1912 = vmatprep.mubr.bf16.mxu1 %v7026_v19  ;;  %1833 = vmatprep.subr.bf16.mxu0 %v6183_v17  ;;  %v6272_v16 = vld [vmem:[%s8956_s2 + $0x2cc] ss:$16 sps:$4 sm:$0xff]  }
  0x61   : > { %1859 = vmatprep.mubr.bf16.mxu0 %v7436_v33  ;;  %v7569_v17 = vld [vmem:[%s7280_s23 + $0x4c] ss:$28 sps:$4 sm:$0xff]  }
  0x63   : > { %1834 = vmatpush1.bf16.msra.mxu0 %v6181_v18  ;;  %v6267_v18 = vld [vmem:[%s8956_s2 + $0x148] ss:$16 sps:$4 sm:$0xff]  }
  0x64   : > { %1835 = vmatprep.subr.bf16.mxu0 %v6189_v20  ;;  %v6270_v20 = vld [vmem:[%s8956_s2 + $0x2c8] ss:$16 sps:$4 sm:$0xff]  }
  0x67   : > { %5553 = vmatmul.mubr.msk.bf16.vlgmr.msra.gmra.mxu1 %vm1714_vm0, %v6190_v22  ;;  %1836 = vmatpush1.bf16.msra.mxu0 %v6187_v23  ;;  %v6281_v22 = vld [vmem:[%s8956_s2 + $0x2ac] ss:$16 sps:$4 sm:$0xff]   ;;  %v7586_v23 = vld [vmem:[%s7280_s23 + $0x48] ss:$28 sps:$4 sm:$0xff]  }
  0x68   : > { %1934 = vmatpush1.bf16.msra.mxu1 %v6184_v21  ;;  %1837 = vmatprep.subr.bf16.mxu0 %v6196_v25  ;;  %v6277_v21 = vld [vmem:[%s8956_s2 + $0x12c] ss:$16 sps:$4 sm:$0xff]   ;;  %v6279_v25 = vld [vmem:[%s8956_s2 + $0x2a8] ss:$16 sps:$4 sm:$0xff]  }
  0x69   : > { %1935 = vmatprep.subr.bf16.mxu1 %v6193_v24  ;;  %1922 = vmatprep.mubr.bf16.mxu1 %v7026_v19  ;;  %v6275_v24 = vld [vmem:[%s8956_s2 + $0x128] ss:$16 sps:$4 sm:$0xff]  }
  0x6b   : > { %1838 = vmatpush1.bf16.msra.mxu0 %v6194_v27  ;;  %v6287_v27 = vld [vmem:[%s8956_s2 + $0x28c] ss:$16 sps:$4 sm:$0xff]  }
  0x6c   : > { %1936 = vmatpush1.bf16.msra.mxu1 %v6191_v26  ;;  %1839 = vmatprep.subr.bf16.mxu0 %v6202_v29  ;;  %v6284_v26 = vld [vmem:[%s8956_s2 + $0x10c] ss:$16 sps:$4 sm:$0xff]   ;;  %v6285_v29 = vld [vmem:[%s8956_s2 + $0x288] ss:$16 sps:$4 sm:$0xff]  }
  0x6d   : > { %1937 = vmatprep.subr.bf16.mxu1 %v6199_v28  ;;  %v6282_v28 = vld [vmem:[%s8956_s2 + $0x108] ss:$16 sps:$4 sm:$0xff]  }
  0x6f   : > { %1840 = vmatpush1.bf16.msra.mxu0 %v6200_v31  ;;  %5554 = vmatmul.mubr.msk.bf16.gmra.mxu1 %vm1714_vm0, %v6266_v37  ;;  %v6293_v31 = vld [vmem:[%s8956_s2 + $0x26c] ss:$16 sps:$4 sm:$0xff]   ;;  %v6294_v37 = vld [vmem:[%s8956_s2 + $0x4c8] ss:$16 sps:$4 sm:$0xff]  }
  0x70   : > { %1938 = vmatpush1.bf16.msra.mxu1 %v6197_v30  ;;  %1841 = vmatprep.subr.bf16.mxu0 %v6208_v34  ;;  %v6290_v30 = vld [vmem:[%s8956_s2 + $0x4ec] ss:$16 sps:$4 sm:$0xff]   ;;  %v6291_v34 = vld [vmem:[%s8956_s2 + $0x268] ss:$16 sps:$4 sm:$0xff]  }
  0x71   : > { %1939 = vmatprep.subr.bf16.mxu1 %v6205_v32  ;;  %1965 = vmatprep.mubr.bf16.mxu1 %v7295_v49  ;;  %v6224_v49 = vld [vmem:[%s8956_s2 + $0x5a0] ss:$16 sps:$4 sm:$0xff]   ;;  %v6288_v32 = vld [vmem:[%s8956_s2 + $0x4e8] ss:$16 sps:$4 sm:$0xff]  }
  0x73   : > { %1842 = vmatpush1.bf16.msra.mxu0 %v6206_v36  ;;  %v6299_v36 = vld [vmem:[%s8956_s2 + $0x24c] ss:$16 sps:$4 sm:$0xff]  }
  0x74   : > { %1940 = vmatpush1.bf16.msra.mxu1 %v6203_v35  ;;  %1843 = vmatprep.subr.bf16.mxu0 %v6214_v39  ;;  %v6296_v35 = vld [vmem:[%s8956_s2 + $0x4cc] ss:$16 sps:$4 sm:$0xff]  }
  0x75   : > { %1941 = vmatprep.subr.bf16.mxu1 %v6211_v38  ;;  %v6302_v38 = vld [vmem:[%s8956_s2 + $0x4ac] ss:$16 sps:$4 sm:$0xff]  }
  0x76   : > { %v6305_v39 = vld [vmem:[%s8956_s2 + $0x22c] ss:$16 sps:$4 sm:$0xff]  }
  0x77   : > { %1844 = vmatpush2.bf16.msra.mxu0 %v6212_v41  ;;  %v6308_v41 = vld [vmem:[%s8956_s2 + $0x48c] ss:$16 sps:$4 sm:$0xff]  }
  0x78   : > { %1942 = vmatpush1.bf16.msra.mxu1 %v6209_v40  ;;  %1845 = vmatprep.subr.bf16.mxu0 %v6220_v43  ;;  %v6300_v40 = vld [vmem:[%s8956_s2 + $0x4a8] ss:$16 sps:$4 sm:$0xff]  }
  0x79   : > { %1943 = vmatprep.subr.bf16.mxu1 %v6217_v42  ;;  %v6311_v42 = vld [vmem:[%s8956_s2 + $0x20c] ss:$16 sps:$4 sm:$0xff]   ;;  %v6309_v43 = vld [vmem:[%s8956_s2 + $0x208] ss:$16 sps:$4 sm:$0xff]  }
  0x7b   : > { %1846 = vmatpush2.bf16.msra.mxu0 %v6218_v45  ;;  %v6312_v45 = vld [vmem:[%s8956_s2 + $0x468] ss:$16 sps:$4 sm:$0xff]  }
  0x7c   : > { %1944 = vmatpush1.bf16.msra.mxu1 %v6215_v44  ;;  %1847 = vmatprep.subr.bf16.mxu0 %v6226_v47  ;;  %v6314_v44 = vld [vmem:[%s8956_s2 + $0x46c] ss:$16 sps:$4 sm:$0xff]  }
  0x7d   : > { %1945 = vmatprep.subr.bf16.mxu1 %v6223_v46  ;;  %v6315_v46 = vld [vmem:[%s8956_s2 + $0x3e8] ss:$16 sps:$4 sm:$0xff]   ;;  %v6320_v47 = vld [vmem:[%s8956_s2 + $0x44c] ss:$16 sps:$4 sm:$0xff]  }
  0x7f   : > { %1848 = vmatpush2.bf16.msra.mxu0 %v6224_v49  ;;  %v6318_v49 = vld [vmem:[%s8956_s2 + $0x448] ss:$16 sps:$4 sm:$0xff]  }
  0x80   : > { %1946 = vmatpush1.bf16.msra.mxu1 %v6221_v48  ;;  %1849 = vmatprep.subr.bf16.mxu0 %v6232_v52  ;;  %v6323_v48 = vld [vmem:[%s8956_s2 + $0x3cc] ss:$16 sps:$4 sm:$0xff]  }
  0x81   : > { %1947 = vmatprep.subr.bf16.mxu1 %v6229_v50  ;;  %v6326_v50 = vld [vmem:[%s8956_s2 + $0x42c] ss:$16 sps:$4 sm:$0xff]  }
  0x82   : > { %v6329_v52 = vld [vmem:[%s8956_s2 + $0x3ac] ss:$16 sps:$4 sm:$0xff]  }
  0x83   : > { %1850 = vmatpush2.bf16.msra.mxu0 %v6230_v54  ;;  %v6327_v54 = vld [vmem:[%s8956_s2 + $0x3a8] ss:$16 sps:$4 sm:$0xff]  }
  0x84   : > { %1948 = vmatpush1.bf16.msra.mxu1 %v6227_v53  ;;  %1851 = vmatprep.subr.bf16.mxu0 %v6238_v56  ;;  %v6324_v53 = vld [vmem:[%s8956_s2 + $0x428] ss:$16 sps:$4 sm:$0xff]   ;;  %v6335_v56 = vld [vmem:[%s8956_s2 + $0x38c] ss:$16 sps:$4 sm:$0xff]  }
  0x85   : > { %1949 = vmatprep.subr.bf16.mxu1 %v6235_v55  ;;  %v6332_v55 = vld [vmem:[%s8956_s2 + $0x40c] ss:$16 sps:$4 sm:$0xff]  }
  0x87   : > { %1852 = vmatpush2.bf16.msra.mxu0 %v6236_v58  ;;  %v6333_v58 = vld [vmem:[%s8956_s2 + $0x388] ss:$16 sps:$4 sm:$0xff]  }
  0x88   : > { %1950 = vmatpush2.bf16.msra.mxu1 %v6233_v57  ;;  %1853 = vmatprep.subr.bf16.mxu0 %v6244_v60  ;;  %v6330_v57 = vld [vmem:[%s8956_s2 + $0x408] ss:$16 sps:$4 sm:$0xff]   ;;  %v6341_v60 = vld [vmem:[%s8956_s2 + $0x36c] ss:$16 sps:$4 sm:$0xff]  }
  0x89   : > { %1951 = vmatprep.subr.bf16.mxu1 %v6241_v59  ;;  %v6338_v59 = vld [vmem:[%s8956_s2 + $0x5ec] ss:$16 sps:$4 sm:$0xff]  }
  0x8b   : > { %1854 = vmatpush2.bf16.msra.mxu0 %v6242_v62  ;;  %v6339_v62 = vld [vmem:[%s8956_s2 + $0x368] ss:$16 sps:$4 sm:$0xff]  }
  0x8c   : > { %1952 = vmatpush2.bf16.msra.mxu1 %v6239_v61  ;;  %1855 = vmatprep.subr.bf16.mxu0 %v6250_v0  ;;  %v6336_v61 = vld [vmem:[%s8956_s2 + $0x5e8] ss:$16 sps:$4 sm:$0xff]   ;;  %v6347_v0 = vld [vmem:[%s8956_s2 + $0x34c] ss:$16 sps:$4 sm:$0xff]  }
  0x8d   : > { %1953 = vmatprep.subr.bf16.mxu1 %v6247_v63  ;;  %v6344_v63 = vld [vmem:[%s8956_s2 + $0x5cc] ss:$16 sps:$4 sm:$0xff]  }
  0x8f   : > { %1856 = vmatpush2.bf16.msra.mxu0 %v6248_v2  ;;  %v6345_v2 = vld [vmem:[%s8956_s2 + $0x348] ss:$16 sps:$4 sm:$0xff]  }
  0x90   : > { %1954 = vmatpush2.bf16.msra.mxu1 %v6245_v1  ;;  %1857 = vmatprep.subr.bf16.mxu0 %v6256_v5  ;;  %v6342_v1 = vld [vmem:[%s8956_s2 + $0x5c8] ss:$16 sps:$4 sm:$0xff]   ;;  %v6353_v5 = vld [vmem:[%s8956_s2 + $0x32c] ss:$16 sps:$4 sm:$0xff]  }
  0x91   : > { %1955 = vmatprep.subr.bf16.mxu1 %v6253_v4  ;;  %v6350_v4 = vld [vmem:[%s8956_s2 + $0x5ac] ss:$16 sps:$4 sm:$0xff]  }
  0x93   : > { %1858 = vmatpush2.bf16.msra.mxu0 %v6254_v7  ;;  %v6351_v7 = vld [vmem:[%s8956_s2 + $0x328] ss:$16 sps:$4 sm:$0xff]  }
  0x94   : > { %1956 = vmatpush2.bf16.msra.mxu1 %v6251_v6  ;;  %1986 = vmatprep.subr.bf16.mxu0 %v6265_v10  ;;  %v6348_v6 = vld [vmem:[%s8956_s2 + $0x5a8] ss:$16 sps:$4 sm:$0xff]   ;;  %v6359_v10 = vld [vmem:[%s8956_s2 + $0x30c] ss:$16 sps:$4 sm:$0xff]  }
  0x95   : > { %1957 = vmatprep.subr.bf16.mxu1 %v6262_v8  ;;  %v6356_v8 = vld [vmem:[%s8956_s2 + $0x58c] ss:$16 sps:$4 sm:$0xff]  }
  0x96   : > { %1860 = vmatmul.mubr.bf16.vlgmr.msra.gmra.mxu0 %v7554_v11 }
  0x97   : > { %1987 = vmatpush1.bf16.msra.mxu0 %v6263_v13  ;;  %1869 = vmatprep.mubr.bf16.mxu0 %v7569_v17  ;;  %v6357_v13 = vld [vmem:[%s8956_s2 + $0x308] ss:$16 sps:$4 sm:$0xff]  }
  0x98   : > { %1958 = vmatpush2.bf16.msra.mxu1 %v6260_v12  ;;  %1988 = vmatprep.subr.bf16.mxu0 %v6272_v16  ;;  %v6354_v12 = vld [vmem:[%s8956_s2 + $0x588] ss:$16 sps:$4 sm:$0xff]   ;;  %v6365_v16 = vld [vmem:[%s8956_s2 + $0x60c] ss:$16 sps:$4 sm:$0xff]  }
  0x99   : > { %1959 = vmatprep.subr.bf16.mxu1 %v6269_v15  ;;  %v6362_v15 = vld [vmem:[%s8956_s2 + $0x56c] ss:$16 sps:$4 sm:$0xff]  }
  0x9b   : > { %1989 = vmatpush1.bf16.msra.mxu0 %v6270_v20  ;;  %v6363_v20 = vld [vmem:[%s8956_s2 + $0x608] ss:$16 sps:$4 sm:$0xff]  }
  0x9c   : > { %1960 = vmatpush2.bf16.msra.mxu1 %v6267_v18  ;;  %1990 = vmatprep.subr.bf16.mxu0 %v6281_v22  ;;  %v6360_v18 = vld [vmem:[%s8956_s2 + $0x568] ss:$16 sps:$4 sm:$0xff]  }
  0x9d   : > { %1961 = vmatprep.subr.bf16.mxu1 %v6277_v21  ;;  %v6368_v21 = vld [vmem:[%s8956_s2 + $0x54c] ss:$16 sps:$4 sm:$0xff]   ;;  %v6366_v22 = vld [vmem:[%s8956_s2 + $0x548] ss:$16 sps:$4 sm:$0xff]  }
  0x9e   : > { %1870 = vmatmul.mubr.bf16.gmra.mxu0 %v7586_v23 }
  0x9f   : > { %1991 = vmatpush1.bf16.msra.mxu0 %v6279_v25  ;;  %2018 = vmatprep.mubr.bf16.mxu0 %v7301_v51  ;;  %v6297_v51 = vld [vmem:[%s8956_s2 + $0x248] ss:$16 sps:$4 sm:$0xff]  }
  0xa0   : > { %1962 = vmatpush2.bf16.msra.mxu1 %v6275_v24  ;;  %1992 = vmatprep.subr.bf16.mxu0 %v6287_v27  ;;  %v6377_v24 = vld [vmem:[%s8958_s4 + $0x74] ss:$8 sps:$4 sm:$0xff]   ;;  %v6959_v25 = vld [vmem:[%s7280_s23 + $0x8] ss:$28 sps:$4 sm:$0xff]  }
  0xa1   : > { %1963 = vmatprep.subr.bf16.mxu1 %v6284_v26  ;;  %v6371_v26 = vld [vmem:[%s8956_s2 + $0x52c] ss:$16 sps:$4 sm:$0xff]   ;;  %v6960_v27 = vld [vmem:[%s7280_s23 + $0x44] ss:$28 sps:$4 sm:$0xff]  }
  0xa3   : > { %1993 = vmatpush1.bf16.msra.mxu0 %v6285_v29  ;;  %v6374_v29 = vld [vmem:[%s8956_s2 + $0x50c] ss:$16 sps:$4 sm:$0xff]  }
  0xa4   : > { %1964 = vmatpush2.bf16.msra.mxu1 %v6282_v28  ;;  %1994 = vmatprep.subr.bf16.mxu0 %v6293_v31  ;;  %v6369_v28 = vld [vmem:[%s8956_s2 + $0x528] ss:$16 sps:$4 sm:$0xff]  }
  0xa5   : > { %2039 = vmatprep.subr.bf16.mxu1 %v6290_v30  ;;  %v6961_v30 = vld [vmem:[%s7280_s23 + $0x40] ss:$28 sps:$4 sm:$0xff]   ;;  %v6372_v31 = vld [vmem:[%s8956_s2 + $0x508] ss:$16 sps:$4 sm:$0xff]  }
  0xa7   : > { %1966 = vmatmul.mubr.bf16.vlgmr.msra.gmra.mxu1 %v7351_v3  ;;  %1995 = vmatpush1.bf16.msra.mxu0 %v6291_v34  ;;  %v6303_v3 = vld [vmem:[%s8956_s2 + $0x228] ss:$16 sps:$4 sm:$0xff]   ;;  %v6380_v34 = vld [vmem:[%s8958_s4 + $0x64] ss:$8 sps:$4 sm:$0xff]  }
  0xa8   : > { %2040 = vmatpush1.bf16.msra.mxu1 %v6288_v32  ;;  %1996 = vmatprep.subr.bf16.mxu0 %v6299_v36  ;;  %v6375_v32 = vld [vmem:[%s8958_s4 + $0x70] ss:$8 sps:$4 sm:$0xff]   ;;  %v6378_v36 = vld [vmem:[%s8958_s4 + $0x60] ss:$8 sps:$4 sm:$0xff]  }
  0xa9   : > { %2041 = vmatprep.subr.bf16.mxu1 %v6296_v35  ;;  %1975 = vmatprep.mubr.bf16.mxu1 %v7367_v9  ;;  %v6306_v9 = vld [vmem:[%s8956_s2 + $0x488] ss:$16 sps:$4 sm:$0xff]  }
  0xaa   : > { %v6962_v35 = vld [vmem:[%s7280_s23 + $0x18] ss:$28 sps:$4 sm:$0xff]  }
  0xab   : > { %1997 = vmatpush1.bf16.msra.mxu0 %v6297_v51  ;;  %v6386_v51 = vld [vmem:[%s8958_s4 + $0x44] ss:$8 sps:$4 sm:$0xff]  }
  0xac   : > { %2042 = vmatpush1.bf16.msra.mxu1 %v6294_v37  ;;  %1998 = vmatprep.subr.bf16.mxu0 %v6305_v39  ;;  %v6383_v37 = vld [vmem:[%s8958_s4 + $0x54] ss:$8 sps:$4 sm:$0xff]  }
  0xad   : > { %2043 = vmatprep.subr.bf16.mxu1 %v6302_v38  ;;  %v6423_v38 = vld [vmem:[%s8958_s4 + $0x170] ss:$8 sps:$4 sm:$0xff]   ;;  %v6425_v39 = vld [vmem:[%s8958_s4 + $0x174] ss:$8 sps:$4 sm:$0xff]  }
  0xaf   : > { %1976 = vmatmul.mubr.bf16.gmra.mxu1 %v7382_v14  ;;  %1999 = vmatpush1.bf16.msra.mxu0 %v6303_v3  ;;  %v6317_v14 = vld [vmem:[%s8956_s2 + $0x3ec] ss:$16 sps:$4 sm:$0xff]  }
  0xb0   : > { %2044 = vmatpush1.bf16.msra.mxu1 %v6300_v40  ;;  %2000 = vmatprep.subr.bf16.mxu0 %v6311_v42  ;;  %v6428_v40 = vld [vmem:[%s8958_s4 + $0x164] ss:$8 sps:$4 sm:$0xff]   ;;  %v6389_v3 = vld [vmem:[%s8958_s4 + $0x34] ss:$8 sps:$4 sm:$0xff]  }
  0xb1   : > { %2045 = vmatprep.subr.bf16.mxu1 %v6308_v41  ;;  %2071 = vmatprep.mubr.bf16.mxu1 %v7436_v33  ;;  %v6321_v33 = vld [vmem:[%s8956_s2 + $0x3c8] ss:$16 sps:$4 sm:$0xff]   ;;  %v6431_v42 = vld [vmem:[%s8958_s4 + $0x154] ss:$8 sps:$4 sm:$0xff]  }
  0xb2   : > { %v6426_v41 = vld [vmem:[%s8958_s4 + $0x160] ss:$8 sps:$4 sm:$0xff]  }
  0xb3   : > { %2001 = vmatpush1.bf16.msra.mxu0 %v6309_v43  ;;  %v6392_v43 = vld [vmem:[%s8958_s4 + $0x24] ss:$8 sps:$4 sm:$0xff]  }
  0xb4   : > { %2046 = vmatpush1.bf16.msra.mxu1 %v6306_v9  ;;  %2002 = vmatprep.subr.bf16.mxu0 %v6317_v14  ;;  %v6387_v9 = vld [vmem:[%s8958_s4 + $0x30] ss:$8 sps:$4 sm:$0xff]   ;;  %v6434_v14 = vld [vmem:[%s8958_s4 + $0x144] ss:$8 sps:$4 sm:$0xff]  }
  0xb5   : > { %2047 = vmatprep.subr.bf16.mxu1 %v6314_v44  ;;  %v6429_v44 = vld [vmem:[%s8958_s4 + $0x150] ss:$8 sps:$4 sm:$0xff]  }
  0xb7   : > { %2003 = vmatpush2.bf16.msra.mxu0 %v6315_v46  ;;  %v6395_v46 = vld [vmem:[%s8958_s4 + $0x14] ss:$8 sps:$4 sm:$0xff]  }
  0xb8   : > { %2048 = vmatpush1.bf16.msra.mxu1 %v6312_v45  ;;  %2004 = vmatprep.subr.bf16.mxu0 %v6323_v48  ;;  %v6390_v45 = vld [vmem:[%s8958_s4 + $0x20] ss:$8 sps:$4 sm:$0xff]   ;;  %v6437_v48 = vld [vmem:[%s8958_s4 + $0x134] ss:$8 sps:$4 sm:$0xff]  }
  0xb9   : > { %2049 = vmatprep.subr.bf16.mxu1 %v6320_v47  ;;  %v6432_v47 = vld [vmem:[%s8958_s4 + $0x140] ss:$8 sps:$4 sm:$0xff]  }
  0xbb   : > { %2005 = vmatpush2.bf16.msra.mxu0 %v6321_v33  ;;  %v6398_v33 = vld [vmem:[%s8958_s4 + $0x4] ss:$8 sps:$4 sm:$0xff]  }
  0xbc   : > { %2050 = vmatpush1.bf16.msra.mxu1 %v6318_v49  ;;  %2006 = vmatprep.subr.bf16.mxu0 %v6329_v52  ;;  %v6393_v49 = vld [vmem:[%s8958_s4 + $0x10] ss:$8 sps:$4 sm:$0xff]   ;;  %v6440_v52 = vld [vmem:[%s8958_s4 + $0x124] ss:$8 sps:$4 sm:$0xff]  }
  0xbd   : > { %2051 = vmatprep.subr.bf16.mxu1 %v6326_v50  ;;  %v6435_v50 = vld [vmem:[%s8958_s4 + $0x130] ss:$8 sps:$4 sm:$0xff]  }
  0xbf   : > { %2007 = vmatpush2.bf16.msra.mxu0 %v6327_v54  ;;  %v6401_v54 = vld [vmem:[%s8958_s4 + $0xf4] ss:$8 sps:$4 sm:$0xff]  }
  0xc0   : > { %2052 = vmatpush1.bf16.msra.mxu1 %v6324_v53  ;;  %2008 = vmatprep.subr.bf16.mxu0 %v6335_v56  ;;  %v6396_v53 = vld [vmem:[%s8958_s4] ss:$8 sps:$4 sm:$0xff]   ;;  %v6443_v56 = vld [vmem:[%s8958_s4 + $0x114] ss:$8 sps:$4 sm:$0xff]  }
  0xc1   : > { %2053 = vmatprep.subr.bf16.mxu1 %v6332_v55  ;;  %v6438_v55 = vld [vmem:[%s8958_s4 + $0x120] ss:$8 sps:$4 sm:$0xff]  }
  0xc3   : > { %2009 = vmatpush2.bf16.msra.mxu0 %v6333_v58  ;;  %v6404_v58 = vld [vmem:[%s8958_s4 + $0xe4] ss:$8 sps:$4 sm:$0xff]  }
  0xc4   : > { %2054 = vmatpush1.bf16.msra.mxu1 %v6330_v57  ;;  %2010 = vmatprep.subr.bf16.mxu0 %v6341_v60  ;;  %v6399_v57 = vld [vmem:[%s8958_s4 + $0xf0] ss:$8 sps:$4 sm:$0xff]   ;;  %v6446_v60 = vld [vmem:[%s8958_s4 + $0x104] ss:$8 sps:$4 sm:$0xff]  }
  0xc5   : > { %2055 = vmatprep.subr.bf16.mxu1 %v6338_v59  ;;  %v6441_v59 = vld [vmem:[%s8958_s4 + $0x110] ss:$8 sps:$4 sm:$0xff]  }
  0xc7   : > { %2011 = vmatpush2.bf16.msra.mxu0 %v6339_v62  ;;  %v6407_v62 = vld [vmem:[%s8958_s4 + $0xd4] ss:$8 sps:$4 sm:$0xff]  }
  0xc8   : > { %2056 = vmatpush2.bf16.msra.mxu1 %v6336_v61  ;;  %2012 = vmatprep.subr.bf16.mxu0 %v6347_v0  ;;  %v6402_v61 = vld [vmem:[%s8958_s4 + $0xe0] ss:$8 sps:$4 sm:$0xff]   ;;  %v6449_v0 = vld [vmem:[%s8958_s4 + $0x1f4] ss:$8 sps:$4 sm:$0xff]  }
  0xc9   : > { %2057 = vmatprep.subr.bf16.mxu1 %v6344_v63  ;;  %v6444_v63 = vld [vmem:[%s8958_s4 + $0x100] ss:$8 sps:$4 sm:$0xff]  }
  0xcb   : > { %2013 = vmatpush2.bf16.msra.mxu0 %v6345_v2  ;;  %v6410_v2 = vld [vmem:[%s8958_s4 + $0xc4] ss:$8 sps:$4 sm:$0xff]  }
  0xcc   : > { %2058 = vmatpush2.bf16.msra.mxu1 %v6342_v1  ;;  %2014 = vmatprep.subr.bf16.mxu0 %v6353_v5  ;;  %v6405_v1 = vld [vmem:[%s8958_s4 + $0xd0] ss:$8 sps:$4 sm:$0xff]   ;;  %v6408_v5 = vld [vmem:[%s8958_s4 + $0xc0] ss:$8 sps:$4 sm:$0xff]  }
  0xcd   : > { %2059 = vmatprep.subr.bf16.mxu1 %v6350_v4  ;;  %v6447_v4 = vld [vmem:[%s8958_s4 + $0x1f0] ss:$8 sps:$4 sm:$0xff]  }
  0xcf   : > { %2015 = vmatpush2.bf16.msra.mxu0 %v6351_v7  ;;  %v6411_v7 = vld [vmem:[%s8958_s4 + $0xb0] ss:$8 sps:$4 sm:$0xff]  }
  0xd0   : > { %2060 = vmatpush2.bf16.msra.mxu1 %v6348_v6  ;;  %2016 = vmatprep.subr.bf16.mxu0 %v6359_v10  ;;  %v6413_v6 = vld [vmem:[%s8958_s4 + $0xb4] ss:$8 sps:$4 sm:$0xff]   ;;  %v6414_v10 = vld [vmem:[%s8958_s4 + $0xa0] ss:$8 sps:$4 sm:$0xff]  }
  0xd1   : > { %2061 = vmatprep.subr.bf16.mxu1 %v6356_v8  ;;  %v6416_v8 = vld [vmem:[%s8958_s4 + $0xa4] ss:$8 sps:$4 sm:$0xff]  }
  0xd3   : > { %2017 = vmatpush2.bf16.msra.mxu0 %v6357_v13  ;;  %v6452_v13 = vld [vmem:[%s8958_s4 + $0x1e4] ss:$8 sps:$4 sm:$0xff]  }
  0xd4   : > { %2062 = vmatpush2.bf16.msra.mxu1 %v6354_v12  ;;  %2106 = vmatprep.subr.bf16.mxu0 %v6365_v16  ;;  %v6419_v12 = vld [vmem:[%s8958_s4 + $0x94] ss:$8 sps:$4 sm:$0xff]   ;;  %v6417_v16 = vld [vmem:[%s8958_s4 + $0x90] ss:$8 sps:$4 sm:$0xff]  }
  0xd5   : > { %2063 = vmatprep.subr.bf16.mxu1 %v6362_v15  ;;  %v6450_v15 = vld [vmem:[%s8958_s4 + $0x1e0] ss:$8 sps:$4 sm:$0xff]  }
  0xd6   : > { %2019 = vmatmul.mubr.bf16.vlgmr.msra.gmra.mxu0 %v6959_v25  ;;  %v6456_v25 = vld [vmem:[%s8958_s4 + $0x1c0] ss:$8 sps:$4 sm:$0xff]  }
  0xd7   : > { %2107 = vmatpush1.bf16.msra.mxu0 %v6363_v20  ;;  %2028 = vmatprep.mubr.bf16.mxu0 %v6960_v27  ;;  %v6455_v20 = vld [vmem:[%s8958_s4 + $0x1d4] ss:$8 sps:$4 sm:$0xff]   ;;  %v6459_v27 = vld [vmem:[%s8958_s4 + $0x1b0] ss:$8 sps:$4 sm:$0xff]  }
  0xd8   : > { %2064 = vmatpush2.bf16.msra.mxu1 %v6360_v18  ;;  %2565 = vmatprep.subr.bf16.mxu0 %v6377_v24  ;;  %v6422_v18 = vld [vmem:[%s8958_s4 + $0x84] ss:$8 sps:$4 sm:$0xff]  }
  0xd9   : > { %2065 = vmatprep.subr.bf16.mxu1 %v6368_v21  ;;  %v6453_v21 = vld [vmem:[%s8958_s4 + $0x1d0] ss:$8 sps:$4 sm:$0xff]   ;;  %v6458_v24 = vld [vmem:[%s8958_s4 + $0x1c4] ss:$8 sps:$4 sm:$0xff]  }
  0xdc   : > { %2066 = vmatpush2.bf16.msra.mxu1 %v6366_v22  ;;  %v6420_v22 = vld [vmem:[%s8958_s4 + $0x80] ss:$8 sps:$4 sm:$0xff]  }
  0xdd   : > { %2067 = vmatprep.subr.bf16.mxu1 %v6371_v26  ;;  %v6461_v26 = vld [vmem:[%s8958_s4 + $0x1b4] ss:$8 sps:$4 sm:$0xff]  }
  0xde   : > { %2029 = vmatmul.mubr.bf16.gmra.mxu0 %v6961_v30 }
  0xdf   : > { %2124 = vmatprep.mubr.bf16.mxu0 %v7026_v19 }
  0xe0   : > { %2068 = vmatpush2.bf16.msra.mxu1 %v6369_v28  ;;  %v6464_v28 = vld [vmem:[%s8958_s4 + $0x1a4] ss:$8 sps:$4 sm:$0xff]  }
  0xe1   : > { %2069 = vmatprep.subr.bf16.mxu1 %v6374_v29  ;;  %v6462_v29 = vld [vmem:[%s8958_s4 + $0x1a0] ss:$8 sps:$4 sm:$0xff]  }
  0xe4   : > { %2070 = vmatpush2.bf16.msra.mxu1 %v6372_v31  ;;  %v6467_v31 = vld [vmem:[%s8958_s4 + $0x194] ss:$8 sps:$4 sm:$0xff]  }
  0xe5   : > { %2618 = vmatprep.subr.bf16.mxu1 %v6425_v39 }
  0xe6   : > { %5555 = vmatmul.mubr.msk.bf16.vlgmr.msra.gmra.mxu0 %vm1714_vm0, %v6962_v35  ;;  %v6470_v35 = vld [vmem:[%s8958_s4 + $0x184] ss:$8 sps:$4 sm:$0xff]  }
  0xe7   : > { %2072 = vmatmul.mubr.bf16.vlgmr.msra.gmra.mxu1 %v7554_v11  ;;  %2134 = vmatprep.mubr.bf16.mxu0 %v7026_v19  ;;  %v6381_v11 = vld [vmem:[%s8958_s4 + $0x50] ss:$8 sps:$4 sm:$0xff]  }
  0xe8   : > { %2081 = vmatprep.mubr.bf16.mxu1 %v7569_v17  ;;  %2566 = vmatpush1.bf16.msra.mxu0 %v6375_v32  ;;  %v6963_v17 = vld [vmem:[%s7280_s23 + $0x50] ss:$28 sps:$4 sm:$0xff]   ;;  %s6016_s23 = smul.u32 112, %s397_s22 }
  0xe9   : > { %2567 = vmatprep.subr.bf16.mxu0 %v6380_v34  ;;  %2619 = vmatpush1.bf16.msra.mxu1 %v6423_v38  ;;  %v6465_v32 = vld [vmem:[%s8958_s4 + $0x190] ss:$8 sps:$4 sm:$0xff]  }
  0xea   : > { %2620 = vmatprep.subr.bf16.mxu1 %v6428_v40 }
  0xec   : > { %2568 = vmatpush1.bf16.msra.mxu0 %v6378_v36  ;;  %v6468_v36 = vld [vmem:[%s8958_s4 + $0x180] ss:$8 sps:$4 sm:$0xff]  }
  0xed   : > { %2569 = vmatprep.subr.bf16.mxu0 %v6383_v37  ;;  %2621 = vmatpush1.bf16.msra.mxu1 %v6426_v41 }
  0xee   : > { %5556 = vmatmul.mubr.msk.bf16.gmra.mxu0 %vm1714_vm0, %v6963_v17  ;;  %2622 = vmatprep.subr.bf16.mxu1 %v6431_v42 }
  0xef   : > { %2082 = vmatmul.mubr.bf16.gmra.mxu1 %v7586_v23  ;;  %v6384_v23 = vld [vmem:[%s8958_s4 + $0x40] ss:$8 sps:$4 sm:$0xff]  }
  0xf0   : > { %2570 = vmatpush1.bf16.msra.mxu0 %v6381_v11 }
  0xf1   : > { %2571 = vmatprep.subr.bf16.mxu0 %v6386_v51  ;;  %2623 = vmatpush1.bf16.msra.mxu1 %v6429_v44 }
  0xf2   : > { %2624 = vmatprep.subr.bf16.mxu1 %v6434_v14 }
  0xf4   : > { %2572 = vmatpush1.bf16.msra.mxu0 %v6384_v23  ;;  %v644_v23 = vlaneseq }
  0xf5   : > { %2573 = vmatprep.subr.bf16.mxu0 %v6389_v3  ;;  %2625 = vmatpush1.bf16.msra.mxu1 %v6432_v47  ;;  %v8001_v47 = vld [vmem:[%s8957_s3] sm:$0xf] }
  0xf6   : > { %2626 = vmatprep.subr.bf16.mxu1 %v6437_v48  ;;  %v7990_v42 = vshrl.u32 %v644_v23, 7 }
  0xf8   : > { %2574 = vmatpush1.bf16.msra.mxu0 %v6387_v9  ;;  %v7993_v44 = vsub.s32 1, %v7990_v42  ;;  %v7996_v14 = vsub.s32 0, %v7990_v42 }
  0xf9   : > { %2575 = vmatprep.subr.bf16.mxu0 %v6392_v43  ;;  %2627 = vmatpush1.bf16.msra.mxu1 %v6435_v50 }
  0xfa   : > { %2628 = vmatprep.subr.bf16.mxu1 %v6440_v52  ;;  %v651_v48 = vrot.slane %v8001_v47, %v7993_v44 }
  0xfc   : > { %2576 = vmatpush1.bf16.msra.mxu0 %v6390_v45 }
  0xfd   : > { %2577 = vmatprep.subr.bf16.mxu0 %v6395_v46  ;;  %2629 = vmatpush1.bf16.msra.mxu1 %v6438_v55 }
  0xfe   : > { %2630 = vmatprep.subr.bf16.mxu1 %v6443_v56 }
 0x100   : > { %2578 = vmatpush1.bf16.msra.mxu0 %v6393_v49  ;;  %v647_v49 = vrot.slane %v8001_v47, %v7996_v14 }
 0x101   : > { %2579 = vmatprep.subr.bf16.mxu0 %v6398_v33  ;;  %2631 = vmatpush1.bf16.msra.mxu1 %v6441_v59 }
 0x102   : > { %2632 = vmatprep.subr.bf16.mxu1 %v6446_v60 }
 0x104   : > { %2580 = vmatpush1.bf16.msra.mxu0 %v6396_v53 }
 0x105   : > { %2581 = vmatprep.subr.bf16.mxu0 %v6401_v54  ;;  %2633 = vmatpush1.bf16.msra.mxu1 %v6444_v63 }
 0x106   : > { %2634 = vmatprep.subr.bf16.mxu1 %v6449_v0 }
 0x108   : > { %2582 = vmatpush2.bf16.msra.mxu0 %v6399_v57 }
 0x109   : > { %2583 = vmatprep.subr.bf16.mxu0 %v6404_v58  ;;  %2635 = vmatpush2.bf16.msra.mxu1 %v6447_v4 }
 0x10a   : > { %2636 = vmatprep.subr.bf16.mxu1 %v6452_v13 }
 0x10c   : > { %2584 = vmatpush2.bf16.msra.mxu0 %v6402_v61 }
 0x10d   : > { %2585 = vmatprep.subr.bf16.mxu0 %v6407_v62  ;;  %2637 = vmatpush2.bf16.msra.mxu1 %v6450_v15 }
 0x10e   : > { %2638 = vmatprep.subr.bf16.mxu1 %v6455_v20 }
 0x110   : > { %2586 = vmatpush2.bf16.msra.mxu0 %v6405_v1 }
 0x111   : > { %2587 = vmatprep.subr.bf16.mxu0 %v6410_v2  ;;  %2639 = vmatpush2.bf16.msra.mxu1 %v6453_v21 }
 0x112   : > { %2640 = vmatprep.subr.bf16.mxu1 %v6458_v24 }
 0x114   : > { %2588 = vmatpush2.bf16.msra.mxu0 %v6408_v5 }
 0x115   : > { %2589 = vmatprep.subr.bf16.mxu0 %v6413_v6  ;;  %2641 = vmatpush2.bf16.msra.mxu1 %v6456_v25 }
 0x116   : > { %2642 = vmatprep.subr.bf16.mxu1 %v6461_v26  ;;  %v1755_v11 = vpop.f32.mrf.mxu0 }
 0x117   : > { %v1808_v30 = vpop.f32.mrf.mxu1  ;;  %v1756_v53 = vadd.f32 %v1755_v11, %v647_v49 }
 0x118   : > { %2590 = vmatpush2.bf16.msra.mxu0 %v6411_v7  ;;  %v1757_v17 = vpop.f32.mrf.mxu0 }
 0x119   : > { %2591 = vmatprep.subr.bf16.mxu0 %v6416_v8  ;;  %2643 = vmatpush2.bf16.msra.mxu1 %v6459_v27  ;;  %v1810_v34 = vpop.f32.mrf.mxu1  ;;  %v1758_v52 = vadd.f32 %v1757_v17, %v651_v48  ;;  %v1809_v60 = vadd.f32 %v1808_v30, %v1756_v53 }
 0x11a   : > { %2644 = vmatprep.subr.bf16.mxu1 %v6464_v28  ;;  %v1759_v39 = vpop.f32.mrf.mxu0 }
 0x11b   : > { %v1812_v37 = vpop.f32.mrf.mxu1  ;;  %v1760_v56 = vadd.f32 %v1759_v39, %v647_v49  ;;  %v1811_v58 = vadd.f32 %v1810_v34, %v1758_v52 }
 0x11c   : > { %2592 = vmatpush2.bf16.msra.mxu0 %v6414_v10  ;;  %v1761_v3 = vpop.f32.mrf.mxu0 }
 0x11d   : > { %2593 = vmatprep.subr.bf16.mxu0 %v6419_v12  ;;  %2645 = vmatpush2.bf16.msra.mxu1 %v6462_v29  ;;  %v1814_v51 = vpop.f32.mrf.mxu1  ;;  %v1762_v59 = vadd.f32 %v1761_v3, %v651_v48  ;;  %v1813_v63 = vadd.f32 %v1812_v37, %v1760_v56 }
 0x11e   : > { %2646 = vmatprep.subr.bf16.mxu1 %v6467_v31  ;;  %v1765_v9 = vpop.f32.mrf.mxu0 }
 0x11f   : > { %v1818_v38 = vpop.f32.mrf.mxu1  ;;  %v1815_v5 = vadd.f32 %v1814_v51, %v1762_v59  ;;  %v1766_v8 = vadd.f32 %v1765_v9, %v647_v49 }
 0x120   : > { %2594 = vmatpush2.bf16.msra.mxu0 %v6417_v16  ;;  %v1767_v45 = vpop.f32.mrf.mxu0 }
 0x121   : > { %2595 = vmatprep.subr.bf16.mxu0 %v6422_v18  ;;  %2647 = vmatpush2.bf16.msra.mxu1 %v6465_v32  ;;  %v1820_v40 = vpop.f32.mrf.mxu1  ;;  %v1768_v6 = vadd.f32 %v1767_v45, %v651_v48  ;;  %v1819_v26 = vadd.f32 %v1818_v38, %v1766_v8 }
 0x122   : > { %2648 = vmatprep.subr.bf16.mxu1 %v6470_v35  ;;  %v1769_v33 = vpop.f32.mrf.mxu0 }
 0x123   : > { %v1822_v41 = vpop.f32.mrf.mxu1  ;;  %v1770_v12 = vadd.f32 %v1769_v33, %v647_v49 }
 0x124   : > { %2596 = vmatpush2.bf16.msra.mxu0 %v6420_v22  ;;  %v1771_v54 = vpop.f32.mrf.mxu0  ;;  %v1821_v22 = vadd.f32 %v1820_v40, %v1768_v6 }
 0x125   : > { %2649 = vmatpush2.bf16.msra.mxu1 %v6468_v36  ;;  %v1824_v43 = vpop.f32.mrf.mxu1  ;;  %v1772_v24 = vadd.f32 %v1771_v54, %v651_v48  ;;  %v1823_v29 = vadd.f32 %v1822_v41, %v1770_v12 }
 0x127   : > { %v1914_v46 = vpop.f32.mrf.mxu1  ;;  %v1825_v11 = vadd.f32 %v1824_v43, %v1772_v24 }
 0x129   : > { %v1916_v50 = vpop.f32.mrf.mxu1 }
 0x12b   : > { %v1918_v55 = vpop.f32.mrf.mxu1 }
 0x12d   : > { %v1920_v61 = vpop.f32.mrf.mxu1 }
 0x12f   : > { %v1924_v2 = vpop.f32.mrf.mxu1 }
 0x131   : > { %v1926_v20 = vpop.f32.mrf.mxu1 }
 0x133   : > { %v1928_v35 = vpop.f32.mrf.mxu1 }
 0x135   : > { %v1930_v45 = vpop.f32.mrf.mxu1 }
 0x156   : > { %v1861_v57 = vpop.f32.mrf.mxu0 }
 0x157   : > { %v1862_v1 = vadd.f32 %v1861_v57, %v1809_v60 }
 0x158   : > { %v1863_v62 = vpop.f32.mrf.mxu0 }
 0x159   : > { %v1864_v0 = vadd.f32 %v1863_v62, %v1811_v58  ;;  %v1915_v18 = vadd.f32 %v1914_v46, %v1862_v1  ;;  %v8009_v62 = vsub.s32 3, %v7990_v42 }
 0x15a   : > { %v1865_v4 = vpop.f32.mrf.mxu0 }
 0x15b   : > { %v1866_v7 = vadd.f32 %v1865_v4, %v1813_v63  ;;  %v1917_v13 = vadd.f32 %v1916_v50, %v1864_v0  ;;  %v2145_v34 = vmax.f32 %v1915_v18, 0.0  ;;  %v8012_v63 = vsub.s32 2, %v7990_v42 }
 0x15c   : > { %v1867_v10 = vpop.f32.mrf.mxu0  ;;  %v659_v4 = vrot.slane %v8001_v47, %v8009_v62 }
 0x15d   : > { %v1919_v15 = vadd.f32 %v1918_v55, %v1866_v7  ;;  %v1868_v16 = vadd.f32 %v1867_v10, %v1815_v5  ;;  %v2146_v30 = vmax.f32 %v1917_v13, 0.0  ;;  %v655_v5 = vrot.slane %v8001_v47, %v8012_v63 }
 0x15e   : > { %v1871_v21 = vpop.f32.mrf.mxu0 }
 0x15f   : > { %v1921_v25 = vadd.f32 %v1920_v61, %v1868_v16  ;;  %v2149_v27 = vmax.f32 %v1919_v15, 0.0  ;;  %v1872_v36 = vadd.f32 %v1871_v21, %v1819_v26 }
 0x160   : > { %v1873_v28 = vpop.f32.mrf.mxu0 }
 0x161   : > { %v2150_v31 = vmax.f32 %v1921_v25, 0.0  ;;  %v1874_v32 = vadd.f32 %v1873_v28, %v1821_v22  ;;  %v2161_v39 = vpack.c.bf16 %v2149_v27, %v2145_v34  ;;  %v1925_v38 = vadd.f32 %v1924_v2, %v1872_v36 }
 0x162   : > { %v1875_v37 = vpop.f32.mrf.mxu0 }
 0x163   : > { %v1876_v51 = vadd.f32 %v1875_v37, %v1823_v29  ;;  %v2162_v17 = vpack.c.bf16 %v2150_v31, %v2146_v30  ;;  %v1927_v3 = vadd.f32 %v1926_v20, %v1874_v32  ;;  %v2153_v33 = vmax.f32 %v1925_v38, 0.0 }
 0x164   : > { %v1877_v23 = vpop.f32.mrf.mxu0 }
 0x165   : > { %v1929_v40 = vadd.f32 %v1928_v35, %v1876_v51  ;;  %v1878_v9 = vadd.f32 %v1877_v23, %v1825_v11  ;;  %2597 = vmatprep.mubr.bf16.mxu0 %v2162_v17  ;;  %v2154_v48 = vmax.f32 %v1927_v3, 0.0 }
 0x166   : > { %2598 = vmatmul.mubr.bf16.vlgmr.msra.gmra.mxu0 %v2161_v39 }
 0x167   : > { %v1931_v41 = vadd.f32 %v1930_v45, %v1878_v9  ;;  %v2157_v46 = vmax.f32 %v1929_v40, 0.0  ;;  %v1967_v43 = vpop.f32.mrf.mxu1 }
 0x168   : > { %v1968_v12 = vadd.f32 %v1967_v43, %v655_v5 }
 0x169   : > { %v2158_v49 = vmax.f32 %v1931_v41, 0.0  ;;  %v2165_v52 = vpack.c.bf16 %v2157_v46, %v2153_v33  ;;  %v1969_v53 = vpop.f32.mrf.mxu1 }
 0x16a   : > { %v1970_v10 = vadd.f32 %v1969_v53, %v659_v4 }
 0x16b   : > { %v2166_v50 = vpack.c.bf16 %v2158_v49, %v2154_v48  ;;  %v1971_v54 = vpop.f32.mrf.mxu1 }
 0x16c   : > { %v1972_v16 = vadd.f32 %v1971_v54, %v655_v5 }
 0x16d   : > { %2607 = vmatprep.mubr.bf16.mxu0 %v2166_v50  ;;  %v1973_v55 = vpop.f32.mrf.mxu1 }
 0x16e   : > { %2608 = vmatmul.mubr.bf16.gmra.mxu0 %v2165_v52  ;;  %v1974_v24 = vadd.f32 %v1973_v55, %v659_v4 }
 0x16f   : > { %2975 = vmatprep.mubr.bf16.mxu0 %v7026_v19  ;;  %v1977_v57 = vpop.f32.mrf.mxu1 }
 0x170   : > { %v1978_v32 = vadd.f32 %v1977_v57, %v655_v5 }
 0x171   : > { %v1979_v60 = vpop.f32.mrf.mxu1 }
 0x172   : > { %v1980_v30 = vadd.f32 %v1979_v60, %v659_v4 }
 0x173   : > { %v1981_v1 = vpop.f32.mrf.mxu1 }
 0x174   : > { %v1982_v23 = vadd.f32 %v1981_v1, %v655_v5 }
 0x175   : > { %v1983_v7 = vpop.f32.mrf.mxu1 }
 0x176   : > { %v1984_v9 = vadd.f32 %v1983_v7, %v659_v4 }
 0x196   : > { %v2020_v56 = vpop.f32.mrf.mxu0 }
 0x197   : > { %v2021_v20 = vadd.f32 %v2020_v56, %v1968_v12 }
 0x198   : > { %v2022_v58 = vpop.f32.mrf.mxu0 }
 0x199   : > { %v2023_v18 = vadd.f32 %v2022_v58, %v1970_v10 }
 0x19a   : > { %v2024_v59 = vpop.f32.mrf.mxu0 }
 0x19b   : > { %v2025_v25 = vadd.f32 %v2024_v59, %v1972_v16  ;;  %v6471_v16 = vld [vmem:[%s8960_s6 + $0xe0] ss:$16 sps:$4 sm:$0xff]  }
 0x19c   : > { %v2026_v61 = vpop.f32.mrf.mxu0 }
 0x19d   : > { %v2027_v47 = vadd.f32 %v2026_v61, %v1974_v24  ;;  %v6480_v24 = vld [vmem:[%s8960_s6 + $0xc8] ss:$16 sps:$4 sm:$0xff]  }
 0x19e   : > { %v2030_v0 = vpop.f32.mrf.mxu0 }
 0x19f   : > { %v2031_v38 = vadd.f32 %v2030_v0, %v1978_v32  ;;  %v6497_v32 = vld [vmem:[%s8960_s6 + $0x64] ss:$16 sps:$4 sm:$0xff]  }
 0x1a0   : > { %v2032_v2 = vpop.f32.mrf.mxu0 }
 0x1a1   : > { %v2033_v3 = vadd.f32 %v2032_v2, %v1980_v30  ;;  %v6494_v30 = vld [vmem:[%s8960_s6 + $0x8c] ss:$16 sps:$4 sm:$0xff]  }
 0x1a2   : > { %v2034_v6 = vpop.f32.mrf.mxu0 }
 0x1a3   : > { %v2035_v48 = vadd.f32 %v2034_v6, %v1982_v23  ;;  %v6507_v23 = vld [vmem:[%s8960_s6 + $0x20] ss:$16 sps:$4 sm:$0xff]  }
 0x1a4   : > { %v2036_v8 = vpop.f32.mrf.mxu0 }
 0x1a5   : > { %v2037_v55 = vadd.f32 %v2036_v8, %v1984_v9  ;;  %v6473_v8 = vld [vmem:[%s8960_s6 + $0xe4] ss:$16 sps:$4 sm:$0xff]  }
 0x1a6   : > { %v2126_v15 = vpop.f32.mrf.mxu0  ;;  %2943 = vmatprep.subr.bf16.mxu0 %v6473_v8  ;;  %v6515_v9 = vld [vmem:[%s8960_s6 + $0x4] ss:$16 sps:$4 sm:$0xff]  }
 0x1a7   : > { %v2073_v13 = vpop.f32.mrf.mxu1  ;;  %2944 = vmatpush1.bf16.msra.mxu0 %v6471_v16 }
 0x1a8   : > { %v2128_v22 = vpop.f32.mrf.mxu0  ;;  %v2074_v27 = vadd.f32 %v2073_v13, %v2021_v20  ;;  %v6479_v20 = vld [vmem:[%s8960_s6 + $0xc4] ss:$16 sps:$4 sm:$0xff]  }
 0x1a9   : > { %v2075_v21 = vpop.f32.mrf.mxu1  ;;  %2945 = vmatprep.subr.bf16.mxu0 %v6479_v20 }
 0x1aa   : > { %v2076_v26 = vadd.f32 %v2075_v21, %v2023_v18  ;;  %v2130_v29 = vpop.f32.mrf.mxu0  ;;  %v2127_v51 = vadd.f32 %v2126_v15, %v2074_v27  ;;  %v6476_v15 = vld [vmem:[%s8960_s6 + $0xec] ss:$16 sps:$4 sm:$0xff]   ;;  %v6474_v18 = vld [vmem:[%s8960_s6 + $0xe8] ss:$16 sps:$4 sm:$0xff]   ;;  %v6483_v27 = vld [vmem:[%s8960_s6 + $0xa0] ss:$16 sps:$4 sm:$0xff]  }
 0x1ab   : > { %v2077_v28 = vpop.f32.mrf.mxu1  ;;  %2996 = vmatprep.subr.bf16.mxu1 %v6476_v15  ;;  %v6482_v21 = vld [vmem:[%s8960_s6 + $0xcc] ss:$16 sps:$4 sm:$0xff]  }
 0x1ac   : > { %v2078_v31 = vadd.f32 %v2077_v28, %v2025_v25  ;;  %v2132_v35 = vpop.f32.mrf.mxu0  ;;  %v2129_v36 = vadd.f32 %v2128_v22, %v2076_v26  ;;  %v2147_v52 = vmax.f32 %v2127_v51, 0.0  ;;  %v6477_v22 = vld [vmem:[%s8960_s6 + $0xc0] ss:$16 sps:$4 sm:$0xff]   ;;  %v6485_v25 = vld [vmem:[%s8960_s6 + $0xa4] ss:$16 sps:$4 sm:$0xff]  }
 0x1ad   : > { %v2079_v34 = vpop.f32.mrf.mxu1  ;;  %2946 = vmatpush1.bf16.msra.mxu0 %v6477_v22  ;;  %v6488_v26 = vld [vmem:[%s8960_s6 + $0xac] ss:$16 sps:$4 sm:$0xff]   ;;  %v6486_v28 = vld [vmem:[%s8960_s6 + $0xa8] ss:$16 sps:$4 sm:$0xff]   ;;  %v6501_v51 = vld [vmem:[%s8960_s6 + $0x40] ss:$16 sps:$4 sm:$0xff]  }
 0x1ae   : > { %v2131_v37 = vadd.f32 %v2130_v29, %v2078_v31  ;;  %v2080_v11 = vadd.f32 %v2079_v34, %v2027_v47  ;;  %v2136_v39 = vpop.f32.mrf.mxu0  ;;  %v2148_v49 = vmax.f32 %v2129_v36, 0.0  ;;  %2947 = vmatprep.subr.bf16.mxu0 %v6485_v25  ;;  %v6491_v29 = vld [vmem:[%s8960_s6 + $0x84] ss:$16 sps:$4 sm:$0xff]   ;;  %v6489_v47 = vld [vmem:[%s8960_s6 + $0x80] ss:$16 sps:$4 sm:$0xff]  }
 0x1af   : > { %v2083_v17 = vpop.f32.mrf.mxu1  ;;  %v6492_v31 = vld [vmem:[%s8960_s6 + $0x88] ss:$16 sps:$4 sm:$0xff]   ;;  %v6500_v34 = vld [vmem:[%s8960_s6 + $0x6c] ss:$16 sps:$4 sm:$0xff]  }
 0x1b0   : > { %v2133_v40 = vadd.f32 %v2132_v35, %v2080_v11  ;;  %v2151_v45 = vmax.f32 %v2131_v37, 0.0  ;;  %v2138_v46 = vpop.f32.mrf.mxu0  ;;  %v2084_v43 = vadd.f32 %v2083_v17, %v2031_v38  ;;  %v6495_v35 = vld [vmem:[%s8960_s6 + $0x60] ss:$16 sps:$4 sm:$0xff]   ;;  %v6498_v36 = vld [vmem:[%s8960_s6 + $0x68] ss:$16 sps:$4 sm:$0xff]  }
 0x1b1   : > { %v2085_v41 = vpop.f32.mrf.mxu1  ;;  %2948 = vmatpush1.bf16.msra.mxu0 %v6483_v27  ;;  %v6503_v37 = vld [vmem:[%s8960_s6 + $0x44] ss:$16 sps:$4 sm:$0xff]   ;;  %v6506_v11 = vld [vmem:[%s8960_s6 + $0x4c] ss:$16 sps:$4 sm:$0xff]   ;;  %v6504_v17 = vld [vmem:[%s8960_s6 + $0x48] ss:$16 sps:$4 sm:$0xff]  }
 0x1b2   : > { %v2152_v33 = vmax.f32 %v2133_v40, 0.0  ;;  %v2086_v50 = vadd.f32 %v2085_v41, %v2033_v3  ;;  %v2140_v54 = vpop.f32.mrf.mxu0  ;;  %v2163_v58 = vpack.c.bf16 %v2151_v45, %v2147_v52  ;;  %v2137_v2 = vadd.f32 %v2136_v39, %v2084_v43  ;;  %2949 = vmatprep.subr.bf16.mxu0 %v6491_v29  ;;  %v6509_v39 = vld [vmem:[%s8960_s6 + $0x24] ss:$16 sps:$4 sm:$0xff]   ;;  %v6510_v3 = vld [vmem:[%s8960_s6 + $0x28] ss:$16 sps:$4 sm:$0xff]  }
 0x1b3   : > { %v2087_v53 = vpop.f32.mrf.mxu1  ;;  %v6512_v40 = vld [vmem:[%s8960_s6 + $0x2c] ss:$16 sps:$4 sm:$0xff]   ;;  %v6513_v45 = vld [vmem:[%s8960_s6] ss:$16 sps:$4 sm:$0xff]   ;;  %v6516_v41 = vld [vmem:[%s8960_s6 + $0x8] ss:$16 sps:$4 sm:$0xff]  }
 0x1b4   : > { %v2164_v56 = vpack.c.bf16 %v2152_v33, %v2148_v49  ;;  %v2088_v57 = vadd.f32 %v2087_v53, %v2035_v48  ;;  %v2142_v60 = vpop.f32.mrf.mxu0  ;;  %v2139_v61 = vadd.f32 %v2138_v46, %v2086_v50  ;;  %v2155_v10 = vmax.f32 %v2137_v2, 0.0  ;;  %v6518_v38 = vld [vmem:[%s8960_s6 + $0xc] ss:$16 sps:$4 sm:$0xff]   ;;  %v2233_v52 = vld [vmem:[%s8959_s5] sm:$0x3] }
 0x1b5   : > { %v2089_v59 = vpop.f32.mrf.mxu1  ;;  %2950 = vmatpush1.bf16.msra.mxu0 %v6489_v47  ;;  %v6521_v46 = vld [vmem:[%s8962_s8 + $0x18c] ss:$28 sps:$4 sm:$0xff]   ;;  %v2238_v53 = vrot.slane %v2233_v52, %v7996_v14 }
 0x1b6   : > { %v2090_v1 = vadd.f32 %v2089_v59, %v2037_v55  ;;  %v2141_v0 = vadd.f32 %v2140_v54, %v2088_v57  ;;  %2650 = vmatprep.mubr.bf16.mxu1 %v2164_v56  ;;  %v2156_v6 = vmax.f32 %v2139_v61, 0.0  ;;  %2951 = vmatprep.subr.bf16.mxu0 %v6497_v32  ;;  %v6524_v48 = vld [vmem:[%s8962_s8 + $0x50c] ss:$28 sps:$4 sm:$0xff]   ;;  %v2242_v54 = vrot.slane %v2233_v52, %v7993_v44 }
 0x1b7   : > { %2651 = vmatmul.mubr.bf16.vlgmr.msra.gmra.mxu1 %v2163_v58  ;;  %v6519_v52 = vld [vmem:[%s8962_s8 + $0x188] ss:$28 sps:$4 sm:$0xff]  }
 0x1b8   : > { %v2143_v4 = vadd.f32 %v2142_v60, %v2090_v1  ;;  %v2159_v5 = vmax.f32 %v2141_v0, 0.0  ;;  %2997 = vmatpush1.bf16.msra.mxu1 %v6474_v18 }
 0x1b9   : > { %2998 = vmatprep.subr.bf16.mxu1 %v6482_v21  ;;  %2952 = vmatpush1.bf16.msra.mxu0 %v6495_v35 }
 0x1ba   : > { %v2160_v7 = vmax.f32 %v2143_v4, 0.0  ;;  %v2167_v13 = vpack.c.bf16 %v2159_v5, %v2155_v10  ;;  %2953 = vmatprep.subr.bf16.mxu0 %v6503_v37 }
 0x1bc   : > { %v2168_v12 = vpack.c.bf16 %v2160_v7, %v2156_v6  ;;  %2999 = vmatpush1.bf16.msra.mxu1 %v6480_v24 }
 0x1bd   : > { %3000 = vmatprep.subr.bf16.mxu1 %v6488_v26  ;;  %2954 = vmatpush1.bf16.msra.mxu0 %v6501_v51  ;;  %v5952_v51 = vld [vmem:[%s419_s30] sm:$0xff]  }
 0x1be   : > { %2660 = vmatprep.mubr.bf16.mxu1 %v2168_v12  ;;  %2955 = vmatprep.subr.bf16.mxu0 %v6509_v39  ;;  %v5953_v39 = vunpack.c.l.bf16 %v5952_v51 }
 0x1bf   : > { %2661 = vmatmul.mubr.bf16.gmra.mxu1 %v2167_v13 }
 0x1c0   : > { %3028 = vmatprep.mubr.bf16.mxu1 %v7026_v19  ;;  %3001 = vmatpush1.bf16.msra.mxu1 %v6486_v28 }
 0x1c1   : > { %3002 = vmatprep.subr.bf16.mxu1 %v6494_v30  ;;  %2956 = vmatpush1.bf16.msra.mxu0 %v6507_v23 }
 0x1c2   : > { %2957 = vmatprep.subr.bf16.mxu0 %v6515_v9 }
 0x1c4   : > { %3003 = vmatpush1.bf16.msra.mxu1 %v6492_v31 }
 0x1c5   : > { %3004 = vmatprep.subr.bf16.mxu1 %v6500_v34  ;;  %2958 = vmatpush1.bf16.msra.mxu0 %v6513_v45 }
 0x1c6   : > { %4518 = vmatprep.subr.bf16.mxu0 %v6521_v46 }
 0x1c8   : > { %3005 = vmatpush1.bf16.msra.mxu1 %v6498_v36 }
 0x1c9   : > { %3006 = vmatprep.subr.bf16.mxu1 %v6506_v11 }
 0x1cc   : > { %3007 = vmatpush1.bf16.msra.mxu1 %v6504_v17 }
 0x1cd   : > { %3008 = vmatprep.subr.bf16.mxu1 %v6512_v40 }
 0x1d0   : > { %3009 = vmatpush1.bf16.msra.mxu1 %v6510_v3  ;;  %v5954_v3 = vunpack.c.h.bf16 %v5952_v51  ;;  %v6581_v51 = vld [vmem:[%s8962_s8 + $0x2dc] ss:$28 sps:$4 sm:$0xff]  }
 0x1d1   : > { %3010 = vmatprep.subr.bf16.mxu1 %v6518_v38  ;;  %v5959_v38 = vld [vmem:[%s419_s30 + $0x8] sm:$0xff]  }
 0x1d4   : > { %3011 = vmatpush1.bf16.msra.mxu1 %v6516_v41 }
 0x1d5   : > { %4571 = vmatprep.subr.bf16.mxu1 %v6524_v48  ;;  %v5957_v48 = vunpack.c.l.bf16 %v5959_v38 }
 0x226   : > { %v2599_v49 = vpop.f32.mrf.mxu0 }
 0x227   : > { %v2600_v57 = vadd.f32 %v2599_v49, %v2238_v53 }
 0x228   : > { %v2601_v33 = vpop.f32.mrf.mxu0 }
 0x229   : > { %v2602_v58 = vadd.f32 %v2601_v33, %v2242_v54 }
 0x22a   : > { %v2603_v50 = vpop.f32.mrf.mxu0 }
 0x22b   : > { %v2604_v2 = vadd.f32 %v2603_v50, %v2238_v53  ;;  %v5958_v50 = vunpack.c.h.bf16 %v5959_v38  ;;  %v6588_v38 = vld [vmem:[%s8962_s8 + $0x620] ss:$28 sps:$4 sm:$0xff]  }
 0x22c   : > { %v2605_v43 = vpop.f32.mrf.mxu0 }
 0x22d   : > { %v2606_v4 = vadd.f32 %v2605_v43, %v2242_v54  ;;  %v6522_v43 = vld [vmem:[%s8962_s8 + $0x508] ss:$28 sps:$4 sm:$0xff]  }
 0x22e   : > { %v2609_v55 = vpop.f32.mrf.mxu0 }
 0x22f   : > { %v2610_v15 = vadd.f32 %v2609_v55, %v2238_v53 }
 0x230   : > { %v2611_v59 = vpop.f32.mrf.mxu0 }
 0x231   : > { %v2612_v18 = vadd.f32 %v2611_v59, %v2242_v54  ;;  %v6528_v59 = vld [vmem:[%s8962_s8 + $0x4d0] ss:$28 sps:$4 sm:$0xff]  }
 0x232   : > { %v2613_v7 = vpop.f32.mrf.mxu0 }
 0x233   : > { %v2614_v28 = vadd.f32 %v2613_v7, %v2238_v53  ;;  %v6527_v53 = vld [vmem:[%s8962_s8 + $0x154] ss:$28 sps:$4 sm:$0xff]   ;;  %v6537_v7 = vld [vmem:[%s8962_s8 + $0xe0] ss:$28 sps:$4 sm:$0xff]  }
 0x234   : > { %v2615_v22 = vpop.f32.mrf.mxu0 }
 0x235   : > { %v2616_v30 = vadd.f32 %v2615_v22, %v2242_v54  ;;  %v6530_v54 = vld [vmem:[%s8962_s8 + $0x4d4] ss:$28 sps:$4 sm:$0xff]   ;;  %v6557_v22 = vld [vmem:[%s8962_s8 + $0x3c] ss:$28 sps:$4 sm:$0xff]  }
 0x277   : > { %v2652_v56 = vpop.f32.mrf.mxu1 }
 0x278   : > { %v2653_v61 = vadd.f32 %v2652_v56, %v2600_v57 }
 0x279   : > { %v2654_v60 = vpop.f32.mrf.mxu1 }
 0x27a   : > { %v2655_v1 = vadd.f32 %v2654_v60, %v2602_v58  ;;  %v6525_v58 = vld [vmem:[%s8962_s8 + $0x150] ss:$28 sps:$4 sm:$0xff]   ;;  %v6533_v60 = vld [vmem:[%s8962_s8 + $0x11c] ss:$28 sps:$4 sm:$0xff]  }
 0x27b   : > { %v2656_v0 = vpop.f32.mrf.mxu1 }
 0x27c   : > { %v5931_v5 = vpack.c.bf16 %v2655_v1, %v2653_v61  ;;  %v2699_v6 = vmul.f32 0.5, %v2655_v1  ;;  %v2657_v13 = vadd.f32 %v2656_v0, %v2604_v2  ;;  %v6531_v2 = vld [vmem:[%s8962_s8 + $0x118] ss:$28 sps:$4 sm:$0xff]  }
 0x27d   : > { %v2658_v10 = vpop.f32.mrf.mxu1 }
 0x27e   : > { %2695 = vst [vmem:[%s8130_s24] sm:$0xff] %v5931_v5  ;;  %v2703_v12 = vmul.f32 1.442695, %v2699_v6  ;;  %v2659_v8 = vadd.f32 %v2658_v10, %v2606_v4  ;;  %v6534_v4 = vld [vmem:[%s8962_s8 + $0x498] ss:$28 sps:$4 sm:$0xff]   ;;  %v6539_v5 = vld [vmem:[%s8962_s8 + $0xe4] ss:$28 sps:$4 sm:$0xff]  }
 0x27f   : > { %v2662_v16 = vpop.f32.mrf.mxu1  ;;  %v6542_v6 = vld [vmem:[%s8962_s8 + $0x464] ss:$28 sps:$4 sm:$0xff]  }
 0x280   : > { %6839 = vpow2.f32 %v2703_v12  ;;  %v5932_v20 = vpack.c.bf16 %v2659_v8, %v2657_v13  ;;  %v2700_v21 = vmul.f32 0.5, %v2659_v8  ;;  %v2663_v26 = vadd.f32 %v2662_v16, %v2610_v15  ;;  %v6540_v10 = vld [vmem:[%s8962_s8 + $0x460] ss:$28 sps:$4 sm:$0xff]   ;;  %v6545_v12 = vld [vmem:[%s8962_s8 + $0xac] ss:$28 sps:$4 sm:$0xff]  }
 0x281   : > { %v2664_v24 = vpop.f32.mrf.mxu1  ;;  %v6543_v8 = vld [vmem:[%s8962_s8 + $0xa8] ss:$28 sps:$4 sm:$0xff]   ;;  %v6551_v16 = vld [vmem:[%s8962_s8 + $0x74] ss:$28 sps:$4 sm:$0xff]  }
 0x282   : > { %2696 = vst [vmem:[%s8130_s24 + $0x8] sm:$0xff] %v5932_v20  ;;  %v2705_v25 = vmul.f32 1.442695, %v2700_v21  ;;  %v2665_v27 = vadd.f32 %v2664_v24, %v2612_v18  ;;  %v6546_v15 = vld [vmem:[%s8962_s8 + $0x428] ss:$28 sps:$4 sm:$0xff]  }
 0x283   : > { %v2666_v29 = vpop.f32.mrf.mxu1  ;;  %v6554_v18 = vld [vmem:[%s8962_s8 + $0x3f4] ss:$28 sps:$4 sm:$0xff]   ;;  %v6560_v24 = vld [vmem:[%s8962_s8 + $0x3bc] ss:$28 sps:$4 sm:$0xff]  }
 0x284   : > { %6841 = vpow2.f32 %v2705_v25  ;;  %v5933_v47 = vpack.c.bf16 %v2665_v27, %v2663_v26  ;;  %v2701_v31 = vmul.f32 0.5, %v2665_v27  ;;  %v2667_v35 = vadd.f32 %v2666_v29, %v2614_v28  ;;  %v6549_v20 = vld [vmem:[%s8962_s8 + $0x70] ss:$28 sps:$4 sm:$0xff]   ;;  %v6555_v25 = vld [vmem:[%s8962_s8 + $0x38] ss:$28 sps:$4 sm:$0xff]  }
 0x285   : > { %v2668_v32 = vpop.f32.mrf.mxu1  ;;  %v6552_v21 = vld [vmem:[%s8962_s8 + $0x3f0] ss:$28 sps:$4 sm:$0xff]   ;;  %v6563_v27 = vld [vmem:[%s8962_s8 + $0x4] ss:$28 sps:$4 sm:$0xff]  }
 0x286   : > { %2697 = vst [vmem:[%s8130_s24 + $0x10] sm:$0xff] %v5933_v47  ;;  %v2707_v34 = vmul.f32 1.442695, %v2701_v31  ;;  %v2669_v36 = vadd.f32 %v2668_v32, %v2616_v30  ;;  %v6566_v28 = vld [vmem:[%s8962_s8 + $0x384] ss:$28 sps:$4 sm:$0xff]  }
 0x287   : > { %v6561_v29 = vld [vmem:[%s8962_s8] ss:$28 sps:$4 sm:$0xff]   ;;  %v6569_v47 = vld [vmem:[%s8962_s8 + $0x34c] ss:$28 sps:$4 sm:$0xff]  }
 0x288   : > { %6843 = vpow2.f32 %v2707_v34  ;;  %v5934_v37 = vpack.c.bf16 %v2669_v36, %v2667_v35  ;;  %v2702_v11 = vmul.f32 0.5, %v2669_v36  ;;  %v6564_v30 = vld [vmem:[%s8962_s8 + $0x380] ss:$28 sps:$4 sm:$0xff]   ;;  %v6572_v31 = vld [vmem:[%s8962_s8 + $0x6cc] ss:$28 sps:$4 sm:$0xff]  }
 0x289   : > { %v6567_v32 = vld [vmem:[%s8962_s8 + $0x348] ss:$28 sps:$4 sm:$0xff]   ;;  %v6578_v36 = vld [vmem:[%s8962_s8 + $0x694] ss:$28 sps:$4 sm:$0xff]  }
 0x28a   : > { %2698 = vst [vmem:[%s8130_s24 + $0x18] sm:$0xff] %v5934_v37  ;;  %v2709_v17 = vmul.f32 1.442695, %v2702_v11  ;;  %v6570_v34 = vld [vmem:[%s8962_s8 + $0x6c8] ss:$28 sps:$4 sm:$0xff]   ;;  %s8875_s24 = scalar_lea.vmem [#allocation2], %s6016_s23 }
 0x28b   : > { %v6573_v37 = vld [vmem:[%s8962_s8 + $0x310] ss:$28 sps:$4 sm:$0xff]   ;;  %s5228_s25 = sshll.u32 %s8875_s24, 4  ;;  %s8909_s25 = int_to_ptr.vmem [resolvable:$true] %s5228_s25 }
 0x28c   : > { %6845 = vpow2.f32 %v2709_v17  ;;  %v6576_v11 = vld [vmem:[%s8962_s8 + $0x690] ss:$28 sps:$4 sm:$0xff]   ;;  %v6584_v17 = vld [vmem:[%s8962_s8 + $0x65c] ss:$28 sps:$4 sm:$0xff]   ;;  %s6964_s21 = scalar_lea.vmem %s8909_s25, 1792  ;;  %p6971_p0 = scmp.lt.s32.totalorder %s8909_s25, %s6969_s15 }
 0x28d   : > { %v6840_v23 = vpop.eup %6839  ;;  %p6965_p11 = scmp.ne.s32.totalorder %s8909_s25, %s6964_s21  ;;  %p6972_p1 = scmp.lt.s32.totalorder %s6970_s19, %s6964_s21 }
 0x28e   : > { %v2719_v40 = vmul.f32 %v6840_v23, %v5953_v39  ;;  %v6579_v39 = vld [vmem:[%s8962_s8 + $0x2d8] ss:$28 sps:$4 sm:$0xff]  }
 0x28f   : > { %v6582_v23 = vld [vmem:[%s8962_s8 + $0x658] ss:$28 sps:$4 sm:$0xff]   ;;  %p6966_p12 = pnand %p6965_p11, %p7128_p5  ;;  %p6973_p2 = por %p6972_p1, %p6971_p0 }
 0x290   : > { %v2723_v41 = vadd.f32 %v2719_v40, %v2653_v61  ;;  %v6590_v40 = vld [vmem:[%s8962_s8 + $0x624] ss:$28 sps:$4 sm:$0xff]  }
 0x291   : > { %v6842_v9 = vpop.eup %6841  ;;  %p6967_p13 = pneg %p6966_p12 }
 0x292   : > { %v2720_v45 = vmul.f32 %v6842_v9, %v5954_v3  ;;  %v6587_v3 = vld [vmem:[%s8962_s8 + $0x2a4] ss:$28 sps:$4 sm:$0xff]  }
 0x293   : > { %v6585_v9 = vld [vmem:[%s8962_s8 + $0x2a0] ss:$28 sps:$4 sm:$0xff]   ;;  %p6974_p3 = pnand %p6973_p2, %p6967_p13 }
 0x294   : > { %v2724_v46 = vadd.f32 %v2720_v45, %v2657_v13  ;;  %v6548_v13 = vld [vmem:[%s8962_s8 + $0x42c] ss:$28 sps:$4 sm:$0xff]  }
 0x295   : > { %v6844_v49 = vpop.eup %6843  ;;  %v6593_v45 = vld [vmem:[%s8962_s8 + $0x26c] ss:$28 sps:$4 sm:$0xff]  }
 0x296   : > { %v2727_v33 = vpack.c.bf16 %v2724_v46, %v2723_v41  ;;  %v2721_v55 = vmul.f32 %v6844_v49, %v5957_v48  ;;  %v6596_v41 = vld [vmem:[%s8962_s8 + $0x5ec] ss:$28 sps:$4 sm:$0xff]   ;;  %v6599_v49 = vld [vmem:[%s8962_s8 + $0x234] ss:$28 sps:$4 sm:$0xff]  }
 0x297   : > { %v6591_v46 = vld [vmem:[%s8962_s8 + $0x268] ss:$28 sps:$4 sm:$0xff]  }
 0x298   : > { %2976 = vmatmul.mubr.bf16.vlgmr.msra.gmra.mxu0 %v2727_v33  ;;  %3029 = vmatmul.mubr.bf16.vlgmr.msra.gmra.mxu1 %v2727_v33  ;;  %v2725_v61 = vadd.f32 %v2721_v55, %v2663_v26  ;;  %v6558_v26 = vld [vmem:[%s8962_s8 + $0x3b8] ss:$28 sps:$4 sm:$0xff]   ;;  %v6594_v48 = vld [vmem:[%s8962_s8 + $0x5e8] ss:$28 sps:$4 sm:$0xff]  }
 0x299   : > { %v6846_v56 = vpop.eup %6845  ;;  %2985 = vmatprep.mubr.bf16.mxu0 %v7026_v19  ;;  %3038 = vmatprep.mubr.bf16.mxu1 %v7026_v19  ;;  %v6536_v19 = vld [vmem:[%s8962_s8 + $0x49c] ss:$28 sps:$4 sm:$0xff]   ;;  %v6602_v33 = vld [vmem:[%s8962_s8 + $0x5b4] ss:$28 sps:$4 sm:$0xff]  }
 0x29a   : > { %v2722_v57 = vmul.f32 %v6846_v56, %v5958_v50  ;;  %4519 = vmatpush1.bf16.msra.mxu0 %v6519_v52  ;;  %4572 = vmatpush1.bf16.msra.mxu1 %v6522_v43  ;;  %v6597_v50 = vld [vmem:[%s8962_s8 + $0x230] ss:$28 sps:$4 sm:$0xff]   ;;  %v6605_v43 = vld [vmem:[%s8962_s8 + $0x1fc] ss:$28 sps:$4 sm:$0xff]   ;;  %v6611_v56 = vld [vmem:[%s8962_s8 + $0x1c4] ss:$28 sps:$4 sm:$0xff]  }
 0x29b   : > { %4520 = vmatprep.subr.bf16.mxu0 %v6527_v53  ;;  %4573 = vmatprep.subr.bf16.mxu1 %v6530_v54  ;;  %v6600_v52 = vld [vmem:[%s8962_s8 + $0x5b0] ss:$28 sps:$4 sm:$0xff]   ;;  %v6608_v53 = vld [vmem:[%s8962_s8 + $0x57c] ss:$28 sps:$4 sm:$0xff]  }
 0x29c   : > { %v2726_v1 = vadd.f32 %v2722_v57, %v2667_v35  ;;  %v6575_v35 = vld [vmem:[%s8962_s8 + $0x314] ss:$28 sps:$4 sm:$0xff]   ;;  %v6614_v57 = vld [vmem:[%s8962_s8 + $0x544] ss:$28 sps:$4 sm:$0xff]  }
 0x29d   : > { %v6603_v54 = vld [vmem:[%s8962_s8 + $0x1f8] ss:$28 sps:$4 sm:$0xff]  }
 0x29e   : > { %v2728_v0 = vpack.c.bf16 %v2726_v1, %v2725_v61  ;;  %4521 = vmatpush1.bf16.msra.mxu0 %v6525_v58  ;;  %4574 = vmatpush1.bf16.msra.mxu1 %v6528_v59  ;;  %v6606_v55 = vld [vmem:[%s8962_s8 + $0x578] ss:$28 sps:$4 sm:$0xff]   ;;  %v6609_v58 = vld [vmem:[%s8962_s8 + $0x1c0] ss:$28 sps:$4 sm:$0xff]  }
 0x29f   : > { %4522 = vmatprep.subr.bf16.mxu0 %v6533_v60  ;;  %4575 = vmatprep.subr.bf16.mxu1 %v6536_v19  ;;  %v6612_v59 = vld [vmem:[%s8962_s8 + $0x540] ss:$28 sps:$4 sm:$0xff]   ;;  %v6617_v60 = vld [vmem:[%s8962_s8 + $0x194] ss:$28 sps:$4 sm:$0xff]  }
 0x2a0   : > { %2986 = vmatmul.mubr.bf16.gmra.mxu0 %v2728_v0  ;;  %3039 = vmatmul.mubr.bf16.gmra.mxu1 %v2728_v0  ;;  %v6620_v19 = vld [vmem:[%s8962_s8 + $0x514] ss:$28 sps:$4 sm:$0xff]   ;;  %v2761_v61 = vld [vmem:[%s8961_s7] sm:$0xf] }
 0x2a2   : > { %4523 = vmatpush1.bf16.msra.mxu0 %v6531_v2  ;;  %4576 = vmatpush1.bf16.msra.mxu1 %v6534_v4  ;;  %v2770_v2 = vrot.slane %v2761_v61, %v7993_v44  ;;  %v2778_v4 = vrot.slane %v2761_v61, %v8009_v62 }
 0x2a3   : > { %4524 = vmatprep.subr.bf16.mxu0 %v6539_v5  ;;  %4577 = vmatprep.subr.bf16.mxu1 %v6542_v6  ;;  %v2766_v5 = vrot.slane %v2761_v61, %v7996_v14  ;;  %v2774_v6 = vrot.slane %v2761_v61, %v8012_v63 }
 0x2a6   : > { %4525 = vmatpush1.bf16.msra.mxu0 %v6537_v7  ;;  %4578 = vmatpush1.bf16.msra.mxu1 %v6540_v10 }
 0x2a7   : > { %4526 = vmatprep.subr.bf16.mxu0 %v6545_v12  ;;  %4579 = vmatprep.subr.bf16.mxu1 %v6548_v13 }
 0x2aa   : > { %4527 = vmatpush1.bf16.msra.mxu0 %v6543_v8  ;;  %4580 = vmatpush1.bf16.msra.mxu1 %v6546_v15 }
 0x2ab   : > { %4528 = vmatprep.subr.bf16.mxu0 %v6551_v16  ;;  %4581 = vmatprep.subr.bf16.mxu1 %v6554_v18 }
 0x2ae   : > { %4529 = vmatpush1.bf16.msra.mxu0 %v6549_v20  ;;  %4582 = vmatpush1.bf16.msra.mxu1 %v6552_v21 }
 0x2af   : > { %4530 = vmatprep.subr.bf16.mxu0 %v6557_v22  ;;  %4583 = vmatprep.subr.bf16.mxu1 %v6560_v24 }
 0x2b2   : > { %4531 = vmatpush1.bf16.msra.mxu0 %v6555_v25  ;;  %4584 = vmatpush1.bf16.msra.mxu1 %v6558_v26 }
 0x2b3   : > { %4532 = vmatprep.subr.bf16.mxu0 %v6563_v27  ;;  %4585 = vmatprep.subr.bf16.mxu1 %v6566_v28 }
 0x2b6   : > { %4533 = vmatpush1.bf16.msra.mxu0 %v6561_v29  ;;  %4586 = vmatpush1.bf16.msra.mxu1 %v6564_v30 }
 0x2b7   : > { %4534 = vmatprep.subr.bf16.mxu0 %v6569_v47  ;;  %4587 = vmatprep.subr.bf16.mxu1 %v6572_v31 }
 0x2ba   : > { %4535 = vmatpush2.bf16.msra.mxu0 %v6567_v32  ;;  %4588 = vmatpush2.bf16.msra.mxu1 %v6570_v34 }
 0x2bb   : > { %4536 = vmatprep.subr.bf16.mxu0 %v6575_v35  ;;  %4589 = vmatprep.subr.bf16.mxu1 %v6578_v36 }
 0x2be   : > { %4537 = vmatpush2.bf16.msra.mxu0 %v6573_v37  ;;  %4590 = vmatpush2.bf16.msra.mxu1 %v6576_v11 }
 0x2bf   : > { %4538 = vmatprep.subr.bf16.mxu0 %v6581_v51  ;;  %4591 = vmatprep.subr.bf16.mxu1 %v6584_v17 }
 0x2c2   : > { %4539 = vmatpush2.bf16.msra.mxu0 %v6579_v39  ;;  %4592 = vmatpush2.bf16.msra.mxu1 %v6582_v23  ;;  %v6615_v39 = vld [vmem:[%s8962_s8 + $0x190] ss:$28 sps:$4 sm:$0xff]  }
 0x2c3   : > { %4540 = vmatprep.subr.bf16.mxu0 %v6587_v3  ;;  %4593 = vmatprep.subr.bf16.mxu1 %v6590_v40  ;;  %v6618_v23 = vld [vmem:[%s8962_s8 + $0x510] ss:$28 sps:$4 sm:$0xff]  }
 0x2c6   : > { %4541 = vmatpush2.bf16.msra.mxu0 %v6585_v9  ;;  %4594 = vmatpush2.bf16.msra.mxu1 %v6588_v38 }
 0x2c7   : > { %4542 = vmatprep.subr.bf16.mxu0 %v6593_v45  ;;  %4595 = vmatprep.subr.bf16.mxu1 %v6596_v41  ;;  %v6623_v41 = vld [vmem:[%s8962_s8 + $0x15c] ss:$28 sps:$4 sm:$0xff]  }
 0x2ca   : > { %4543 = vmatpush2.bf16.msra.mxu0 %v6591_v46  ;;  %4596 = vmatpush2.bf16.msra.mxu1 %v6594_v48  ;;  %v6626_v46 = vld [vmem:[%s8962_s8 + $0x4dc] ss:$28 sps:$4 sm:$0xff]  }
 0x2cb   : > { %4544 = vmatprep.subr.bf16.mxu0 %v6599_v49  ;;  %4597 = vmatprep.subr.bf16.mxu1 %v6602_v33 }
 0x2ce   : > { %4545 = vmatpush2.bf16.msra.mxu0 %v6597_v50  ;;  %4598 = vmatpush2.bf16.msra.mxu1 %v6600_v52 }
 0x2cf   : > { %4546 = vmatprep.subr.bf16.mxu0 %v6605_v43  ;;  %4599 = vmatprep.subr.bf16.mxu1 %v6608_v53 }
 0x2d2   : > { %4547 = vmatpush2.bf16.msra.mxu0 %v6603_v54  ;;  %4600 = vmatpush2.bf16.msra.mxu1 %v6606_v55 }
 0x2d3   : > { %4548 = vmatprep.subr.bf16.mxu0 %v6611_v56  ;;  %4601 = vmatprep.subr.bf16.mxu1 %v6614_v57  ;;  %v6621_v56 = vld [vmem:[%s8962_s8 + $0x158] ss:$28 sps:$4 sm:$0xff]  }
 0x2d4   : > { %v6624_v57 = vld [vmem:[%s8962_s8 + $0x4d8] ss:$28 sps:$4 sm:$0xff]  }
 0x2d6   : > { %4549 = vmatpush2.bf16.msra.mxu0 %v6609_v58  ;;  %4602 = vmatpush2.bf16.msra.mxu1 %v6612_v59 }
 0x2d7   : > { %4624 = vmatprep.subr.bf16.mxu0 %v6617_v60  ;;  %4677 = vmatprep.subr.bf16.mxu1 %v6620_v19  ;;  %v6629_v60 = vld [vmem:[%s8962_s8 + $0x124] ss:$28 sps:$4 sm:$0xff]  }
 0x2d8   : > { %v6632_v19 = vld [vmem:[%s8962_s8 + $0x4a4] ss:$28 sps:$4 sm:$0xff]  }
 0x358   : > { %v2977_v1 = vpop.f32.mrf.mxu0  ;;  %v3030_v0 = vpop.f32.mrf.mxu1 }
 0x359   : > { %v2978_v20 = vadd.f32 %v2977_v1, %v2766_v5  ;;  %v3031_v21 = vadd.f32 %v3030_v0, %v2774_v6 }
 0x35a   : > { %v2979_v7 = vpop.f32.mrf.mxu0  ;;  %v3032_v10 = vpop.f32.mrf.mxu1 }
 0x35b   : > { %v2980_v8 = vadd.f32 %v2979_v7, %v2770_v2  ;;  %v3033_v15 = vadd.f32 %v3032_v10, %v2778_v4  ;;  %v3049_v35 = vmax.f32 %v2978_v20, 0.0  ;;  %v3051_v36 = vmax.f32 %v3031_v21, 0.0  ;;  %v6627_v10 = vld [vmem:[%s8962_s8 + $0x120] ss:$28 sps:$4 sm:$0xff]   ;;  %v6636_v20 = vld [vmem:[%s8962_s8 + $0x468] ss:$28 sps:$4 sm:$0xff]  }
 0x35c   : > { %v2981_v12 = vpop.f32.mrf.mxu0  ;;  %v3034_v13 = vpop.f32.mrf.mxu1  ;;  %v6641_v21 = vld [vmem:[%s8962_s8 + $0xb4] ss:$28 sps:$4 sm:$0xff]  }
 0x35d   : > { %v2982_v16 = vadd.f32 %v2981_v12, %v2766_v5  ;;  %v3035_v18 = vadd.f32 %v3034_v13, %v2774_v6  ;;  %v3050_v47 = vmax.f32 %v2980_v8, 0.0  ;;  %v3052_v31 = vmax.f32 %v3033_v15, 0.0  ;;  %v6630_v12 = vld [vmem:[%s8962_s8 + $0x4a0] ss:$28 sps:$4 sm:$0xff]   ;;  %v6635_v15 = vld [vmem:[%s8962_s8 + $0xec] ss:$28 sps:$4 sm:$0xff]  }
 0x35e   : > { %v2983_v22 = vpop.f32.mrf.mxu0  ;;  %v3036_v24 = vpop.f32.mrf.mxu1 }
 0x35f   : > { %v2984_v25 = vadd.f32 %v2983_v22, %v2770_v2  ;;  %v3037_v26 = vadd.f32 %v3036_v24, %v2778_v4  ;;  %v3053_v27 = vmax.f32 %v2982_v16, 0.0  ;;  %v3055_v28 = vmax.f32 %v3035_v18, 0.0  ;;  %v6638_v16 = vld [vmem:[%s8962_s8 + $0x46c] ss:$28 sps:$4 sm:$0xff]   ;;  %v6644_v22 = vld [vmem:[%s8962_s8 + $0x434] ss:$28 sps:$4 sm:$0xff]  }
 0x360   : > { %v2987_v29 = vpop.f32.mrf.mxu0  ;;  %v3040_v30 = vpop.f32.mrf.mxu1  ;;  %v6633_v18 = vld [vmem:[%s8962_s8 + $0xe8] ss:$28 sps:$4 sm:$0xff]   ;;  %v6639_v24 = vld [vmem:[%s8962_s8 + $0xb0] ss:$28 sps:$4 sm:$0xff]  }
 0x361   : > { %v3054_v32 = vmax.f32 %v2984_v25, 0.0  ;;  %v3056_v34 = vmax.f32 %v3037_v26, 0.0  ;;  %v8351_v3 = vpack.c.bf16 %v3053_v27, %v3049_v35  ;;  %v8353_v40 = vpack.c.bf16 %v3055_v28, %v3051_v36  ;;  %v6642_v25 = vld [vmem:[%s8962_s8 + $0x430] ss:$28 sps:$4 sm:$0xff]   ;;  %v6647_v26 = vld [vmem:[%s8962_s8 + $0x7c] ss:$28 sps:$4 sm:$0xff]  }
 0x362   : > { %v2989_v37 = vpop.f32.mrf.mxu0  ;;  %v3042_v11 = vpop.f32.mrf.mxu1  ;;  %v2988_v50 = vadd.f32 %v2987_v29, %v2766_v5  ;;  %v3041_v52 = vadd.f32 %v3040_v30, %v2774_v6  ;;  %v6650_v27 = vld [vmem:[%s8962_s8 + $0x3fc] ss:$28 sps:$4 sm:$0xff]   ;;  %v6653_v30 = vld [vmem:[%s8962_s8 + $0x44] ss:$28 sps:$4 sm:$0xff]   ;;  %v6662_v35 = vld [vmem:[%s8962_s8 + $0x38c] ss:$28 sps:$4 sm:$0xff]  }
 0x363   : > { %v8341_v51 = vpack.c.bf16 %v3054_v32, %v3050_v47  ;;  %v8343_v17 = vpack.c.bf16 %v3056_v34, %v3052_v31  ;;  %v2990_v9 = vadd.f32 %v2989_v37, %v2770_v2  ;;  %v3043_v48 = vadd.f32 %v3042_v11, %v2778_v4  ;;  %v6645_v28 = vld [vmem:[%s8962_s8 + $0x78] ss:$28 sps:$4 sm:$0xff]   ;;  %v6656_v47 = vld [vmem:[%s8962_s8 + $0x3c4] ss:$28 sps:$4 sm:$0xff]   ;;  %v6659_v34 = vld [vmem:[%s8962_s8 + $0xc] ss:$28 sps:$4 sm:$0xff]  }
 0x364   : > { %v2991_v38 = vpop.f32.mrf.mxu0  ;;  %v3044_v45 = vpop.f32.mrf.mxu1  ;;  %v6648_v29 = vld [vmem:[%s8962_s8 + $0x3f8] ss:$28 sps:$4 sm:$0xff]   ;;  %v6651_v31 = vld [vmem:[%s8962_s8 + $0x40] ss:$28 sps:$4 sm:$0xff]   ;;  %v6657_v36 = vld [vmem:[%s8962_s8 + $0x8] ss:$28 sps:$4 sm:$0xff]  }
 0x365   : > { %v2992_v49 = vadd.f32 %v2991_v38, %v2766_v5  ;;  %v3045_v33 = vadd.f32 %v3044_v45, %v2774_v6  ;;  %4550 = vmatprep.mubr.bf16.mxu0 %v8341_v51  ;;  %4603 = vmatprep.mubr.bf16.mxu1 %v8343_v17  ;;  %v3058_v61 = vmax.f32 %v2990_v9, 0.0  ;;  %v3060_v1 = vmax.f32 %v3043_v48, 0.0  ;;  %v6654_v32 = vld [vmem:[%s8962_s8 + $0x3c0] ss:$28 sps:$4 sm:$0xff]   ;;  %v6660_v37 = vld [vmem:[%s8962_s8 + $0x388] ss:$28 sps:$4 sm:$0xff]  }
 0x366   : > { %v2993_v43 = vpop.f32.mrf.mxu0  ;;  %v3046_v53 = vpop.f32.mrf.mxu1  ;;  %4551 = vmatmul.mubr.bf16.vlgmr.msra.gmra.mxu0 %v8351_v3  ;;  %4604 = vmatmul.mubr.bf16.vlgmr.msra.gmra.mxu1 %v8353_v40  ;;  %v3059_v5 = vmax.f32 %v3041_v52, 0.0  ;;  %v6665_v11 = vld [vmem:[%s8962_s8 + $0x354] ss:$28 sps:$4 sm:$0xff]   ;;  %v6671_v38 = vld [vmem:[%s8962_s8 + $0x31c] ss:$28 sps:$4 sm:$0xff]  }
 0x367   : > { %v2994_v54 = vadd.f32 %v2993_v43, %v2770_v2  ;;  %v3047_v55 = vadd.f32 %v3046_v53, %v2778_v4  ;;  %4625 = vmatpush1.bf16.msra.mxu0 %v6615_v39  ;;  %4678 = vmatpush1.bf16.msra.mxu1 %v6618_v23  ;;  %v3061_v58 = vmax.f32 %v2992_v49, 0.0  ;;  %v3063_v59 = vmax.f32 %v3045_v33, 0.0  ;;  %v6668_v39 = vld [vmem:[%s8962_s8 + $0x6d4] ss:$28 sps:$4 sm:$0xff]   ;;  %v6674_v45 = vld [vmem:[%s8962_s8 + $0x69c] ss:$28 sps:$4 sm:$0xff]  }
 0x368   : > { %4626 = vmatprep.subr.bf16.mxu0 %v6623_v41  ;;  %4679 = vmatprep.subr.bf16.mxu1 %v6626_v46  ;;  %v3057_v4 = vmax.f32 %v2988_v50, 0.0  ;;  %v6663_v23 = vld [vmem:[%s8962_s8 + $0x350] ss:$28 sps:$4 sm:$0xff]   ;;  %v6669_v41 = vld [vmem:[%s8962_s8 + $0x318] ss:$28 sps:$4 sm:$0xff]  }
 0x369   : > { %v3062_v0 = vmax.f32 %v2994_v54, 0.0  ;;  %v3064_v2 = vmax.f32 %v3047_v55, 0.0  ;;  %v8389_v8 = vpack.c.bf16 %v3063_v59, %v3059_v5  ;;  %v6666_v9 = vld [vmem:[%s8962_s8 + $0x6d0] ss:$28 sps:$4 sm:$0xff]   ;;  %v6672_v46 = vld [vmem:[%s8962_s8 + $0x698] ss:$28 sps:$4 sm:$0xff]  }
 0x36a   : > { %v8387_v13 = vpack.c.bf16 %v3061_v58, %v3057_v4  ;;  %v6677_v48 = vld [vmem:[%s8962_s8 + $0x2e4] ss:$28 sps:$4 sm:$0xff]   ;;  %v6683_v52 = vld [vmem:[%s8962_s8 + $0x2ac] ss:$28 sps:$4 sm:$0xff]   ;;  %v6689_v55 = vld [vmem:[%s8962_s8 + $0x274] ss:$28 sps:$4 sm:$0xff]  }
 0x36b   : > { %v8377_v6 = vpack.c.bf16 %v3062_v0, %v3058_v61  ;;  %v8379_v7 = vpack.c.bf16 %v3064_v2, %v3060_v1  ;;  %4627 = vmatpush1.bf16.msra.mxu0 %v6621_v56  ;;  %4680 = vmatpush1.bf16.msra.mxu1 %v6624_v57  ;;  %v6680_v49 = vld [vmem:[%s8962_s8 + $0x664] ss:$28 sps:$4 sm:$0xff]   ;;  %v6686_v43 = vld [vmem:[%s8962_s8 + $0x62c] ss:$28 sps:$4 sm:$0xff]   ;;  %v6692_v56 = vld [vmem:[%s8962_s8 + $0x5f4] ss:$28 sps:$4 sm:$0xff]  }
 0x36c   : > { %4628 = vmatprep.subr.bf16.mxu0 %v6629_v60  ;;  %4681 = vmatprep.subr.bf16.mxu1 %v6632_v19  ;;  %v6675_v33 = vld [vmem:[%s8962_s8 + $0x2e0] ss:$28 sps:$4 sm:$0xff]   ;;  %v6681_v53 = vld [vmem:[%s8962_s8 + $0x2a8] ss:$28 sps:$4 sm:$0xff]   ;;  %v6687_v57 = vld [vmem:[%s8962_s8 + $0x270] ss:$28 sps:$4 sm:$0xff]  }
 0x36d   : > { %4560 = vmatprep.mubr.bf16.mxu0 %v8377_v6  ;;  %4613 = vmatprep.mubr.bf16.mxu1 %v8379_v7  ;;  %v6678_v50 = vld [vmem:[%s8962_s8 + $0x660] ss:$28 sps:$4 sm:$0xff]   ;;  %v6684_v54 = vld [vmem:[%s8962_s8 + $0x628] ss:$28 sps:$4 sm:$0xff]   ;;  %v6690_v58 = vld [vmem:[%s8962_s8 + $0x5f0] ss:$28 sps:$4 sm:$0xff]  }
 0x36e   : > { %4561 = vmatmul.mubr.bf16.gmra.mxu0 %v8387_v13  ;;  %4614 = vmatmul.mubr.bf16.gmra.mxu1 %v8389_v8  ;;  %v6695_v59 = vld [vmem:[%s8962_s8 + $0x23c] ss:$28 sps:$4 sm:$0xff]   ;;  %v6701_v1 = vld [vmem:[%s8962_s8 + $0x204] ss:$28 sps:$4 sm:$0xff]   ;;  %v6707_v5 = vld [vmem:[%s8962_s8 + $0x1cc] ss:$28 sps:$4 sm:$0xff]  }
 0x36f   : > { %4629 = vmatpush1.bf16.msra.mxu0 %v6627_v10  ;;  %4682 = vmatpush1.bf16.msra.mxu1 %v6630_v12  ;;  %v6698_v60 = vld [vmem:[%s8962_s8 + $0x5bc] ss:$28 sps:$4 sm:$0xff]   ;;  %v6704_v0 = vld [vmem:[%s8962_s8 + $0x584] ss:$28 sps:$4 sm:$0xff]   ;;  %v6710_v10 = vld [vmem:[%s8962_s8 + $0x54c] ss:$28 sps:$4 sm:$0xff]  }
 0x370   : > { %4656 = vmatprep.mubr.bf16.mxu0 %v8341_v51  ;;  %4709 = vmatprep.mubr.bf16.mxu1 %v8343_v17  ;;  %v6693_v19 = vld [vmem:[%s8962_s8 + $0x238] ss:$28 sps:$4 sm:$0xff]   ;;  %v6699_v2 = vld [vmem:[%s8962_s8 + $0x200] ss:$28 sps:$4 sm:$0xff]   ;;  %v6705_v12 = vld [vmem:[%s8962_s8 + $0x1c8] ss:$28 sps:$4 sm:$0xff]  }
 0x371   : > { %4630 = vmatprep.subr.bf16.mxu0 %v6635_v15  ;;  %4683 = vmatprep.subr.bf16.mxu1 %v6638_v16  ;;  %v6696_v61 = vld [vmem:[%s8962_s8 + $0x5b8] ss:$28 sps:$4 sm:$0xff]   ;;  %v6702_v4 = vld [vmem:[%s8962_s8 + $0x580] ss:$28 sps:$4 sm:$0xff]   ;;  %v6708_v15 = vld [vmem:[%s8962_s8 + $0x548] ss:$28 sps:$4 sm:$0xff]  }
 0x372   : > { %v6713_v16 = vld [vmem:[%s8962_s8 + $0x19c] ss:$28 sps:$4 sm:$0xff]  }
 0x373   : > { %4631 = vmatpush1.bf16.msra.mxu0 %v6633_v18  ;;  %4684 = vmatpush1.bf16.msra.mxu1 %v6636_v20  ;;  %v6716_v18 = vld [vmem:[%s8962_s8 + $0x51c] ss:$28 sps:$4 sm:$0xff]  }
 0x374   : > { %4632 = vmatprep.subr.bf16.mxu0 %v6641_v21  ;;  %4685 = vmatprep.subr.bf16.mxu1 %v6644_v22  ;;  %v6711_v20 = vld [vmem:[%s8962_s8 + $0x198] ss:$28 sps:$4 sm:$0xff]   ;;  %v6719_v22 = vld [vmem:[%s8962_s8 + $0x164] ss:$28 sps:$4 sm:$0xff]  }
 0x375   : > { %v6714_v21 = vld [vmem:[%s8962_s8 + $0x518] ss:$28 sps:$4 sm:$0xff]  }
 0x377   : > { %4633 = vmatpush1.bf16.msra.mxu0 %v6639_v24  ;;  %4686 = vmatpush1.bf16.msra.mxu1 %v6642_v25  ;;  %v6722_v24 = vld [vmem:[%s8962_s8 + $0x4e4] ss:$28 sps:$4 sm:$0xff]  }
 0x378   : > { %4634 = vmatprep.subr.bf16.mxu0 %v6647_v26  ;;  %4687 = vmatprep.subr.bf16.mxu1 %v6650_v27  ;;  %v6717_v25 = vld [vmem:[%s8962_s8 + $0x160] ss:$28 sps:$4 sm:$0xff]   ;;  %v6725_v27 = vld [vmem:[%s8962_s8 + $0x12c] ss:$28 sps:$4 sm:$0xff]  }
 0x379   : > { %v6720_v26 = vld [vmem:[%s8962_s8 + $0x4e0] ss:$28 sps:$4 sm:$0xff]  }
 0x37b   : > { %4635 = vmatpush1.bf16.msra.mxu0 %v6645_v28  ;;  %4688 = vmatpush1.bf16.msra.mxu1 %v6648_v29  ;;  %v6728_v28 = vld [vmem:[%s8962_s8 + $0x4ac] ss:$28 sps:$4 sm:$0xff]  }
 0x37c   : > { %4636 = vmatprep.subr.bf16.mxu0 %v6653_v30  ;;  %4689 = vmatprep.subr.bf16.mxu1 %v6656_v47  ;;  %v6723_v29 = vld [vmem:[%s8962_s8 + $0x128] ss:$28 sps:$4 sm:$0xff]   ;;  %v6731_v47 = vld [vmem:[%s8962_s8 + $0xf4] ss:$28 sps:$4 sm:$0xff]  }
 0x37d   : > { %v6726_v30 = vld [vmem:[%s8962_s8 + $0x4a8] ss:$28 sps:$4 sm:$0xff]  }
 0x37f   : > { %4637 = vmatpush1.bf16.msra.mxu0 %v6651_v31  ;;  %4690 = vmatpush1.bf16.msra.mxu1 %v6654_v32  ;;  %v6734_v31 = vld [vmem:[%s8962_s8 + $0x474] ss:$28 sps:$4 sm:$0xff]  }
 0x380   : > { %4638 = vmatprep.subr.bf16.mxu0 %v6659_v34  ;;  %4691 = vmatprep.subr.bf16.mxu1 %v6662_v35  ;;  %v6729_v32 = vld [vmem:[%s8962_s8 + $0xf0] ss:$28 sps:$4 sm:$0xff]   ;;  %v6737_v35 = vld [vmem:[%s8962_s8 + $0xbc] ss:$28 sps:$4 sm:$0xff]  }
 0x381   : > { %v6732_v34 = vld [vmem:[%s8962_s8 + $0x470] ss:$28 sps:$4 sm:$0xff]  }
 0x383   : > { %4639 = vmatpush1.bf16.msra.mxu0 %v6657_v36  ;;  %4692 = vmatpush1.bf16.msra.mxu1 %v6660_v37  ;;  %v6740_v36 = vld [vmem:[%s8962_s8 + $0x43c] ss:$28 sps:$4 sm:$0xff]  }
 0x384   : > { %4640 = vmatprep.subr.bf16.mxu0 %v6665_v11  ;;  %4693 = vmatprep.subr.bf16.mxu1 %v6668_v39  ;;  %v6735_v37 = vld [vmem:[%s8962_s8 + $0xb8] ss:$28 sps:$4 sm:$0xff]   ;;  %v6743_v39 = vld [vmem:[%s8962_s8 + $0x84] ss:$28 sps:$4 sm:$0xff]  }
 0x385   : > { %v6738_v11 = vld [vmem:[%s8962_s8 + $0x438] ss:$28 sps:$4 sm:$0xff]  }
 0x387   : > { %4641 = vmatpush2.bf16.msra.mxu0 %v6663_v23  ;;  %4694 = vmatpush2.bf16.msra.mxu1 %v6666_v9  ;;  %v6746_v23 = vld [vmem:[%s8962_s8 + $0x404] ss:$28 sps:$4 sm:$0xff]  }
 0x388   : > { %4642 = vmatprep.subr.bf16.mxu0 %v6671_v38  ;;  %4695 = vmatprep.subr.bf16.mxu1 %v6674_v45  ;;  %v6741_v9 = vld [vmem:[%s8962_s8 + $0x80] ss:$28 sps:$4 sm:$0xff]   ;;  %v6749_v45 = vld [vmem:[%s8962_s8 + $0x4c] ss:$28 sps:$4 sm:$0xff]  }
 0x389   : > { %v6744_v38 = vld [vmem:[%s8962_s8 + $0x400] ss:$28 sps:$4 sm:$0xff]  }
 0x38b   : > { %4643 = vmatpush2.bf16.msra.mxu0 %v6669_v41  ;;  %4696 = vmatpush2.bf16.msra.mxu1 %v6672_v46  ;;  %v6752_v41 = vld [vmem:[%s8962_s8 + $0x3cc] ss:$28 sps:$4 sm:$0xff]  }
 0x38c   : > { %4644 = vmatprep.subr.bf16.mxu0 %v6677_v48  ;;  %4697 = vmatprep.subr.bf16.mxu1 %v6680_v49  ;;  %v6747_v46 = vld [vmem:[%s8962_s8 + $0x48] ss:$28 sps:$4 sm:$0xff]   ;;  %v6755_v49 = vld [vmem:[%s8962_s8 + $0x14] ss:$28 sps:$4 sm:$0xff]  }
 0x38d   : > { %v6750_v48 = vld [vmem:[%s8962_s8 + $0x3c8] ss:$28 sps:$4 sm:$0xff]  }
 0x38f   : > { %4645 = vmatpush2.bf16.msra.mxu0 %v6675_v33  ;;  %4698 = vmatpush2.bf16.msra.mxu1 %v6678_v50  ;;  %v6758_v33 = vld [vmem:[%s8962_s8 + $0x394] ss:$28 sps:$4 sm:$0xff]  }
 0x390   : > { %4646 = vmatprep.subr.bf16.mxu0 %v6683_v52  ;;  %4699 = vmatprep.subr.bf16.mxu1 %v6686_v43  ;;  %v6753_v50 = vld [vmem:[%s8962_s8 + $0x10] ss:$28 sps:$4 sm:$0xff]   ;;  %v6761_v43 = vld [vmem:[%s8962_s8 + $0x35c] ss:$28 sps:$4 sm:$0xff]  }
 0x391   : > { %v6756_v52 = vld [vmem:[%s8962_s8 + $0x390] ss:$28 sps:$4 sm:$0xff]  }
 0x393   : > { %4647 = vmatpush2.bf16.msra.mxu0 %v6681_v53  ;;  %4700 = vmatpush2.bf16.msra.mxu1 %v6684_v54  ;;  %v6764_v53 = vld [vmem:[%s8962_s8 + $0x6dc] ss:$28 sps:$4 sm:$0xff]  }
 0x394   : > { %4648 = vmatprep.subr.bf16.mxu0 %v6689_v55  ;;  %4701 = vmatprep.subr.bf16.mxu1 %v6692_v56  ;;  %v6759_v54 = vld [vmem:[%s8962_s8 + $0x358] ss:$28 sps:$4 sm:$0xff]   ;;  %v6767_v56 = vld [vmem:[%s8962_s8 + $0x324] ss:$28 sps:$4 sm:$0xff]  }
 0x395   : > { %v6762_v55 = vld [vmem:[%s8962_s8 + $0x6d8] ss:$28 sps:$4 sm:$0xff]  }
 0x397   : > { %4649 = vmatpush2.bf16.msra.mxu0 %v6687_v57  ;;  %4702 = vmatpush2.bf16.msra.mxu1 %v6690_v58  ;;  %v6770_v57 = vld [vmem:[%s8962_s8 + $0x6a4] ss:$28 sps:$4 sm:$0xff]  }
 0x398   : > { %4650 = vmatprep.subr.bf16.mxu0 %v6695_v59  ;;  %4703 = vmatprep.subr.bf16.mxu1 %v6698_v60  ;;  %v6765_v58 = vld [vmem:[%s8962_s8 + $0x320] ss:$28 sps:$4 sm:$0xff]   ;;  %v6773_v60 = vld [vmem:[%s8962_s8 + $0x2ec] ss:$28 sps:$4 sm:$0xff]  }
 0x399   : > { %v6768_v59 = vld [vmem:[%s8962_s8 + $0x6a0] ss:$28 sps:$4 sm:$0xff]  }
 0x39b   : > { %4651 = vmatpush2.bf16.msra.mxu0 %v6693_v19  ;;  %4704 = vmatpush2.bf16.msra.mxu1 %v6696_v61  ;;  %v6776_v19 = vld [vmem:[%s8962_s8 + $0x66c] ss:$28 sps:$4 sm:$0xff]  }
 0x39c   : > { %4652 = vmatprep.subr.bf16.mxu0 %v6701_v1  ;;  %4705 = vmatprep.subr.bf16.mxu1 %v6704_v0  ;;  %v6771_v61 = vld [vmem:[%s8962_s8 + $0x2e8] ss:$28 sps:$4 sm:$0xff]   ;;  %v6779_v0 = vld [vmem:[%s8962_s8 + $0x2b4] ss:$28 sps:$4 sm:$0xff]  }
 0x39d   : > { %v6774_v1 = vld [vmem:[%s8962_s8 + $0x668] ss:$28 sps:$4 sm:$0xff]  }
 0x39f   : > { %4653 = vmatpush2.bf16.msra.mxu0 %v6699_v2  ;;  %4706 = vmatpush2.bf16.msra.mxu1 %v6702_v4  ;;  %v6782_v2 = vld [vmem:[%s8962_s8 + $0x634] ss:$28 sps:$4 sm:$0xff]  }
 0x3a0   : > { %4654 = vmatprep.subr.bf16.mxu0 %v6707_v5  ;;  %4707 = vmatprep.subr.bf16.mxu1 %v6710_v10  ;;  %v6777_v4 = vld [vmem:[%s8962_s8 + $0x2b0] ss:$28 sps:$4 sm:$0xff]   ;;  %v6785_v10 = vld [vmem:[%s8962_s8 + $0x27c] ss:$28 sps:$4 sm:$0xff]  }
 0x3a1   : > { %v6780_v5 = vld [vmem:[%s8962_s8 + $0x630] ss:$28 sps:$4 sm:$0xff]  }
 0x3a3   : > { %4655 = vmatpush2.bf16.msra.mxu0 %v6705_v12  ;;  %4708 = vmatpush2.bf16.msra.mxu1 %v6708_v15  ;;  %v6788_v12 = vld [vmem:[%s8962_s8 + $0x5fc] ss:$28 sps:$4 sm:$0xff]  }
 0x3a4   : > { %4730 = vmatprep.subr.bf16.mxu0 %v6713_v16  ;;  %4783 = vmatprep.subr.bf16.mxu1 %v6716_v18  ;;  %v6783_v15 = vld [vmem:[%s8962_s8 + $0x278] ss:$28 sps:$4 sm:$0xff]   ;;  %v6791_v18 = vld [vmem:[%s8962_s8 + $0x244] ss:$28 sps:$4 sm:$0xff]  }
 0x3a5   : > { %v6786_v16 = vld [vmem:[%s8962_s8 + $0x5f8] ss:$28 sps:$4 sm:$0xff]  }
 0x3a6   : > { %4657 = vmatmul.mubr.bf16.vlgmr.msra.gmra.mxu0 %v8351_v3  ;;  %4710 = vmatmul.mubr.bf16.vlgmr.msra.gmra.mxu1 %v8353_v40 }
 0x3a7   : > { %4666 = vmatprep.mubr.bf16.mxu0 %v8377_v6  ;;  %4719 = vmatprep.mubr.bf16.mxu1 %v8379_v7 }
 0x3a8   : > { %4731 = vmatpush1.bf16.msra.mxu0 %v6711_v20  ;;  %4784 = vmatpush1.bf16.msra.mxu1 %v6714_v21  ;;  %v6794_v20 = vld [vmem:[%s8962_s8 + $0x5c4] ss:$28 sps:$4 sm:$0xff]  }
 0x3a9   : > { %4732 = vmatprep.subr.bf16.mxu0 %v6719_v22  ;;  %4785 = vmatprep.subr.bf16.mxu1 %v6722_v24  ;;  %v6789_v21 = vld [vmem:[%s8962_s8 + $0x240] ss:$28 sps:$4 sm:$0xff]   ;;  %v6797_v24 = vld [vmem:[%s8962_s8 + $0x20c] ss:$28 sps:$4 sm:$0xff]  }
 0x3aa   : > { %v6792_v22 = vld [vmem:[%s8962_s8 + $0x5c0] ss:$28 sps:$4 sm:$0xff]  }
 0x3ac   : > { %4733 = vmatpush1.bf16.msra.mxu0 %v6717_v25  ;;  %4786 = vmatpush1.bf16.msra.mxu1 %v6720_v26  ;;  %v6800_v25 = vld [vmem:[%s8962_s8 + $0x58c] ss:$28 sps:$4 sm:$0xff]  }
 0x3ad   : > { %4734 = vmatprep.subr.bf16.mxu0 %v6725_v27  ;;  %4787 = vmatprep.subr.bf16.mxu1 %v6728_v28  ;;  %v6795_v26 = vld [vmem:[%s8962_s8 + $0x208] ss:$28 sps:$4 sm:$0xff]   ;;  %v6803_v28 = vld [vmem:[%s8962_s8 + $0x1d4] ss:$28 sps:$4 sm:$0xff]  }
 0x3ae   : > { %4667 = vmatmul.mubr.bf16.gmra.mxu0 %v8387_v13  ;;  %4720 = vmatmul.mubr.bf16.gmra.mxu1 %v8389_v8  ;;  %v6798_v27 = vld [vmem:[%s8962_s8 + $0x588] ss:$28 sps:$4 sm:$0xff]  }
 0x3af   : > { %4762 = vmatprep.mubr.bf16.mxu0 %v8341_v51  ;;  %4815 = vmatprep.mubr.bf16.mxu1 %v8343_v17 }
 0x3b0   : > { %4735 = vmatpush1.bf16.msra.mxu0 %v6723_v29  ;;  %4788 = vmatpush1.bf16.msra.mxu1 %v6726_v30  ;;  %v6806_v29 = vld [vmem:[%s8962_s8 + $0x554] ss:$28 sps:$4 sm:$0xff]  }
 0x3b1   : > { %4736 = vmatprep.subr.bf16.mxu0 %v6731_v47  ;;  %4789 = vmatprep.subr.bf16.mxu1 %v6734_v31  ;;  %v6801_v30 = vld [vmem:[%s8962_s8 + $0x1d0] ss:$28 sps:$4 sm:$0xff]   ;;  %v6807_v31 = vld [vmem:[%s8962_s8 + $0x360] ss:$28 sps:$4 sm:$0xff]  }
 0x3b2   : > { %v6804_v47 = vld [vmem:[%s8962_s8 + $0x550] ss:$28 sps:$4 sm:$0xff]  }
 0x3b4   : > { %4737 = vmatpush1.bf16.msra.mxu0 %v6729_v32  ;;  %4790 = vmatpush1.bf16.msra.mxu1 %v6732_v34  ;;  %v6808_v32 = vld [vmem:[%s8962_s8 + $0x6e0] ss:$28 sps:$4 sm:$0xff]  }
 0x3b5   : > { %4738 = vmatprep.subr.bf16.mxu0 %v6737_v35  ;;  %4791 = vmatprep.subr.bf16.mxu1 %v6740_v36  ;;  %v6809_v34 = vld [vmem:[%s8962_s8 + $0x1a0] ss:$28 sps:$4 sm:$0xff]   ;;  %v6811_v36 = vld [vmem:[%s8962_s8 + $0x328] ss:$28 sps:$4 sm:$0xff]  }
 0x3b6   : > { %v6810_v35 = vld [vmem:[%s8962_s8 + $0x520] ss:$28 sps:$4 sm:$0xff]  }
 0x3b8   : > { %4739 = vmatpush1.bf16.msra.mxu0 %v6735_v37  ;;  %4792 = vmatpush1.bf16.msra.mxu1 %v6738_v11  ;;  %v6812_v37 = vld [vmem:[%s8962_s8 + $0x6a8] ss:$28 sps:$4 sm:$0xff]  }
 0x3b9   : > { %4740 = vmatprep.subr.bf16.mxu0 %v6743_v39  ;;  %4793 = vmatprep.subr.bf16.mxu1 %v6746_v23  ;;  %v6813_v11 = vld [vmem:[%s8962_s8 + $0x168] ss:$28 sps:$4 sm:$0xff]   ;;  %v6815_v23 = vld [vmem:[%s8962_s8 + $0x2f0] ss:$28 sps:$4 sm:$0xff]  }
 0x3ba   : > { %v6814_v39 = vld [vmem:[%s8962_s8 + $0x4e8] ss:$28 sps:$4 sm:$0xff]  }
 0x3bc   : > { %4741 = vmatpush1.bf16.msra.mxu0 %v6741_v9  ;;  %4794 = vmatpush1.bf16.msra.mxu1 %v6744_v38  ;;  %v6816_v9 = vld [vmem:[%s8962_s8 + $0x670] ss:$28 sps:$4 sm:$0xff]  }
 0x3bd   : > { %4742 = vmatprep.subr.bf16.mxu0 %v6749_v45  ;;  %4795 = vmatprep.subr.bf16.mxu1 %v6752_v41  ;;  %v6817_v38 = vld [vmem:[%s8962_s8 + $0x130] ss:$28 sps:$4 sm:$0xff]   ;;  %v6819_v41 = vld [vmem:[%s8962_s8 + $0x2b8] ss:$28 sps:$4 sm:$0xff]  }
 0x3be   : > { %v6818_v45 = vld [vmem:[%s8962_s8 + $0x4b0] ss:$28 sps:$4 sm:$0xff]  }
 0x3c0   : > { %4743 = vmatpush1.bf16.msra.mxu0 %v6747_v46  ;;  %4796 = vmatpush1.bf16.msra.mxu1 %v6750_v48  ;;  %v6820_v46 = vld [vmem:[%s8962_s8 + $0x638] ss:$28 sps:$4 sm:$0xff]  }
 0x3c1   : > { %4744 = vmatprep.subr.bf16.mxu0 %v6755_v49  ;;  %4797 = vmatprep.subr.bf16.mxu1 %v6758_v33  ;;  %v6821_v48 = vld [vmem:[%s8962_s8 + $0xf8] ss:$28 sps:$4 sm:$0xff]   ;;  %v6823_v33 = vld [vmem:[%s8962_s8 + $0x280] ss:$28 sps:$4 sm:$0xff]  }
 0x3c2   : > { %v6822_v49 = vld [vmem:[%s8962_s8 + $0x478] ss:$28 sps:$4 sm:$0xff]  }
 0x3c4   : > { %4745 = vmatpush1.bf16.msra.mxu0 %v6753_v50  ;;  %4798 = vmatpush1.bf16.msra.mxu1 %v6756_v52  ;;  %v6826_v50 = vld [vmem:[%s8962_s8 + $0x440] ss:$28 sps:$4 sm:$0xff]   ;;  %v6827_v52 = vld [vmem:[%s8962_s8 + $0x248] ss:$28 sps:$4 sm:$0xff]  }
 0x3c5   : > { %4746 = vmatprep.subr.bf16.mxu0 %v6761_v43  ;;  %4799 = vmatprep.subr.bf16.mxu1 %v6764_v53  ;;  %v6828_v43 = vld [vmem:[%s8962_s8 + $0x5c8] ss:$28 sps:$4 sm:$0xff]  }
 0x3c6   : > { %v6829_v53 = vld [vmem:[%s8962_s8 + $0x88] ss:$28 sps:$4 sm:$0xff]  }
 0x3c8   : > { %4747 = vmatpush2.bf16.msra.mxu0 %v6759_v54  ;;  %4800 = vmatpush2.bf16.msra.mxu1 %v6762_v55  ;;  %v6830_v54 = vld [vmem:[%s8962_s8 + $0x408] ss:$28 sps:$4 sm:$0xff]   ;;  %v6831_v55 = vld [vmem:[%s8962_s8 + $0x210] ss:$28 sps:$4 sm:$0xff]  }
 0x3c9   : > { %4748 = vmatprep.subr.bf16.mxu0 %v6767_v56  ;;  %4801 = vmatprep.subr.bf16.mxu1 %v6770_v57  ;;  %v6832_v56 = vld [vmem:[%s8962_s8 + $0x590] ss:$28 sps:$4 sm:$0xff]  }
 0x3ca   : > { %v6833_v57 = vld [vmem:[%s8962_s8 + $0x50] ss:$28 sps:$4 sm:$0xff]  }
 0x3cc   : > { %4749 = vmatpush2.bf16.msra.mxu0 %v6765_v58  ;;  %4802 = vmatpush2.bf16.msra.mxu1 %v6768_v59  ;;  %v6834_v58 = vld [vmem:[%s8962_s8 + $0x3d0] ss:$28 sps:$4 sm:$0xff]   ;;  %v6835_v59 = vld [vmem:[%s8962_s8 + $0x1d8] ss:$28 sps:$4 sm:$0xff]  }
 0x3cd   : > { %4750 = vmatprep.subr.bf16.mxu0 %v6773_v60  ;;  %4803 = vmatprep.subr.bf16.mxu1 %v6776_v19  ;;  %v6836_v60 = vld [vmem:[%s8962_s8 + $0x558] ss:$28 sps:$4 sm:$0xff]  }
 0x3ce   : > { %v6837_v19 = vld [vmem:[%s8962_s8 + $0x18] ss:$28 sps:$4 sm:$0xff]  }
 0x3d0   : > { %4751 = vmatpush2.bf16.msra.mxu0 %v6771_v61  ;;  %4804 = vmatpush2.bf16.msra.mxu1 %v6774_v1  ;;  %v6838_v61 = vld [vmem:[%s8962_s8 + $0x398] ss:$28 sps:$4 sm:$0xff]   ;;  %v8866_v1 = vld [vmem:[%s8963_s9] sm:$0x7f] }
 0x3d1   : > { %4752 = vmatprep.subr.bf16.mxu0 %v6779_v0  ;;  %4805 = vmatprep.subr.bf16.mxu1 %v6782_v2  ;;  %v3334_v0 = vrot.slane %v8866_v1, %v7996_v14 }
 0x3d4   : > { %4753 = vmatpush2.bf16.msra.mxu0 %v6777_v4  ;;  %4806 = vmatpush2.bf16.msra.mxu1 %v6780_v5 }
 0x3d5   : > { %4754 = vmatprep.subr.bf16.mxu0 %v6785_v10  ;;  %4807 = vmatprep.subr.bf16.mxu1 %v6788_v12 }
 0x3d8   : > { %4755 = vmatpush2.bf16.msra.mxu0 %v6783_v15  ;;  %4808 = vmatpush2.bf16.msra.mxu1 %v6786_v16 }
 0x3d9   : > { %4756 = vmatprep.subr.bf16.mxu0 %v6791_v18  ;;  %4809 = vmatprep.subr.bf16.mxu1 %v6794_v20 }
 0x3dc   : > { %4757 = vmatpush2.bf16.msra.mxu0 %v6789_v21  ;;  %4810 = vmatpush2.bf16.msra.mxu1 %v6792_v22 }
 0x3dd   : > { %4758 = vmatprep.subr.bf16.mxu0 %v6797_v24  ;;  %4811 = vmatprep.subr.bf16.mxu1 %v6800_v25 }
 0x3e0   : > { %4759 = vmatpush2.bf16.msra.mxu0 %v6795_v26  ;;  %4812 = vmatpush2.bf16.msra.mxu1 %v6798_v27 }
 0x3e1   : > { %4760 = vmatprep.subr.bf16.mxu0 %v6803_v28  ;;  %4813 = vmatprep.subr.bf16.mxu1 %v6806_v29 }
 0x3e4   : > { %4761 = vmatpush2.bf16.msra.mxu0 %v6801_v30  ;;  %4814 = vmatpush2.bf16.msra.mxu1 %v6804_v47 }
 0x3e5   : > { %5960 = vmatprep.subr.bf16.mxu0 %v6807_v31  ;;  %5988 = vmatprep.subr.bf16.mxu1 %v6808_v32 }
 0x3e7   : > { %4763 = vmatmul.mubr.bf16.vlgmr.msra.gmra.mxu0 %v8351_v3  ;;  %4816 = vmatmul.mubr.bf16.vlgmr.msra.gmra.mxu1 %v8353_v40 }
 0x3e8   : > { %4772 = vmatprep.mubr.bf16.mxu0 %v8377_v6  ;;  %4825 = vmatprep.mubr.bf16.mxu1 %v8379_v7 }
 0x3e9   : > { %5961 = vmatpush3.bf16.msra.mxu0 %v6809_v34  ;;  %5989 = vmatpush3.bf16.msra.mxu1 %v6810_v35 }
 0x3ea   : > { %5962 = vmatprep.subr.bf16.mxu0 %v6811_v36  ;;  %5990 = vmatprep.subr.bf16.mxu1 %v6812_v37 }
 0x3ed   : > { %5963 = vmatpush3.bf16.msra.mxu0 %v6813_v11  ;;  %5991 = vmatpush3.bf16.msra.mxu1 %v6814_v39 }
 0x3ee   : > { %5964 = vmatprep.subr.bf16.mxu0 %v6815_v23  ;;  %5992 = vmatprep.subr.bf16.mxu1 %v6816_v9 }
 0x3ef   : > { %4773 = vmatmul.mubr.bf16.gmra.mxu0 %v8387_v13  ;;  %4826 = vmatmul.mubr.bf16.gmra.mxu1 %v8389_v8 }
 0x3f0   : > { %4868 = vmatprep.mubr.bf16.mxu0 %v8341_v51  ;;  %4917 = vmatprep.mubr.bf16.mxu1 %v8343_v17  ;;  %v6824_v51 = vld [vmem:[%s8962_s8 + $0x600] ss:$28 sps:$4 sm:$0xff]  }
 0x3f1   : > { %5965 = vmatpush3.bf16.msra.mxu0 %v6817_v38  ;;  %5993 = vmatpush3.bf16.msra.mxu1 %v6818_v45  ;;  %v6825_v17 = vld [vmem:[%s8962_s8 + $0xc0] ss:$28 sps:$4 sm:$0xff]  }
 0x3f2   : > { %5966 = vmatprep.subr.bf16.mxu0 %v6819_v41  ;;  %5994 = vmatprep.subr.bf16.mxu1 %v6820_v46 }
 0x3f5   : > { %5967 = vmatpush3.bf16.msra.mxu0 %v6821_v48  ;;  %5995 = vmatpush3.bf16.msra.mxu1 %v6822_v49 }
 0x3f6   : > { %5968 = vmatprep.subr.bf16.mxu0 %v6823_v33  ;;  %5996 = vmatprep.subr.bf16.mxu1 %v6824_v51 }
 0x3f9   : > { %5969 = vmatpush3.bf16.msra.mxu0 %v6825_v17  ;;  %5997 = vmatpush3.bf16.msra.mxu1 %v6826_v50 }
 0x3fa   : > { %5970 = vmatprep.subr.bf16.mxu0 %v6827_v52  ;;  %5998 = vmatprep.subr.bf16.mxu1 %v6828_v43 }
 0x3fd   : > { %5971 = vmatpush3.bf16.msra.mxu0 %v6829_v53  ;;  %5999 = vmatpush3.bf16.msra.mxu1 %v6830_v54 }
 0x3fe   : > { %5972 = vmatprep.subr.bf16.mxu0 %v6831_v55  ;;  %6000 = vmatprep.subr.bf16.mxu1 %v6832_v56 }
 0x401   : > { %5973 = vmatpush3.bf16.msra.mxu0 %v6833_v57  ;;  %6001 = vmatpush3.bf16.msra.mxu1 %v6834_v58 }
 0x402   : > { %5974 = vmatprep.subr.bf16.mxu0 %v6835_v59  ;;  %6002 = vmatprep.subr.bf16.mxu1 %v6836_v60 }
 0x405   : > { %5975 = vmatpush3.bf16.msra.mxu0 %v6837_v19  ;;  %6003 = vmatpush3.bf16.msra.mxu1 %v6838_v61 }
 0x408   : > { %4869 = vmatmul.mubr.bf16.vlgmr.msra.gmra.mxu0 %v8351_v3  ;;  %4918 = vmatmul.mubr.bf16.vlgmr.msra.gmra.mxu1 %v8353_v40  ;;  %v3338_v3 = vrot.slane %v8866_v1, %v7993_v44 }
 0x409   : > { %4876 = vmatprep.mubr.bf16.mxu0 %v8377_v6  ;;  %4925 = vmatprep.mubr.bf16.mxu1 %v8379_v7 }
 0x410   : > { %4877 = vmatmul.mubr.bf16.gmra.mxu0 %v8387_v13  ;;  %4926 = vmatmul.mubr.bf16.gmra.mxu1 %v8389_v8 }
 0x426   : > { %v4552_v40 = vpop.f32.mrf.mxu0  ;;  %v4605_v2 = vpop.f32.mrf.mxu1 }
 0x427   : > { %v4553_v6 = vadd.f32 %v4552_v40, %v3334_v0 }
 0x428   : > { %v4554_v4 = vpop.f32.mrf.mxu0  ;;  %v4607_v7 = vpop.f32.mrf.mxu1 }
 0x429   : > { %v4606_v5 = vadd.f32 %v4605_v2, %v4553_v6  ;;  %v4555_v13 = vadd.f32 %v4554_v4, %v3338_v3 }
 0x42a   : > { %v4556_v10 = vpop.f32.mrf.mxu0  ;;  %v4609_v8 = vpop.f32.mrf.mxu1 }
 0x42b   : > { %v5881_v12 = vmul.f32 -1.442695, %v4606_v5  ;;  %v4608_v15 = vadd.f32 %v4607_v7, %v4555_v13  ;;  %v4557_v16 = vadd.f32 %v4556_v10, %v3334_v0 }
 0x42c   : > { %v4558_v18 = vpop.f32.mrf.mxu0  ;;  %v4611_v20 = vpop.f32.mrf.mxu1 }
 0x42d   : > { %6847 = vpow2.f32 %v5881_v12  ;;  %v5882_v21 = vmul.f32 -1.442695, %v4608_v15  ;;  %v4610_v14 = vadd.f32 %v4609_v8, %v4557_v16  ;;  %v4559_v22 = vadd.f32 %v4558_v18, %v3338_v3 }
 0x42e   : > { %v4562_v24 = vpop.f32.mrf.mxu0  ;;  %v4615_v44 = vpop.f32.mrf.mxu1  ;;  %v3342_v8 = vrot.slane %v8866_v1, %v8012_v63  ;;  %v3346_v12 = vrot.slane %v8866_v1, %v8009_v62 }
 0x42f   : > { %6849 = vpow2.f32 %v5882_v21  ;;  %v5888_v25 = vmul.f32 -1.442695, %v4610_v14  ;;  %v4612_v26 = vadd.f32 %v4611_v20, %v4559_v22  ;;  %v4563_v27 = vadd.f32 %v4562_v24, %v3334_v0 }
 0x430   : > { %v4564_v28 = vpop.f32.mrf.mxu0  ;;  %v4617_v29 = vpop.f32.mrf.mxu1 }
 0x431   : > { %6851 = vpow2.f32 %v5888_v25  ;;  %v5889_v30 = vmul.f32 -1.442695, %v4612_v26  ;;  %v4616_v47 = vadd.f32 %v4615_v44, %v4563_v27  ;;  %v4565_v31 = vadd.f32 %v4564_v28, %v3338_v3 }
 0x432   : > { %v4566_v32 = vpop.f32.mrf.mxu0  ;;  %v4619_v34 = vpop.f32.mrf.mxu1 }
 0x433   : > { %6853 = vpow2.f32 %v5889_v30  ;;  %v5895_v35 = vmul.f32 -1.442695, %v4616_v47  ;;  %v4618_v36 = vadd.f32 %v4617_v29, %v4565_v31  ;;  %v4567_v37 = vadd.f32 %v4566_v32, %v3334_v0 }
 0x434   : > { %v4568_v11 = vpop.f32.mrf.mxu0  ;;  %v4621_v38 = vpop.f32.mrf.mxu1 }
 0x435   : > { %6855 = vpow2.f32 %v5895_v35  ;;  %v5896_v39 = vmul.f32 -1.442695, %v4618_v36  ;;  %v4620_v23 = vadd.f32 %v4619_v34, %v4567_v37  ;;  %v4569_v9 = vadd.f32 %v4568_v11, %v3338_v3 }
 0x437   : > { %6857 = vpow2.f32 %v5896_v39  ;;  %v5902_v45 = vmul.f32 -1.442695, %v4620_v23  ;;  %v4622_v41 = vadd.f32 %v4621_v38, %v4569_v9 }
 0x439   : > { %6859 = vpow2.f32 %v5902_v45  ;;  %v5903_v46 = vmul.f32 -1.442695, %v4622_v41 }
 0x43a   : > { %v6848_v48 = vpop.eup %6847 }
 0x43b   : > { %v5018_v49 = vadd.f32 1.0, %v6848_v48  ;;  %6861 = vpow2.f32 %v5903_v46 }
 0x43c   : > { %v6850_v33 = vpop.eup %6849 }
 0x43d   : > { %v5019_v51 = vadd.f32 1.0, %v6850_v33  ;;  %6863 = vrcp.f32 %v5018_v49 }
 0x43e   : > { %v6852_v17 = vpop.eup %6851 }
 0x43f   : > { %6865 = vrcp.f32 %v5019_v51  ;;  %v5025_v50 = vadd.f32 1.0, %v6852_v17 }
 0x440   : > { %v6854_v52 = vpop.eup %6853 }
 0x441   : > { %v5026_v43 = vadd.f32 1.0, %v6854_v52  ;;  %6867 = vrcp.f32 %v5025_v50 }
 0x442   : > { %v6856_v53 = vpop.eup %6855 }
 0x443   : > { %6869 = vrcp.f32 %v5026_v43  ;;  %v5032_v54 = vadd.f32 1.0, %v6856_v53 }
 0x444   : > { %v6858_v55 = vpop.eup %6857 }
 0x445   : > { %v5033_v56 = vadd.f32 1.0, %v6858_v55  ;;  %6871 = vrcp.f32 %v5032_v54 }
 0x446   : > { %v6860_v57 = vpop.eup %6859 }
 0x447   : > { %6873 = vrcp.f32 %v5033_v56  ;;  %v5039_v58 = vadd.f32 1.0, %v6860_v57 }
 0x448   : > { %v6862_v59 = vpop.eup %6861 }
 0x449   : > { %v5040_v60 = vadd.f32 1.0, %v6862_v59  ;;  %6875 = vrcp.f32 %v5039_v58 }
 0x44a   : > { %v6864_v19 = vpop.eup %6863 }
 0x44b   : > { %6877 = vrcp.f32 %v5040_v60 }
 0x44c   : > { %v6866_v61 = vpop.eup %6865 }
 0x44d   : > { %v5935_v0 = vpack.c.bf16 %v6866_v61, %v6864_v19 }
 0x44e   : > { %v6868_v3 = vpop.eup %6867 }
 0x44f   : > { %5190 = vst [vmem:[%s8875_s24] sm:$0xff] %v5935_v0 }
 0x450   : > { %v6870_v40 = vpop.eup %6869 }
 0x451   : > { %v5939_v2 = vpack.c.bf16 %v6870_v40, %v6868_v3 }
 0x452   : > { %v6872_v6 = vpop.eup %6871 }
 0x453   : > { %5195 = vst [vmem:[%s8875_s24 + $0x1c] sm:$0xff] %v5939_v2 }
 0x454   : > { %v6874_v4 = vpop.eup %6873 }
 0x455   : > { %v5943_v7 = vpack.c.bf16 %v6874_v4, %v6872_v6 }
 0x456   : > { %v6876_v5 = vpop.eup %6875 }
 0x457   : > { %5199 = vst [vmem:[%s8875_s24 + $0x38] sm:$0xff] %v5943_v7 }
 0x458   : > { %v6878_v13 = vpop.eup %6877 }
 0x459   : > { %v5947_v10 = vpack.c.bf16 %v6878_v13, %v6876_v5 }
 0x45b   : > { %5203 = vst [vmem:[%s8875_s24 + $0x54] sm:$0xff] %v5947_v10 }
 0x466   : > { %v4658_v15 = vpop.f32.mrf.mxu0  ;;  %v4711_v16 = vpop.f32.mrf.mxu1 }
 0x467   : > { %v4659_v18 = vadd.f32 %v4658_v15, %v3342_v8 }
 0x468   : > { %v4660_v20 = vpop.f32.mrf.mxu0  ;;  %v4713_v21 = vpop.f32.mrf.mxu1 }
 0x469   : > { %v4712_v14 = vadd.f32 %v4711_v16, %v4659_v18  ;;  %v4661_v22 = vadd.f32 %v4660_v20, %v3346_v12 }
 0x46a   : > { %v4662_v24 = vpop.f32.mrf.mxu0  ;;  %v4715_v44 = vpop.f32.mrf.mxu1 }
 0x46b   : > { %v5883_v25 = vmul.f32 -1.442695, %v4712_v14  ;;  %v4714_v26 = vadd.f32 %v4713_v21, %v4661_v22  ;;  %v4663_v27 = vadd.f32 %v4662_v24, %v3342_v8  ;;  %v3349_v22 = vsub.s32 4, %v7990_v42 }
 0x46c   : > { %v4664_v28 = vpop.f32.mrf.mxu0  ;;  %v4717_v29 = vpop.f32.mrf.mxu1  ;;  %v3353_v24 = vsub.s32 5, %v7990_v42 }
 0x46d   : > { %6879 = vpow2.f32 %v5883_v25  ;;  %v5884_v30 = vmul.f32 -1.442695, %v4714_v26  ;;  %v4716_v63 = vadd.f32 %v4715_v44, %v4663_v27  ;;  %v4665_v47 = vadd.f32 %v4664_v28, %v3346_v12 }
 0x46e   : > { %v4668_v31 = vpop.f32.mrf.mxu0  ;;  %v4721_v62 = vpop.f32.mrf.mxu1  ;;  %v3350_v44 = vrot.slane %v8866_v1, %v3349_v22  ;;  %v3354_v25 = vrot.slane %v8866_v1, %v3353_v24 }
 0x46f   : > { %6881 = vpow2.f32 %v5884_v30  ;;  %v5890_v32 = vmul.f32 -1.442695, %v4716_v63  ;;  %v4718_v34 = vadd.f32 %v4717_v29, %v4665_v47  ;;  %v4669_v35 = vadd.f32 %v4668_v31, %v3342_v8 }
 0x470   : > { %v4670_v36 = vpop.f32.mrf.mxu0  ;;  %v4723_v37 = vpop.f32.mrf.mxu1 }
 0x471   : > { %6883 = vpow2.f32 %v5890_v32  ;;  %v5891_v11 = vmul.f32 -1.442695, %v4718_v34  ;;  %v4722_v39 = vadd.f32 %v4721_v62, %v4669_v35  ;;  %v4671_v23 = vadd.f32 %v4670_v36, %v3346_v12 }
 0x472   : > { %v4672_v9 = vpop.f32.mrf.mxu0  ;;  %v4725_v38 = vpop.f32.mrf.mxu1 }
 0x473   : > { %6885 = vpow2.f32 %v5891_v11  ;;  %v5897_v45 = vmul.f32 -1.442695, %v4722_v39  ;;  %v4724_v41 = vadd.f32 %v4723_v37, %v4671_v23  ;;  %v4673_v46 = vadd.f32 %v4672_v9, %v3342_v8 }
 0x474   : > { %v4674_v48 = vpop.f32.mrf.mxu0  ;;  %v4727_v17 = vpop.f32.mrf.mxu1 }
 0x475   : > { %6887 = vpow2.f32 %v5897_v45  ;;  %v5898_v49 = vmul.f32 -1.442695, %v4724_v41  ;;  %v4726_v33 = vadd.f32 %v4725_v38, %v4673_v46  ;;  %v4675_v51 = vadd.f32 %v4674_v48, %v3346_v12 }
 0x477   : > { %6889 = vpow2.f32 %v5898_v49  ;;  %v5904_v50 = vmul.f32 -1.442695, %v4726_v33  ;;  %v4728_v52 = vadd.f32 %v4727_v17, %v4675_v51 }
 0x479   : > { %6891 = vpow2.f32 %v5904_v50  ;;  %v5905_v43 = vmul.f32 -1.442695, %v4728_v52 }
 0x47a   : > { %v6880_v53 = vpop.eup %6879 }
 0x47b   : > { %v5020_v54 = vadd.f32 1.0, %v6880_v53  ;;  %6893 = vpow2.f32 %v5905_v43 }
 0x47c   : > { %v6882_v55 = vpop.eup %6881 }
 0x47d   : > { %v5021_v56 = vadd.f32 1.0, %v6882_v55  ;;  %6895 = vrcp.f32 %v5020_v54 }
 0x47e   : > { %v6884_v57 = vpop.eup %6883 }
 0x47f   : > { %6897 = vrcp.f32 %v5021_v56  ;;  %v5027_v58 = vadd.f32 1.0, %v6884_v57 }
 0x480   : > { %v6886_v59 = vpop.eup %6885 }
 0x481   : > { %v5028_v60 = vadd.f32 1.0, %v6886_v59  ;;  %6899 = vrcp.f32 %v5027_v58 }
 0x482   : > { %v6888_v19 = vpop.eup %6887 }
 0x483   : > { %6901 = vrcp.f32 %v5028_v60  ;;  %v5034_v61 = vadd.f32 1.0, %v6888_v19 }
 0x484   : > { %v6890_v0 = vpop.eup %6889 }
 0x485   : > { %v5035_v3 = vadd.f32 1.0, %v6890_v0  ;;  %6903 = vrcp.f32 %v5034_v61 }
 0x486   : > { %v6892_v40 = vpop.eup %6891 }
 0x487   : > { %6905 = vrcp.f32 %v5035_v3  ;;  %v5041_v2 = vadd.f32 1.0, %v6892_v40 }
 0x488   : > { %v6894_v6 = vpop.eup %6893 }
 0x489   : > { %v5042_v4 = vadd.f32 1.0, %v6894_v6  ;;  %6907 = vrcp.f32 %v5041_v2 }
 0x48a   : > { %v6896_v7 = vpop.eup %6895 }
 0x48b   : > { %6909 = vrcp.f32 %v5042_v4 }
 0x48c   : > { %v6898_v5 = vpop.eup %6897 }
 0x48d   : > { %v5936_v13 = vpack.c.bf16 %v6898_v5, %v6896_v7 }
 0x48e   : > { %v6900_v10 = vpop.eup %6899 }
 0x48f   : > { %5191 = vst [vmem:[%s8875_s24 + $0x8] sm:$0xff] %v5936_v13 }
 0x490   : > { %v6902_v8 = vpop.eup %6901 }
 0x491   : > { %v5940_v12 = vpack.c.bf16 %v6902_v8, %v6900_v10 }
 0x492   : > { %v6904_v15 = vpop.eup %6903 }
 0x493   : > { %5196 = vst [vmem:[%s8875_s24 + $0x24] sm:$0xff] %v5940_v12  ;;  %v3357_v12 = vsub.s32 6, %v7990_v42 }
 0x494   : > { %v6906_v16 = vpop.eup %6905 }
 0x495   : > { %v5944_v18 = vpack.c.bf16 %v6906_v16, %v6904_v15  ;;  %v3358_v22 = vrot.slane %v8866_v1, %v3357_v12 }
 0x496   : > { %v6908_v20 = vpop.eup %6907 }
 0x497   : > { %5200 = vst [vmem:[%s8875_s24 + $0x40] sm:$0xff] %v5944_v18 }
 0x498   : > { %v6910_v21 = vpop.eup %6909 }
 0x499   : > { %v5948_v14 = vpack.c.bf16 %v6910_v21, %v6908_v20 }
 0x49b   : > { %5204 = vst [vmem:[%s8875_s24 + $0x5c] sm:$0xff] %v5948_v14 }
 0x4a7   : > { %v4764_v26 = vpop.f32.mrf.mxu0  ;;  %v4817_v27 = vpop.f32.mrf.mxu1 }
 0x4a8   : > { %v4765_v28 = vadd.f32 %v4764_v26, %v3350_v44 }
 0x4a9   : > { %v4766_v29 = vpop.f32.mrf.mxu0  ;;  %v4819_v30 = vpop.f32.mrf.mxu1 }
 0x4aa   : > { %v4818_v63 = vadd.f32 %v4817_v27, %v4765_v28  ;;  %v4767_v47 = vadd.f32 %v4766_v29, %v3354_v25 }
 0x4ab   : > { %v4768_v31 = vpop.f32.mrf.mxu0  ;;  %v4821_v62 = vpop.f32.mrf.mxu1 }
 0x4ac   : > { %v5885_v32 = vmul.f32 -1.442695, %v4818_v63  ;;  %v4820_v34 = vadd.f32 %v4819_v30, %v4767_v47  ;;  %v4769_v35 = vadd.f32 %v4768_v31, %v3350_v44 }
 0x4ad   : > { %v4770_v36 = vpop.f32.mrf.mxu0  ;;  %v4823_v37 = vpop.f32.mrf.mxu1 }
 0x4ae   : > { %6911 = vpow2.f32 %v5885_v32  ;;  %v5886_v11 = vmul.f32 -1.442695, %v4820_v34  ;;  %v4822_v39 = vadd.f32 %v4821_v62, %v4769_v35  ;;  %v4771_v23 = vadd.f32 %v4770_v36, %v3354_v25 }
 0x4af   : > { %v4774_v9 = vpop.f32.mrf.mxu0  ;;  %v4827_v38 = vpop.f32.mrf.mxu1 }
 0x4b0   : > { %6913 = vpow2.f32 %v5886_v11  ;;  %v5892_v45 = vmul.f32 -1.442695, %v4822_v39  ;;  %v4824_v41 = vadd.f32 %v4823_v37, %v4771_v23  ;;  %v4775_v46 = vadd.f32 %v4774_v9, %v3350_v44 }
 0x4b1   : > { %v4776_v48 = vpop.f32.mrf.mxu0  ;;  %v4829_v49 = vpop.f32.mrf.mxu1 }
 0x4b2   : > { %6915 = vpow2.f32 %v5892_v45  ;;  %v5893_v33 = vmul.f32 -1.442695, %v4824_v41  ;;  %v4828_v51 = vadd.f32 %v4827_v38, %v4775_v46  ;;  %v4777_v17 = vadd.f32 %v4776_v48, %v3354_v25 }
 0x4b3   : > { %v4778_v50 = vpop.f32.mrf.mxu0  ;;  %v4831_v52 = vpop.f32.mrf.mxu1 }
 0x4b4   : > { %6917 = vpow2.f32 %v5893_v33  ;;  %v5899_v43 = vmul.f32 -1.442695, %v4828_v51  ;;  %v4830_v53 = vadd.f32 %v4829_v49, %v4777_v17  ;;  %v4779_v54 = vadd.f32 %v4778_v50, %v3350_v44 }
 0x4b5   : > { %v4780_v55 = vpop.f32.mrf.mxu0  ;;  %v4833_v59 = vpop.f32.mrf.mxu1 }
 0x4b6   : > { %6919 = vpow2.f32 %v5899_v43  ;;  %v5900_v56 = vmul.f32 -1.442695, %v4830_v53  ;;  %v4832_v57 = vadd.f32 %v4831_v52, %v4779_v54  ;;  %v4781_v58 = vadd.f32 %v4780_v55, %v3354_v25 }
 0x4b8   : > { %6921 = vpow2.f32 %v5900_v56  ;;  %v5906_v60 = vmul.f32 -1.442695, %v4832_v57  ;;  %v4834_v19 = vadd.f32 %v4833_v59, %v4781_v58 }
 0x4ba   : > { %6923 = vpow2.f32 %v5906_v60  ;;  %v5907_v61 = vmul.f32 -1.442695, %v4834_v19 }
 0x4bb   : > { %v6912_v0 = vpop.eup %6911 }
 0x4bc   : > { %v5022_v3 = vadd.f32 1.0, %v6912_v0  ;;  %6925 = vpow2.f32 %v5907_v61 }
 0x4bd   : > { %v6914_v40 = vpop.eup %6913 }
 0x4be   : > { %v5023_v2 = vadd.f32 1.0, %v6914_v40  ;;  %6927 = vrcp.f32 %v5022_v3 }
 0x4bf   : > { %v6916_v6 = vpop.eup %6915 }
 0x4c0   : > { %6929 = vrcp.f32 %v5023_v2  ;;  %v5029_v4 = vadd.f32 1.0, %v6916_v6 }
 0x4c1   : > { %v6918_v7 = vpop.eup %6917 }
 0x4c2   : > { %v5030_v5 = vadd.f32 1.0, %v6918_v7  ;;  %6931 = vrcp.f32 %v5029_v4 }
 0x4c3   : > { %v6920_v13 = vpop.eup %6919 }
 0x4c4   : > { %6933 = vrcp.f32 %v5030_v5  ;;  %v5036_v10 = vadd.f32 1.0, %v6920_v13 }
 0x4c5   : > { %v6922_v8 = vpop.eup %6921 }
 0x4c6   : > { %v5037_v15 = vadd.f32 1.0, %v6922_v8  ;;  %6935 = vrcp.f32 %v5036_v10 }
 0x4c7   : > { %v6924_v16 = vpop.eup %6923 }
 0x4c8   : > { %6937 = vrcp.f32 %v5037_v15  ;;  %v5043_v18 = vadd.f32 1.0, %v6924_v16  ;;  %v5976_v20 = vpop.f32.mrf.mxu0  ;;  %v6004_v21 = vpop.f32.mrf.mxu1 }
 0x4c9   : > { %v6926_v14 = vpop.eup %6925 }
 0x4ca   : > { %v5044_v24 = vadd.f32 1.0, %v6926_v14  ;;  %v5977_v44 = vpop.f32.mrf.mxu0  ;;  %v6005_v25 = vpop.f32.mrf.mxu1  ;;  %6939 = vrcp.f32 %v5043_v18 }
 0x4cb   : > { %v5978_v26 = vadd.f32 %v5977_v44, %v5976_v20  ;;  %v6928_v27 = vpop.eup %6927  ;;  %v6006_v63 = vadd.f32 %v6005_v25, %v6004_v21 }
 0x4cc   : > { %6941 = vrcp.f32 %v5044_v24  ;;  %v5979_v28 = vpop.f32.mrf.mxu0  ;;  %v6007_v42 = vpop.f32.mrf.mxu1 }
 0x4cd   : > { %v6930_v29 = vpop.eup %6929  ;;  %v4871_v30 = vadd.f32 %v5978_v26, %v3358_v22 }
 0x4ce   : > { %v5937_v47 = vpack.c.bf16 %v6930_v29, %v6928_v27  ;;  %v5980_v31 = vpop.f32.mrf.mxu0  ;;  %v6008_v62 = vpop.f32.mrf.mxu1 }
 0x4cf   : > { %v4920_v32 = vadd.f32 %v6006_v63, %v4871_v30  ;;  %v5981_v34 = vadd.f32 %v5980_v31, %v5979_v28  ;;  %v6932_v1 = vpop.eup %6931  ;;  %v6009_v23 = vadd.f32 %v6008_v62, %v6007_v42 }
 0x4d0   : > { %5192 = vst [vmem:[%s8875_s24 + $0x10] sm:$0xff] %v5937_v47  ;;  %v5982_v35 = vpop.f32.mrf.mxu0  ;;  %v6010_v36 = vpop.f32.mrf.mxu1 }
 0x4d1   : > { %v6934_v37 = vpop.eup %6933  ;;  %v5887_v11 = vmul.f32 -1.442695, %v4920_v32  ;;  %v4874_v39 = vadd.f32 %v5981_v34, %v3358_v22 }
 0x4d2   : > { %v5941_v9 = vpack.c.bf16 %v6934_v37, %v6932_v1  ;;  %v5983_v38 = vpop.f32.mrf.mxu0  ;;  %v6011_v45 = vpop.f32.mrf.mxu1 }
 0x4d3   : > { %6943 = vpow2.f32 %v5887_v11  ;;  %v4923_v41 = vadd.f32 %v6009_v23, %v4874_v39  ;;  %v5984_v46 = vadd.f32 %v5983_v38, %v5982_v35  ;;  %v6936_v48 = vpop.eup %6935  ;;  %v6012_v52 = vadd.f32 %v6011_v45, %v6010_v36 }
 0x4d4   : > { %5197 = vst [vmem:[%s8875_s24 + $0x2c] sm:$0xff] %v5941_v9  ;;  %v5985_v49 = vpop.f32.mrf.mxu0  ;;  %v6013_v33 = vpop.f32.mrf.mxu1 }
 0x4d5   : > { %v6938_v51 = vpop.eup %6937  ;;  %v5894_v17 = vmul.f32 -1.442695, %v4923_v41  ;;  %v4879_v50 = vadd.f32 %v5984_v46, %v3358_v22 }
 0x4d6   : > { %v5945_v43 = vpack.c.bf16 %v6938_v51, %v6936_v48  ;;  %v5986_v53 = vpop.f32.mrf.mxu0  ;;  %v6014_v54 = vpop.f32.mrf.mxu1 }
 0x4d7   : > { %6945 = vpow2.f32 %v5894_v17  ;;  %v4928_v55 = vadd.f32 %v6012_v52, %v4879_v50  ;;  %v5987_v56 = vadd.f32 %v5986_v53, %v5985_v49  ;;  %v6940_v57 = vpop.eup %6939  ;;  %v6015_v19 = vadd.f32 %v6014_v54, %v6013_v33 }
 0x4d8   : > { %5201 = vst [vmem:[%s8875_s24 + $0x48] sm:$0xff] %v5945_v43 }
 0x4d9   : > { %v6942_v58 = vpop.eup %6941  ;;  %v5901_v59 = vmul.f32 -1.442695, %v4928_v55  ;;  %v4882_v60 = vadd.f32 %v5987_v56, %v3358_v22 }
 0x4da   : > { %v5949_v61 = vpack.c.bf16 %v6942_v58, %v6940_v57 }
 0x4db   : > { %6947 = vpow2.f32 %v5901_v59  ;;  %v4931_v0 = vadd.f32 %v6015_v19, %v4882_v60 }
 0x4dc   : > { %5205 = vst [vmem:[%s8875_s24 + $0x64] sm:$0xff] %v5949_v61 }
 0x4dd   : > { %v5908_v3 = vmul.f32 -1.442695, %v4931_v0 }
 0x4df   : > { %6949 = vpow2.f32 %v5908_v3 }
 0x4e0   : > { %v6944_v40 = vpop.eup %6943 }
 0x4e1   : > { %v5024_v2 = vadd.f32 1.0, %v6944_v40 }
 0x4e3   : > { %6951 = vrcp.f32 %v5024_v2 }
 0x4e4   : > { %v6946_v6 = vpop.eup %6945 }
 0x4e5   : > { %v5031_v4 = vadd.f32 1.0, %v6946_v6 }
 0x4e7   : > { %6953 = vrcp.f32 %v5031_v4 }
 0x4e8   : > { %v6948_v7 = vpop.eup %6947 }
 0x4e9   : > { %v5038_v5 = vadd.f32 1.0, %v6948_v7 }
 0x4eb   : > { %6955 = vrcp.f32 %v5038_v5 }
 0x4ec   : > { %v6950_v13 = vpop.eup %6949 }
 0x4ed   : > { %v5045_v10 = vadd.f32 1.0, %v6950_v13 }
 0x4ef   : > { %6957 = vrcp.f32 %v5045_v10 }
 0x4f0   : > { %v6952_v8 = vpop.eup %6951 }
 0x4f1   : > { %v5938_v12 = vpack.c.bf16 %v6952_v8, %v6952_v8 }
 0x4f3   : > { %5194 = vst.msk [vmem:[%s8875_s24 + $0x18] sm:$0xf] %vm5193_vm1, %v5938_v12 }
 0x4f4   : > { %v6954_v15 = vpop.eup %6953 }
 0x4f5   : > { %v5942_v16 = vpack.c.bf16 %v6954_v15, %v6954_v15 }
 0x4f7   : > { %5198 = vst.msk [vmem:[%s8875_s24 + $0x34] sm:$0xf] %vm5193_vm1, %v5942_v16 }
 0x4f8   : > { %v6956_v18 = vpop.eup %6955 }
 0x4f9   : > { %v5946_v20 = vpack.c.bf16 %v6956_v18, %v6956_v18 }
 0x4fb   : > { %5202 = vst.msk [vmem:[%s8875_s24 + $0x50] sm:$0xf] %vm5193_vm1, %v5946_v20 }
 0x4fc   : > { %v6958_v21 = vpop.eup %6957 }
 0x4fd   : > { %v5950_v14 = vpack.c.bf16 %v6958_v21, %v6958_v21 }
 0x4ff   : > { %5206 = vst.msk [vmem:[%s8875_s24 + $0x6c] sm:$0xf] %vm5193_vm1, %v5950_v14 }
 0x500   : > { %6977 = shalt.err (!%p6974_p3)
}
 0x501   : > { %s6978_s16 = scalar_lea.hbm %s8907_s29, 1792  ;;  %s6982_s24 = scalar_lea.hbm %s8964_s10, 3584 }
 0x502   : > { %p6979_p4 = scmp.ne.s32.totalorder %s8907_s29, %s6978_s16  ;;  %p6983_p9 = scmp.lt.s32.totalorder %s8907_s29, %s8964_s10 }
 0x503   : > { %p6984_p10 = scmp.lt.s32.totalorder %s6982_s24, %s6978_s16 }
 0x504   : > { %p6980_p7 = pnand %p6979_p4, %p7128_p5 }
 0x505   : > { %p6985_p11 = por %p6984_p10, %p6983_p9 }
 0x506   : > { %p6981_p8 = pneg %p6980_p7 }
 0x508   : > { %p6986_p12 = pnand %p6985_p11, %p6981_p8 }
 0x50a   : > { %6989 = shalt.err (!%p6986_p12)
}
 0x50b   : > { %s7028_s30 = smov 448   ;;  %s7029_s21 = smov 28  }
 0x50c   : > { %6019 = dma.vmem_to_hbm [thread:$0]  (%p7128_p5), %s8909_s25, 1792, %s8907_s29, %s8914_s12, %s7028_s30, %s7028_s30, %s7029_s21  }
 0x50d PF: > { %p6025_p13 = scmp.ge.s32.totalorder %s7024_s20, 2  ;;  %s5247_s14 = sand.u32 1, %s7012_s17  }
 0x50e   : > { %s5248_s15 = scalar_lea.sflag [#allocation3], %s5247_s14 }
 0x50f   : > { %p6022_p0 = pnand %p6025_p13, %p7132_p6 }
 0x511   : > { %p6023_p1 = pneg %p6022_p0 }
 0x513   : > { %7007 = dma.done.wait (%p6023_p1), %s5248_s15, 1792  }
 0x514   : > { %7009 = vsyncadd (%p6023_p1), %s5248_s15, 4294965504  ;;  %s8974_s20 = sld [smem:[#allocation6_spill]]  ;;  %s8977_s17 = smov %s7016_s18 }
 0x515   : > { %s8975_s19 = sld [smem:[#allocation5_spill]] }
 0x516   : > { %s8976_s16 = sld [smem:[#allocation7_spill]] }
 0x51a   : > { %p22_p2 = scmp.ge.s32.totalorder %s8974_s20, 4  }
 0x51b   : > { %s8978_s18 = smov %s8975_s19 }
 0x51c   : > { %s8979_s19 = smov %s8976_s16  ;;  %24 = sbr.rel (!%p22_p2) target bundleno = 3 (0x3), region = 110 }
 0x521   :  { %5262 = vsyncpa [#allocation3], 1 }
 0x522   :  { %5264 = vsyncpa [#allocation3 + $0x1], 1 }

</bundles_post_ra>
